<compile_context>
chip_gen: v5e
topology: v5e:2x2
jax: 0.10.0
libtpu: 0.0.40
codegen_flags: <defaults>
</compile_context>

<pallas_src>
import functools

import jax
import jax.numpy as jnp
from jax.experimental import pallas as pl
from jax.experimental.pallas import tpu as pltpu

BN_EPS = 1e-5
_VMEM_LIMIT_BYTES = 32 * 1024 * 1024  # above v5e's 16 MiB default, below v7x physical
_HALO_ROWS = 8                        # height of the 8-row halo blocks


def _choose_tile(H, candidates):
    """Largest candidate row-tile that evenly divides H (else the full H)."""
    for c in candidates:
        if H % c == 0:
            return c
    return H


# ----------------------------------------------------------------------------
# Kernel A: fused 3x3 "same" conv + bias + per-tile BatchNorm partial stats
# ----------------------------------------------------------------------------
def _conv_core(x_ref, top, bot, w_ref, b_ref, y_ref, s_ref, xpad_ref,
               *, W, Cin, Cout, TH):
    """Core conv for one (image, row-tile) grid step.

    x_ref : (Cin, TH, W)        f32 VMEM  input rows of this tile
    top   : (Cin, 1, W)         f32       row above the tile (zeros at border)
    bot   : (Cin, 1, W)         f32       row below the tile (zeros at border)
    w_ref : (Cout*Cin*9,)       f32 SMEM  conv weights (scalar reads)
    b_ref : (Cout,)             f32 SMEM  conv bias
    y_ref : (Cout, TH, W)       bf16      conv + bias output tile
    s_ref : (Cout, 2)           f32       [:,0]=sum, [:,1]=centered M2 (per tile)
    xpad_ref: (Cin, TH+2, W+2)  f32 VMEM  scratch, zero-padded image slab
    """
    # Assemble the zero-padded slab in VMEM (only borders + interior written).
    xpad_ref[:, 1:TH + 1, 1:W + 1] = x_ref[...]
    xpad_ref[:, 0:1, 1:W + 1] = top
    xpad_ref[:, TH + 1:TH + 2, 1:W + 1] = bot
    zero_col = jnp.zeros((Cin, TH + 2, 1), jnp.float32)
    xpad_ref[:, :, 0:1] = zero_col
    xpad_ref[:, :, W + 1:W + 2] = zero_col

    # 3x3 conv as Cin*9 scalar-broadcast FMAs per output channel on dense
    # (TH, W) tiles.  Each tap slice is loaded once and reused for both
    # output channels.  (MXU deliberately unused: Cout=2 -> <2% utilization.)
    accs = [jnp.full((TH, W), b_ref[co], jnp.float32) for co in range(Cout)]
    for ci in range(Cin):
        for kh in range(3):
            for kw in range(3):
                tap = xpad_ref[ci, kh:kh + TH, kw:kw + W]      # (TH, W) f32
                for co in range(Cout):
                    w = w_ref[(co * Cin + ci) * 9 + kh * 3 + kw]
                    accs[co] = accs[co] + w * tap

    # Store conv output (bf16 halves the y HBM round trip) and emit stable
    # per-tile BatchNorm partials: sum and centered second moment (M2).
    inv_npix = 1.0 / float(TH * W)
    rows = []
    for co in range(Cout):
        acc = accs[co]
        y_ref[co] = acc.astype(y_ref.dtype)
        s = jnp.sum(acc, keepdims=True)                              # (1, 1)
        m2 = jnp.sum(jnp.square(acc - s * inv_npix), keepdims=True)  # (1, 1)
        rows.append(jnp.concatenate([s, m2], axis=1))                # (1, 2)
    s_ref[...] = jnp.concatenate(rows, axis=0)                       # (Cout, 2)


def _conv_kernel_tiled(x_top_ref, x_mid_ref, x_bot_ref, w_ref, b_ref,
                       y_ref, s_ref, xpad_ref, *, W, Cin, Cout, TH, HB):
    """Row-tiled variant: halo rows come from neighbouring 8-row blocks."""
    t = pl.program_id(1)
    n_t = pl.num_programs(1)
    top_gate = (t > 0).astype(jnp.float32)            # zeros above first tile
    bot_gate = (t < n_t - 1).astype(jnp.float32)      # zeros below last tile
    top = x_top_ref[:, HB - 1:HB, :] * top_gate       # (Cin, 1, W)
    bot = x_bot_ref[:, 0:1, :] * bot_gate             # (Cin, 1, W)
    _conv_core(x_mid_ref, top, bot, w_ref, b_ref, y_ref, s_ref, xpad_ref,
               W=W, Cin=Cin, Cout=Cout, TH=TH)


def _conv_kernel_single(x_mid_ref, w_ref, b_ref, y_ref, s_ref, xpad_ref,
                        *, W, Cin, Cout, TH):
    """Whole-image-per-step variant (TH == H): halo rows are zeros."""
    zero_row = jnp.zeros((Cin, 1, W), jnp.float32)
    _conv_core(x_mid_ref, zero_row, zero_row, w_ref, b_ref, y_ref, s_ref,
               xpad_ref, W=W, Cin=Cin, Cout=Cout, TH=TH)


# ----------------------------------------------------------------------------
# Kernel B: BatchNorm scale/shift + 0.3 * sigmoid (tiled elementwise)
# ----------------------------------------------------------------------------
def _bn_sigmoid_kernel(y_ref, scale_ref, shift_ref, o_ref, *, Cout):
    """y_ref: (Cout, TH, W) bf16; scale/shift: (Cout,) f32 in SMEM; o: f32."""
    for co in range(Cout):
        z = y_ref[co].astype(jnp.float32) * scale_ref[co] + shift_ref[co]
        # sigmoid: exp on the EUP, approximate reciprocal also on the EUP slot.
        o_ref[co] = 0.3 * pl.reciprocal(1.0 + jnp.exp(-z), approx=True)


# ----------------------------------------------------------------------------
# Forward wrapper
# ----------------------------------------------------------------------------
def get_disp_forward(x, weight, bias, eps=BN_EPS):
    """x: (N, Cin, H, W) f32; weight: (2, Cin, 3, 3) f32; bias: (2,) f32.

    Returns (N, 2, H, W) f32, matching get_disp.forward (training-mode BN).
    """
    N, Cin, H, W = x.shape
    Cout = weight.shape[0]

    x = x.astype(jnp.float32)                                # native NCHW, no pad/copy
    w_flat = weight.astype(jnp.float32).reshape(-1)          # (Cout*Cin*9,) -> SMEM
    b_vec = bias.astype(jnp.float32).reshape(Cout)           # (Cout,)       -> SMEM

    # Row-tile for the conv kernel (must be a multiple of 8 to use 8-row halo
    # blocks; falls back to a single whole-image tile otherwise).
    TH = _choose_tile(H, (64, 32, 16, 8))
    n_t = H // TH
    HB = _HALO_ROWS

    smem_spec = pl.BlockSpec(memory_space=pltpu.MemorySpace.SMEM)
    x_mid_spec = pl.BlockSpec((None, Cin, TH, W), lambda n, t: (n, 0, t, 0))
    y_spec = pl.BlockSpec((None, Cout, TH, W), lambda n, t: (n, 0, t, 0))
    s_spec = pl.BlockSpec((None, None, Cout, 2), lambda n, t: (n, t, 0, 0))

    out_shape = (jax.ShapeDtypeStruct((N, Cout, H, W), jnp.bfloat16),
                 jax.ShapeDtypeStruct((N, n_t, Cout, 2), jnp.float32))
    scratch = [pltpu.VMEM((Cin, TH + 2, W + 2), jnp.float32)]
    cparams = pltpu.CompilerParams(
        dimension_semantics=("parallel", "parallel"),
        vmem_limit_bytes=_VMEM_LIMIT_BYTES)

    if n_t > 1:
        # Halo rows come from 8-row blocks of the neighbouring tiles; index
        # maps clamp at the image boundary and the kernel zeroes those rows.
        tpb = TH // HB                  # 8-row blocks per tile
        nhb = H // HB                   # 8-row blocks per image
        x_top_spec = pl.BlockSpec(
            (None, Cin, HB, W),
            lambda n, t: (n, 0, jnp.maximum(t * tpb - 1, 0), 0))
        x_bot_spec = pl.BlockSpec(
            (None, Cin, HB, W),
            lambda n, t: (n, 0, jnp.minimum((t + 1) * tpb, nhb - 1), 0))
        conv_kernel = functools.partial(
            _conv_kernel_tiled, W=W, Cin=Cin, Cout=Cout, TH=TH, HB=HB)
        y, stats = pl.pallas_call(
            conv_kernel,
            out_shape=out_shape,
            grid=(N, n_t),
            in_specs=[x_top_spec, x_mid_spec, x_bot_spec, smem_spec, smem_spec],
            out_specs=(y_spec, s_spec),
            scratch_shapes=scratch,
            compiler_params=cparams,
        )(x, x, x, w_flat, b_vec)
    else:
        conv_kernel = functools.partial(
            _conv_kernel_single, W=W, Cin=Cin, Cout=Cout, TH=TH)
        y, stats = pl.pallas_call(
            conv_kernel,
            out_shape=out_shape,
            grid=(N, n_t),
            in_specs=[x_mid_spec, smem_spec, smem_spec],
            out_specs=(y_spec, s_spec),
            scratch_shapes=scratch,
            compiler_params=cparams,
        )(x, w_flat, b_vec)

    # Exact training-mode BatchNorm2d statistics over (N, H, W) per channel,
    # combined from per-tile (sum, centered M2) partials (numerically stable).
    cnt_tile = float(TH * W)
    total = float(N * H * W)
    sums = stats[..., 0]                                   # (N, n_t, Cout)
    m2s = stats[..., 1]                                    # (N, n_t, Cout)
    mean = jnp.sum(sums, axis=(0, 1)) / total              # (Cout,)
    tile_mean = sums / cnt_tile
    m2 = jnp.sum(m2s, axis=(0, 1)) + cnt_tile * jnp.sum(
        jnp.square(tile_mean - mean), axis=(0, 1))
    var = m2 / total                                       # biased var (PyTorch norm)
    inv_std = jax.lax.rsqrt(var + eps)
    scale = inv_std.astype(jnp.float32)                    # (Cout,)
    shift = (-mean * inv_std).astype(jnp.float32)          # (Cout,)

    # Normalization + 0.3*sigmoid on large dense tiles.
    THB = _choose_tile(H, (256, 128, 64, 32, 16, 8))
    n_tb = H // THB
    bn_kernel = functools.partial(_bn_sigmoid_kernel, Cout=Cout)
    out = pl.pallas_call(
        bn_kernel,
        out_shape=jax.ShapeDtypeStruct((N, Cout, H, W), jnp.float32),
        grid=(N, n_tb),
        in_specs=[
            pl.BlockSpec((None, Cout, THB, W), lambda n, t: (n, 0, t, 0)),
            smem_spec,
            smem_spec,
        ],
        out_specs=pl.BlockSpec((None, Cout, THB, W), lambda n, t: (n, 0, t, 0)),
        compiler_params=cparams,
    )(y, scale, shift)
    return out


# ----------------------------------------------------------------------------
# Pure-JAX reference (full f32, same semantics as the PyTorch module)
# ----------------------------------------------------------------------------
def reference_forward(x, weight, bias, eps=BN_EPS):
    y = jax.lax.conv_general_dilated(
        x.astype(jnp.float32), weight.astype(jnp.float32),
        window_strides=(1, 1), padding=((1, 1), (1, 1)),
        dimension_numbers=("NCHW", "OIHW", "NCHW"))
    y = y + bias.reshape(1, -1, 1, 1)
    mean = jnp.mean(y, axis=(0, 2, 3), keepdims=True)
    var = jnp.mean(jnp.square(y - mean), axis=(0, 2, 3), keepdims=True)
    z = (y - mean) * jax.lax.rsqrt(var + eps)
    return 0.3 * jax.nn.sigmoid(z)


if __name__ == "__main__":
    key = jax.random.PRNGKey(0)
    kx, kw, kb = jax.random.split(key, 3)
    # get_disp in pydnet runs on 8-channel estimator feature maps.
    N, Cin, H, W = 2, 8, 16, 16
    x = jax.random.normal(kx, (N, Cin, H, W), jnp.float32)
    weight = jax.random.normal(kw, (2, Cin, 3, 3), jnp.float32) * 0.1
    bias = jax.random.normal(kb, (2,), jnp.float32) * 0.1

    fwd = jax.jit(get_disp_forward)
    out = jax.block_until_ready(fwd(x, weight, bias))

    assert out.shape == (N, 2, H, W), out.shape
    assert bool(jnp.all(jnp.isfinite(out)))
    # Output is 0.3 * sigmoid(...) -> in [0, 0.3]
    assert float(jnp.min(out)) >= 0.0 and float(jnp.max(out)) <= 0.3
    ref = reference_forward(x, weight, bias)
    err = float(jnp.max(jnp.abs(out - ref)))
    assert err < 2e-3, f"max |out - ref| = {err}"

    # Second shape exercises the H-tiled (halo) conv path: H=48 -> 3 row tiles.
    k2x, k2w, k2b = jax.random.split(jax.random.PRNGKey(1), 3)
    N2, C2, H2, W2 = 1, 3, 48, 16
    x2 = jax.random.normal(k2x, (N2, C2, H2, W2), jnp.float32)
    w2 = jax.random.normal(k2w, (2, C2, 3, 3), jnp.float32) * 0.1
    b2 = jax.random.normal(k2b, (2,), jnp.float32) * 0.1
    out2 = jax.block_until_ready(jax.jit(get_disp_forward)(x2, w2, b2))
    ref2 = reference_forward(x2, w2, b2)
    assert out2.shape == (N2, 2, H2, W2), out2.shape
    err2 = float(jnp.max(jnp.abs(out2 - ref2)))
    assert err2 < 2e-3, f"max |out2 - ref2| = {err2}"

    print("KERNEL_OK")
</pallas_src>

<mosaic_0001>
module attributes {stable_mosaic.version = 11 : i64} {
  func.func @_conv_kernel_single(%arg0: i32, %arg1: i32, %arg2: memref<1x8x16x16xf32, #tpu.memory_space<vmem>>, %arg3: memref<144xf32, #tpu.memory_space<smem>>, %arg4: memref<2xf32, #tpu.memory_space<smem>>, %arg5: memref<1x2x16x16xbf16, #tpu.memory_space<vmem>>, %arg6: memref<1x1x2x2xf32, #tpu.memory_space<vmem>>, %arg7: memref<8x18x18xf32, #tpu.memory_space<vmem>>) attributes {dimension_semantics = [#tpu.dimension_semantics<parallel>, #tpu.dimension_semantics<parallel>], iteration_bounds = array<i64: 2, 1>, scalar_prefetch = 0 : i64, scratch_operands = 1 : i64, tpu.core_type = #tpu.core_type<tc>, window_params = [{transform_indices = @transform_0, window_bounds = array<i64: 1, 8, 16, 16>}, {transform_indices = @transform_1, window_bounds = array<i64: 144>}, {transform_indices = @transform_2, window_bounds = array<i64: 2>}, {transform_indices = @transform_3, window_bounds = array<i64: 1, 2, 16, 16>}, {transform_indices = @transform_4, window_bounds = array<i64: 1, 1, 2, 2>}]} {
    %cst = arith.constant 0.000000e+00 : f32
    %0 = vector.broadcast %cst : f32 to vector<8x1x16xf32>
    %c0 = arith.constant 0 : index
    %c0_0 = arith.constant 0 : index
    %c0_1 = arith.constant 0 : index
    %c0_2 = arith.constant 0 : index
    %1 = vector.load %arg2[%c0, %c0_0, %c0_1, %c0_2] : memref<1x8x16x16xf32, #tpu.memory_space<vmem>>, vector<1x8x16x16xf32>
    %2 = vector.shape_cast %1 : vector<1x8x16x16xf32> to vector<8x16x16xf32>
    %c0_3 = arith.constant 0 : index
    %c1 = arith.constant 1 : index
    %c1_4 = arith.constant 1 : index
    %3 = vector.load %arg7[%c0_3, %c1, %c1_4] : memref<8x18x18xf32, #tpu.memory_space<vmem>>, vector<8x16x16xf32>
    tpu.vector_store %arg7[%c0_3, %c1, %c1_4], %2 {strides = array<i32>} : memref<8x18x18xf32, #tpu.memory_space<vmem>>, vector<8x16x16xf32>,
    %c0_5 = arith.constant 0 : index
    %c0_6 = arith.constant 0 : index
    %c1_7 = arith.constant 1 : index
    %4 = vector.load %arg7[%c0_5, %c0_6, %c1_7] : memref<8x18x18xf32, #tpu.memory_space<vmem>>, vector<8x1x16xf32>
    tpu.vector_store %arg7[%c0_5, %c0_6, %c1_7], %0 {strides = array<i32>} : memref<8x18x18xf32, #tpu.memory_space<vmem>>, vector<8x1x16xf32>,
    %c0_8 = arith.constant 0 : index
    %c17 = arith.constant 17 : index
    %c1_9 = arith.constant 1 : index
    %5 = vector.load %arg7[%c0_8, %c17, %c1_9] : memref<8x18x18xf32, #tpu.memory_space<vmem>>, vector<8x1x16xf32>
    tpu.vector_store %arg7[%c0_8, %c17, %c1_9], %0 {strides = array<i32>} : memref<8x18x18xf32, #tpu.memory_space<vmem>>, vector<8x1x16xf32>,
    %cst_10 = arith.constant 0.000000e+00 : f32
    %6 = vector.broadcast %cst_10 : f32 to vector<8x18x1xf32>
    %c0_11 = arith.constant 0 : index
    %c0_12 = arith.constant 0 : index
    %c0_13 = arith.constant 0 : index
    %7 = vector.load %arg7[%c0_11, %c0_12, %c0_13] : memref<8x18x18xf32, #tpu.memory_space<vmem>>, vector<8x18x1xf32>
    tpu.vector_store %arg7[%c0_11, %c0_12, %c0_13], %6 {strides = array<i32>} : memref<8x18x18xf32, #tpu.memory_space<vmem>>, vector<8x18x1xf32>,
    %c0_14 = arith.constant 0 : index
    %c0_15 = arith.constant 0 : index
    %c17_16 = arith.constant 17 : index
    %8 = vector.load %arg7[%c0_14, %c0_15, %c17_16] : memref<8x18x18xf32, #tpu.memory_space<vmem>>, vector<8x18x1xf32>
    tpu.vector_store %arg7[%c0_14, %c0_15, %c17_16], %6 {strides = array<i32>} : memref<8x18x18xf32, #tpu.memory_space<vmem>>, vector<8x18x1xf32>,
    %c0_17 = arith.constant 0 : index
    %9 = memref.load %arg4[%c0_17] : memref<2xf32, #tpu.memory_space<smem>>
    %10 = vector.broadcast %9 : f32 to vector<16x16xf32>
    %c1_18 = arith.constant 1 : index
    %11 = memref.load %arg4[%c1_18] : memref<2xf32, #tpu.memory_space<smem>>
    %12 = vector.broadcast %11 : f32 to vector<16x16xf32>
    %c0_19 = arith.constant 0 : index
    %c0_20 = arith.constant 0 : index
    %c0_21 = arith.constant 0 : index
    %13 = vector.load %arg7[%c0_19, %c0_20, %c0_21] : memref<8x18x18xf32, #tpu.memory_space<vmem>>, vector<1x16x16xf32>
    %14 = vector.shape_cast %13 : vector<1x16x16xf32> to vector<16x16xf32>
    %c0_22 = arith.constant 0 : index
    %15 = memref.load %arg3[%c0_22] : memref<144xf32, #tpu.memory_space<smem>>
    %16 = vector.broadcast %15 : f32 to vector<16x16xf32>
    %17 = arith.mulf %16, %14 : vector<16x16xf32>
    %18 = arith.addf %10, %17 : vector<16x16xf32>
    %c72 = arith.constant 72 : index
    %19 = memref.load %arg3[%c72] : memref<144xf32, #tpu.memory_space<smem>>
    %20 = vector.broadcast %19 : f32 to vector<16x16xf32>
    %21 = arith.mulf %20, %14 : vector<16x16xf32>
    %22 = arith.addf %12, %21 : vector<16x16xf32>
    %c0_23 = arith.constant 0 : index
    %c0_24 = arith.constant 0 : index
    %c1_25 = arith.constant 1 : index
    %23 = vector.load %arg7[%c0_23, %c0_24, %c1_25] : memref<8x18x18xf32, #tpu.memory_space<vmem>>, vector<1x16x16xf32>
    %24 = vector.shape_cast %23 : vector<1x16x16xf32> to vector<16x16xf32>
    %c1_26 = arith.constant 1 : index
    %25 = memref.load %arg3[%c1_26] : memref<144xf32, #tpu.memory_space<smem>>
    %26 = vector.broadcast %25 : f32 to vector<16x16xf32>
    %27 = arith.mulf %26, %24 : vector<16x16xf32>
    %28 = arith.addf %18, %27 : vector<16x16xf32>
    %c73 = arith.constant 73 : index
    %29 = memref.load %arg3[%c73] : memref<144xf32, #tpu.memory_space<smem>>
    %30 = vector.broadcast %29 : f32 to vector<16x16xf32>
    %31 = arith.mulf %30, %24 : vector<16x16xf32>
    %32 = arith.addf %22, %31 : vector<16x16xf32>
    %c0_27 = arith.constant 0 : index
    %c0_28 = arith.constant 0 : index
    %c2 = arith.constant 2 : index
    %33 = vector.load %arg7[%c0_27, %c0_28, %c2] : memref<8x18x18xf32, #tpu.memory_space<vmem>>, vector<1x16x16xf32>
    %34 = vector.shape_cast %33 : vector<1x16x16xf32> to vector<16x16xf32>
    %c2_29 = arith.constant 2 : index
    %35 = memref.load %arg3[%c2_29] : memref<144xf32, #tpu.memory_space<smem>>
    %36 = vector.broadcast %35 : f32 to vector<16x16xf32>
    %37 = arith.mulf %36, %34 : vector<16x16xf32>
    %38 = arith.addf %28, %37 : vector<16x16xf32>
    %c74 = arith.constant 74 : index
    %39 = memref.load %arg3[%c74] : memref<144xf32, #tpu.memory_space<smem>>
    %40 = vector.broadcast %39 : f32 to vector<16x16xf32>
    %41 = arith.mulf %40, %34 : vector<16x16xf32>
    %42 = arith.addf %32, %41 : vector<16x16xf32>
    %c0_30 = arith.constant 0 : index
    %c1_31 = arith.constant 1 : index
    %c0_32 = arith.constant 0 : index
    %43 = vector.load %arg7[%c0_30, %c1_31, %c0_32] : memref<8x18x18xf32, #tpu.memory_space<vmem>>, vector<1x16x16xf32>
    %44 = vector.shape_cast %43 : vector<1x16x16xf32> to vector<16x16xf32>
    %c3 = arith.constant 3 : index
    %45 = memref.load %arg3[%c3] : memref<144xf32, #tpu.memory_space<smem>>
    %46 = vector.broadcast %45 : f32 to vector<16x16xf32>
    %47 = arith.mulf %46, %44 : vector<16x16xf32>
    %48 = arith.addf %38, %47 : vector<16x16xf32>
    %c75 = arith.constant 75 : index
    %49 = memref.load %arg3[%c75] : memref<144xf32, #tpu.memory_space<smem>>
    %50 = vector.broadcast %49 : f32 to vector<16x16xf32>
    %51 = arith.mulf %50, %44 : vector<16x16xf32>
    %52 = arith.addf %42, %51 : vector<16x16xf32>
    %c0_33 = arith.constant 0 : index
    %c1_34 = arith.constant 1 : index
    %c1_35 = arith.constant 1 : index
    %53 = vector.load %arg7[%c0_33, %c1_34, %c1_35] : memref<8x18x18xf32, #tpu.memory_space<vmem>>, vector<1x16x16xf32>
    %54 = vector.shape_cast %53 : vector<1x16x16xf32> to vector<16x16xf32>
    %c4 = arith.constant 4 : index
    %55 = memref.load %arg3[%c4] : memref<144xf32, #tpu.memory_space<smem>>
    %56 = vector.broadcast %55 : f32 to vector<16x16xf32>
    %57 = arith.mulf %56, %54 : vector<16x16xf32>
    %58 = arith.addf %48, %57 : vector<16x16xf32>
    %c76 = arith.constant 76 : index
    %59 = memref.load %arg3[%c76] : memref<144xf32, #tpu.memory_space<smem>>
    %60 = vector.broadcast %59 : f32 to vector<16x16xf32>
    %61 = arith.mulf %60, %54 : vector<16x16xf32>
    %62 = arith.addf %52, %61 : vector<16x16xf32>
    %c0_36 = arith.constant 0 : index
    %c1_37 = arith.constant 1 : index
    %c2_38 = arith.constant 2 : index
    %63 = vector.load %arg7[%c0_36, %c1_37, %c2_38] : memref<8x18x18xf32, #tpu.memory_space<vmem>>, vector<1x16x16xf32>
    %64 = vector.shape_cast %63 : vector<1x16x16xf32> to vector<16x16xf32>
    %c5 = arith.constant 5 : index
    %65 = memref.load %arg3[%c5] : memref<144xf32, #tpu.memory_space<smem>>
    %66 = vector.broadcast %65 : f32 to vector<16x16xf32>
    %67 = arith.mulf %66, %64 : vector<16x16xf32>
    %68 = arith.addf %58, %67 : vector<16x16xf32>
    %c77 = arith.constant 77 : index
    %69 = memref.load %arg3[%c77] : memref<144xf32, #tpu.memory_space<smem>>
    %70 = vector.broadcast %69 : f32 to vector<16x16xf32>
    %71 = arith.mulf %70, %64 : vector<16x16xf32>
    %72 = arith.addf %62, %71 : vector<16x16xf32>
    %c0_39 = arith.constant 0 : index
    %c2_40 = arith.constant 2 : index
    %c0_41 = arith.constant 0 : index
    %73 = vector.load %arg7[%c0_39, %c2_40, %c0_41] : memref<8x18x18xf32, #tpu.memory_space<vmem>>, vector<1x16x16xf32>
    %74 = vector.shape_cast %73 : vector<1x16x16xf32> to vector<16x16xf32>
    %c6 = arith.constant 6 : index
    %75 = memref.load %arg3[%c6] : memref<144xf32, #tpu.memory_space<smem>>
    %76 = vector.broadcast %75 : f32 to vector<16x16xf32>
    %77 = arith.mulf %76, %74 : vector<16x16xf32>
    %78 = arith.addf %68, %77 : vector<16x16xf32>
    %c78 = arith.constant 78 : index
    %79 = memref.load %arg3[%c78] : memref<144xf32, #tpu.memory_space<smem>>
    %80 = vector.broadcast %79 : f32 to vector<16x16xf32>
    %81 = arith.mulf %80, %74 : vector<16x16xf32>
    %82 = arith.addf %72, %81 : vector<16x16xf32>
    %c0_42 = arith.constant 0 : index
    %c2_43 = arith.constant 2 : index
    %c1_44 = arith.constant 1 : index
    %83 = vector.load %arg7[%c0_42, %c2_43, %c1_44] : memref<8x18x18xf32, #tpu.memory_space<vmem>>, vector<1x16x16xf32>
    %84 = vector.shape_cast %83 : vector<1x16x16xf32> to vector<16x16xf32>
    %c7 = arith.constant 7 : index
    %85 = memref.load %arg3[%c7] : memref<144xf32, #tpu.memory_space<smem>>
    %86 = vector.broadcast %85 : f32 to vector<16x16xf32>
    %87 = arith.mulf %86, %84 : vector<16x16xf32>
    %88 = arith.addf %78, %87 : vector<16x16xf32>
    %c79 = arith.constant 79 : index
    %89 = memref.load %arg3[%c79] : memref<144xf32, #tpu.memory_space<smem>>
    %90 = vector.broadcast %89 : f32 to vector<16x16xf32>
    %91 = arith.mulf %90, %84 : vector<16x16xf32>
    %92 = arith.addf %82, %91 : vector<16x16xf32>
    %c0_45 = arith.constant 0 : index
    %c2_46 = arith.constant 2 : index
    %c2_47 = arith.constant 2 : index
    %93 = vector.load %arg7[%c0_45, %c2_46, %c2_47] : memref<8x18x18xf32, #tpu.memory_space<vmem>>, vector<1x16x16xf32>
    %94 = vector.shape_cast %93 : vector<1x16x16xf32> to vector<16x16xf32>
    %c8 = arith.constant 8 : index
    %95 = memref.load %arg3[%c8] : memref<144xf32, #tpu.memory_space<smem>>
    %96 = vector.broadcast %95 : f32 to vector<16x16xf32>
    %97 = arith.mulf %96, %94 : vector<16x16xf32>
    %98 = arith.addf %88, %97 : vector<16x16xf32>
    %c80 = arith.constant 80 : index
    %99 = memref.load %arg3[%c80] : memref<144xf32, #tpu.memory_space<smem>>
    %100 = vector.broadcast %99 : f32 to vector<16x16xf32>
    %101 = arith.mulf %100, %94 : vector<16x16xf32>
    %102 = arith.addf %92, %101 : vector<16x16xf32>
    %c1_48 = arith.constant 1 : index
    %c0_49 = arith.constant 0 : index
    %c0_50 = arith.constant 0 : index
    %103 = vector.load %arg7[%c1_48, %c0_49, %c0_50] : memref<8x18x18xf32, #tpu.memory_space<vmem>>, vector<1x16x16xf32>
    %104 = vector.shape_cast %103 : vector<1x16x16xf32> to vector<16x16xf32>
    %c9 = arith.constant 9 : index
    %105 = memref.load %arg3[%c9] : memref<144xf32, #tpu.memory_space<smem>>
    %106 = vector.broadcast %105 : f32 to vector<16x16xf32>
    %107 = arith.mulf %106, %104 : vector<16x16xf32>
    %108 = arith.addf %98, %107 : vector<16x16xf32>
    %c81 = arith.constant 81 : index
    %109 = memref.load %arg3[%c81] : memref<144xf32, #tpu.memory_space<smem>>
    %110 = vector.broadcast %109 : f32 to vector<16x16xf32>
    %111 = arith.mulf %110, %104 : vector<16x16xf32>
    %112 = arith.addf %102, %111 : vector<16x16xf32>
    %c1_51 = arith.constant 1 : index
    %c0_52 = arith.constant 0 : index
    %c1_53 = arith.constant 1 : index
    %113 = vector.load %arg7[%c1_51, %c0_52, %c1_53] : memref<8x18x18xf32, #tpu.memory_space<vmem>>, vector<1x16x16xf32>
    %114 = vector.shape_cast %113 : vector<1x16x16xf32> to vector<16x16xf32>
    %c10 = arith.constant 10 : index
    %115 = memref.load %arg3[%c10] : memref<144xf32, #tpu.memory_space<smem>>
    %116 = vector.broadcast %115 : f32 to vector<16x16xf32>
    %117 = arith.mulf %116, %114 : vector<16x16xf32>
    %118 = arith.addf %108, %117 : vector<16x16xf32>
    %c82 = arith.constant 82 : index
    %119 = memref.load %arg3[%c82] : memref<144xf32, #tpu.memory_space<smem>>
    %120 = vector.broadcast %119 : f32 to vector<16x16xf32>
    %121 = arith.mulf %120, %114 : vector<16x16xf32>
    %122 = arith.addf %112, %121 : vector<16x16xf32>
    %c1_54 = arith.constant 1 : index
    %c0_55 = arith.constant 0 : index
    %c2_56 = arith.constant 2 : index
    %123 = vector.load %arg7[%c1_54, %c0_55, %c2_56] : memref<8x18x18xf32, #tpu.memory_space<vmem>>, vector<1x16x16xf32>
    %124 = vector.shape_cast %123 : vector<1x16x16xf32> to vector<16x16xf32>
    %c11 = arith.constant 11 : index
    %125 = memref.load %arg3[%c11] : memref<144xf32, #tpu.memory_space<smem>>
    %126 = vector.broadcast %125 : f32 to vector<16x16xf32>
    %127 = arith.mulf %126, %124 : vector<16x16xf32>
    %128 = arith.addf %118, %127 : vector<16x16xf32>
    %c83 = arith.constant 83 : index
    %129 = memref.load %arg3[%c83] : memref<144xf32, #tpu.memory_space<smem>>
    %130 = vector.broadcast %129 : f32 to vector<16x16xf32>
    %131 = arith.mulf %130, %124 : vector<16x16xf32>
    %132 = arith.addf %122, %131 : vector<16x16xf32>
    %c1_57 = arith.constant 1 : index
    %c1_58 = arith.constant 1 : index
    %c0_59 = arith.constant 0 : index
    %133 = vector.load %arg7[%c1_57, %c1_58, %c0_59] : memref<8x18x18xf32, #tpu.memory_space<vmem>>, vector<1x16x16xf32>
    %134 = vector.shape_cast %133 : vector<1x16x16xf32> to vector<16x16xf32>
    %c12 = arith.constant 12 : index
    %135 = memref.load %arg3[%c12] : memref<144xf32, #tpu.memory_space<smem>>
    %136 = vector.broadcast %135 : f32 to vector<16x16xf32>
    %137 = arith.mulf %136, %134 : vector<16x16xf32>
    %138 = arith.addf %128, %137 : vector<16x16xf32>
    %c84 = arith.constant 84 : index
    %139 = memref.load %arg3[%c84] : memref<144xf32, #tpu.memory_space<smem>>
    %140 = vector.broadcast %139 : f32 to vector<16x16xf32>
    %141 = arith.mulf %140, %134 : vector<16x16xf32>
    %142 = arith.addf %132, %141 : vector<16x16xf32>
    %c1_60 = arith.constant 1 : index
    %c1_61 = arith.constant 1 : index
    %c1_62 = arith.constant 1 : index
    %143 = vector.load %arg7[%c1_60, %c1_61, %c1_62] : memref<8x18x18xf32, #tpu.memory_space<vmem>>, vector<1x16x16xf32>
    %144 = vector.shape_cast %143 : vector<1x16x16xf32> to vector<16x16xf32>
    %c13 = arith.constant 13 : index
    %145 = memref.load %arg3[%c13] : memref<144xf32, #tpu.memory_space<smem>>
    %146 = vector.broadcast %145 : f32 to vector<16x16xf32>
    %147 = arith.mulf %146, %144 : vector<16x16xf32>
    %148 = arith.addf %138, %147 : vector<16x16xf32>
    %c85 = arith.constant 85 : index
    %149 = memref.load %arg3[%c85] : memref<144xf32, #tpu.memory_space<smem>>
    %150 = vector.broadcast %149 : f32 to vector<16x16xf32>
    %151 = arith.mulf %150, %144 : vector<16x16xf32>
    %152 = arith.addf %142, %151 : vector<16x16xf32>
    %c1_63 = arith.constant 1 : index
    %c1_64 = arith.constant 1 : index
    %c2_65 = arith.constant 2 : index
    %153 = vector.load %arg7[%c1_63, %c1_64, %c2_65] : memref<8x18x18xf32, #tpu.memory_space<vmem>>, vector<1x16x16xf32>
    %154 = vector.shape_cast %153 : vector<1x16x16xf32> to vector<16x16xf32>
    %c14 = arith.constant 14 : index
    %155 = memref.load %arg3[%c14] : memref<144xf32, #tpu.memory_space<smem>>
    %156 = vector.broadcast %155 : f32 to vector<16x16xf32>
    %157 = arith.mulf %156, %154 : vector<16x16xf32>
    %158 = arith.addf %148, %157 : vector<16x16xf32>
    %c86 = arith.constant 86 : index
    %159 = memref.load %arg3[%c86] : memref<144xf32, #tpu.memory_space<smem>>
    %160 = vector.broadcast %159 : f32 to vector<16x16xf32>
    %161 = arith.mulf %160, %154 : vector<16x16xf32>
    %162 = arith.addf %152, %161 : vector<16x16xf32>
    %c1_66 = arith.constant 1 : index
    %c2_67 = arith.constant 2 : index
    %c0_68 = arith.constant 0 : index
    %163 = vector.load %arg7[%c1_66, %c2_67, %c0_68] : memref<8x18x18xf32, #tpu.memory_space<vmem>>, vector<1x16x16xf32>
    %164 = vector.shape_cast %163 : vector<1x16x16xf32> to vector<16x16xf32>
    %c15 = arith.constant 15 : index
    %165 = memref.load %arg3[%c15] : memref<144xf32, #tpu.memory_space<smem>>
    %166 = vector.broadcast %165 : f32 to vector<16x16xf32>
    %167 = arith.mulf %166, %164 : vector<16x16xf32>
    %168 = arith.addf %158, %167 : vector<16x16xf32>
    %c87 = arith.constant 87 : index
    %169 = memref.load %arg3[%c87] : memref<144xf32, #tpu.memory_space<smem>>
    %170 = vector.broadcast %169 : f32 to vector<16x16xf32>
    %171 = arith.mulf %170, %164 : vector<16x16xf32>
    %172 = arith.addf %162, %171 : vector<16x16xf32>
    %c1_69 = arith.constant 1 : index
    %c2_70 = arith.constant 2 : index
    %c1_71 = arith.constant 1 : index
    %173 = vector.load %arg7[%c1_69, %c2_70, %c1_71] : memref<8x18x18xf32, #tpu.memory_space<vmem>>, vector<1x16x16xf32>
    %174 = vector.shape_cast %173 : vector<1x16x16xf32> to vector<16x16xf32>
    %c16 = arith.constant 16 : index
    %175 = memref.load %arg3[%c16] : memref<144xf32, #tpu.memory_space<smem>>
    %176 = vector.broadcast %175 : f32 to vector<16x16xf32>
    %177 = arith.mulf %176, %174 : vector<16x16xf32>
    %178 = arith.addf %168, %177 : vector<16x16xf32>
    %c88 = arith.constant 88 : index
    %179 = memref.load %arg3[%c88] : memref<144xf32, #tpu.memory_space<smem>>
    %180 = vector.broadcast %179 : f32 to vector<16x16xf32>
    %181 = arith.mulf %180, %174 : vector<16x16xf32>
    %182 = arith.addf %172, %181 : vector<16x16xf32>
    %c1_72 = arith.constant 1 : index
    %c2_73 = arith.constant 2 : index
    %c2_74 = arith.constant 2 : index
    %183 = vector.load %arg7[%c1_72, %c2_73, %c2_74] : memref<8x18x18xf32, #tpu.memory_space<vmem>>, vector<1x16x16xf32>
    %184 = vector.shape_cast %183 : vector<1x16x16xf32> to vector<16x16xf32>
    %c17_75 = arith.constant 17 : index
    %185 = memref.load %arg3[%c17_75] : memref<144xf32, #tpu.memory_space<smem>>
    %186 = vector.broadcast %185 : f32 to vector<16x16xf32>
    %187 = arith.mulf %186, %184 : vector<16x16xf32>
    %188 = arith.addf %178, %187 : vector<16x16xf32>
    %c89 = arith.constant 89 : index
    %189 = memref.load %arg3[%c89] : memref<144xf32, #tpu.memory_space<smem>>
    %190 = vector.broadcast %189 : f32 to vector<16x16xf32>
    %191 = arith.mulf %190, %184 : vector<16x16xf32>
    %192 = arith.addf %182, %191 : vector<16x16xf32>
    %c2_76 = arith.constant 2 : index
    %c0_77 = arith.constant 0 : index
    %c0_78 = arith.constant 0 : index
    %193 = vector.load %arg7[%c2_76, %c0_77, %c0_78] : memref<8x18x18xf32, #tpu.memory_space<vmem>>, vector<1x16x16xf32>
    %194 = vector.shape_cast %193 : vector<1x16x16xf32> to vector<16x16xf32>
    %c18 = arith.constant 18 : index
    %195 = memref.load %arg3[%c18] : memref<144xf32, #tpu.memory_space<smem>>
    %196 = vector.broadcast %195 : f32 to vector<16x16xf32>
    %197 = arith.mulf %196, %194 : vector<16x16xf32>
    %198 = arith.addf %188, %197 : vector<16x16xf32>
    %c90 = arith.constant 90 : index
    %199 = memref.load %arg3[%c90] : memref<144xf32, #tpu.memory_space<smem>>
    %200 = vector.broadcast %199 : f32 to vector<16x16xf32>
    %201 = arith.mulf %200, %194 : vector<16x16xf32>
    %202 = arith.addf %192, %201 : vector<16x16xf32>
    %c2_79 = arith.constant 2 : index
    %c0_80 = arith.constant 0 : index
    %c1_81 = arith.constant 1 : index
    %203 = vector.load %arg7[%c2_79, %c0_80, %c1_81] : memref<8x18x18xf32, #tpu.memory_space<vmem>>, vector<1x16x16xf32>
    %204 = vector.shape_cast %203 : vector<1x16x16xf32> to vector<16x16xf32>
    %c19 = arith.constant 19 : index
    %205 = memref.load %arg3[%c19] : memref<144xf32, #tpu.memory_space<smem>>
    %206 = vector.broadcast %205 : f32 to vector<16x16xf32>
    %207 = arith.mulf %206, %204 : vector<16x16xf32>
    %208 = arith.addf %198, %207 : vector<16x16xf32>
    %c91 = arith.constant 91 : index
    %209 = memref.load %arg3[%c91] : memref<144xf32, #tpu.memory_space<smem>>
    %210 = vector.broadcast %209 : f32 to vector<16x16xf32>
    %211 = arith.mulf %210, %204 : vector<16x16xf32>
    %212 = arith.addf %202, %211 : vector<16x16xf32>
    %c2_82 = arith.constant 2 : index
    %c0_83 = arith.constant 0 : index
    %c2_84 = arith.constant 2 : index
    %213 = vector.load %arg7[%c2_82, %c0_83, %c2_84] : memref<8x18x18xf32, #tpu.memory_space<vmem>>, vector<1x16x16xf32>
    %214 = vector.shape_cast %213 : vector<1x16x16xf32> to vector<16x16xf32>
    %c20 = arith.constant 20 : index
    %215 = memref.load %arg3[%c20] : memref<144xf32, #tpu.memory_space<smem>>
    %216 = vector.broadcast %215 : f32 to vector<16x16xf32>
    %217 = arith.mulf %216, %214 : vector<16x16xf32>
    %218 = arith.addf %208, %217 : vector<16x16xf32>
    %c92 = arith.constant 92 : index
    %219 = memref.load %arg3[%c92] : memref<144xf32, #tpu.memory_space<smem>>
    %220 = vector.broadcast %219 : f32 to vector<16x16xf32>
    %221 = arith.mulf %220, %214 : vector<16x16xf32>
    %222 = arith.addf %212, %221 : vector<16x16xf32>
    %c2_85 = arith.constant 2 : index
    %c1_86 = arith.constant 1 : index
    %c0_87 = arith.constant 0 : index
    %223 = vector.load %arg7[%c2_85, %c1_86, %c0_87] : memref<8x18x18xf32, #tpu.memory_space<vmem>>, vector<1x16x16xf32>
    %224 = vector.shape_cast %223 : vector<1x16x16xf32> to vector<16x16xf32>
    %c21 = arith.constant 21 : index
    %225 = memref.load %arg3[%c21] : memref<144xf32, #tpu.memory_space<smem>>
    %226 = vector.broadcast %225 : f32 to vector<16x16xf32>
    %227 = arith.mulf %226, %224 : vector<16x16xf32>
    %228 = arith.addf %218, %227 : vector<16x16xf32>
    %c93 = arith.constant 93 : index
    %229 = memref.load %arg3[%c93] : memref<144xf32, #tpu.memory_space<smem>>
    %230 = vector.broadcast %229 : f32 to vector<16x16xf32>
    %231 = arith.mulf %230, %224 : vector<16x16xf32>
    %232 = arith.addf %222, %231 : vector<16x16xf32>
    %c2_88 = arith.constant 2 : index
    %c1_89 = arith.constant 1 : index
    %c1_90 = arith.constant 1 : index
    %233 = vector.load %arg7[%c2_88, %c1_89, %c1_90] : memref<8x18x18xf32, #tpu.memory_space<vmem>>, vector<1x16x16xf32>
    %234 = vector.shape_cast %233 : vector<1x16x16xf32> to vector<16x16xf32>
    %c22 = arith.constant 22 : index
    %235 = memref.load %arg3[%c22] : memref<144xf32, #tpu.memory_space<smem>>
    %236 = vector.broadcast %235 : f32 to vector<16x16xf32>
    %237 = arith.mulf %236, %234 : vector<16x16xf32>
    %238 = arith.addf %228, %237 : vector<16x16xf32>
    %c94 = arith.constant 94 : index
    %239 = memref.load %arg3[%c94] : memref<144xf32, #tpu.memory_space<smem>>
    %240 = vector.broadcast %239 : f32 to vector<16x16xf32>
    %241 = arith.mulf %240, %234 : vector<16x16xf32>
    %242 = arith.addf %232, %241 : vector<16x16xf32>
    %c2_91 = arith.constant 2 : index
    %c1_92 = arith.constant 1 : index
    %c2_93 = arith.constant 2 : index
    %243 = vector.load %arg7[%c2_91, %c1_92, %c2_93] : memref<8x18x18xf32, #tpu.memory_space<vmem>>, vector<1x16x16xf32>
    %244 = vector.shape_cast %243 : vector<1x16x16xf32> to vector<16x16xf32>
    %c23 = arith.constant 23 : index
    %245 = memref.load %arg3[%c23] : memref<144xf32, #tpu.memory_space<smem>>
    %246 = vector.broadcast %245 : f32 to vector<16x16xf32>
    %247 = arith.mulf %246, %244 : vector<16x16xf32>
    %248 = arith.addf %238, %247 : vector<16x16xf32>
    %c95 = arith.constant 95 : index
    %249 = memref.load %arg3[%c95] : memref<144xf32, #tpu.memory_space<smem>>
    %250 = vector.broadcast %249 : f32 to vector<16x16xf32>
    %251 = arith.mulf %250, %244 : vector<16x16xf32>
    %252 = arith.addf %242, %251 : vector<16x16xf32>
    %c2_94 = arith.constant 2 : index
    %c2_95 = arith.constant 2 : index
    %c0_96 = arith.constant 0 : index
    %253 = vector.load %arg7[%c2_94, %c2_95, %c0_96] : memref<8x18x18xf32, #tpu.memory_space<vmem>>, vector<1x16x16xf32>
    %254 = vector.shape_cast %253 : vector<1x16x16xf32> to vector<16x16xf32>
    %c24 = arith.constant 24 : index
    %255 = memref.load %arg3[%c24] : memref<144xf32, #tpu.memory_space<smem>>
    %256 = vector.broadcast %255 : f32 to vector<16x16xf32>
    %257 = arith.mulf %256, %254 : vector<16x16xf32>
    %258 = arith.addf %248, %257 : vector<16x16xf32>
    %c96 = arith.constant 96 : index
    %259 = memref.load %arg3[%c96] : memref<144xf32, #tpu.memory_space<smem>>
    %260 = vector.broadcast %259 : f32 to vector<16x16xf32>
    %261 = arith.mulf %260, %254 : vector<16x16xf32>
    %262 = arith.addf %252, %261 : vector<16x16xf32>
    %c2_97 = arith.constant 2 : index
    %c2_98 = arith.constant 2 : index
    %c1_99 = arith.constant 1 : index
    %263 = vector.load %arg7[%c2_97, %c2_98, %c1_99] : memref<8x18x18xf32, #tpu.memory_space<vmem>>, vector<1x16x16xf32>
    %264 = vector.shape_cast %263 : vector<1x16x16xf32> to vector<16x16xf32>
    %c25 = arith.constant 25 : index
    %265 = memref.load %arg3[%c25] : memref<144xf32, #tpu.memory_space<smem>>
    %266 = vector.broadcast %265 : f32 to vector<16x16xf32>
    %267 = arith.mulf %266, %264 : vector<16x16xf32>
    %268 = arith.addf %258, %267 : vector<16x16xf32>
    %c97 = arith.constant 97 : index
    %269 = memref.load %arg3[%c97] : memref<144xf32, #tpu.memory_space<smem>>
    %270 = vector.broadcast %269 : f32 to vector<16x16xf32>
    %271 = arith.mulf %270, %264 : vector<16x16xf32>
    %272 = arith.addf %262, %271 : vector<16x16xf32>
    %c2_100 = arith.constant 2 : index
    %c2_101 = arith.constant 2 : index
    %c2_102 = arith.constant 2 : index
    %273 = vector.load %arg7[%c2_100, %c2_101, %c2_102] : memref<8x18x18xf32, #tpu.memory_space<vmem>>, vector<1x16x16xf32>
    %274 = vector.shape_cast %273 : vector<1x16x16xf32> to vector<16x16xf32>
    %c26 = arith.constant 26 : index
    %275 = memref.load %arg3[%c26] : memref<144xf32, #tpu.memory_space<smem>>
    %276 = vector.broadcast %275 : f32 to vector<16x16xf32>
    %277 = arith.mulf %276, %274 : vector<16x16xf32>
    %278 = arith.addf %268, %277 : vector<16x16xf32>
    %c98 = arith.constant 98 : index
    %279 = memref.load %arg3[%c98] : memref<144xf32, #tpu.memory_space<smem>>
    %280 = vector.broadcast %279 : f32 to vector<16x16xf32>
    %281 = arith.mulf %280, %274 : vector<16x16xf32>
    %282 = arith.addf %272, %281 : vector<16x16xf32>
    %c3_103 = arith.constant 3 : index
    %c0_104 = arith.constant 0 : index
    %c0_105 = arith.constant 0 : index
    %283 = vector.load %arg7[%c3_103, %c0_104, %c0_105] : memref<8x18x18xf32, #tpu.memory_space<vmem>>, vector<1x16x16xf32>
    %284 = vector.shape_cast %283 : vector<1x16x16xf32> to vector<16x16xf32>
    %c27 = arith.constant 27 : index
    %285 = memref.load %arg3[%c27] : memref<144xf32, #tpu.memory_space<smem>>
    %286 = vector.broadcast %285 : f32 to vector<16x16xf32>
    %287 = arith.mulf %286, %284 : vector<16x16xf32>
    %288 = arith.addf %278, %287 : vector<16x16xf32>
    %c99 = arith.constant 99 : index
    %289 = memref.load %arg3[%c99] : memref<144xf32, #tpu.memory_space<smem>>
    %290 = vector.broadcast %289 : f32 to vector<16x16xf32>
    %291 = arith.mulf %290, %284 : vector<16x16xf32>
    %292 = arith.addf %282, %291 : vector<16x16xf32>
    %c3_106 = arith.constant 3 : index
    %c0_107 = arith.constant 0 : index
    %c1_108 = arith.constant 1 : index
    %293 = vector.load %arg7[%c3_106, %c0_107, %c1_108] : memref<8x18x18xf32, #tpu.memory_space<vmem>>, vector<1x16x16xf32>
    %294 = vector.shape_cast %293 : vector<1x16x16xf32> to vector<16x16xf32>
    %c28 = arith.constant 28 : index
    %295 = memref.load %arg3[%c28] : memref<144xf32, #tpu.memory_space<smem>>
    %296 = vector.broadcast %295 : f32 to vector<16x16xf32>
    %297 = arith.mulf %296, %294 : vector<16x16xf32>
    %298 = arith.addf %288, %297 : vector<16x16xf32>
    %c100 = arith.constant 100 : index
    %299 = memref.load %arg3[%c100] : memref<144xf32, #tpu.memory_space<smem>>
    %300 = vector.broadcast %299 : f32 to vector<16x16xf32>
    %301 = arith.mulf %300, %294 : vector<16x16xf32>
    %302 = arith.addf %292, %301 : vector<16x16xf32>
    %c3_109 = arith.constant 3 : index
    %c0_110 = arith.constant 0 : index
    %c2_111 = arith.constant 2 : index
    %303 = vector.load %arg7[%c3_109, %c0_110, %c2_111] : memref<8x18x18xf32, #tpu.memory_space<vmem>>, vector<1x16x16xf32>
    %304 = vector.shape_cast %303 : vector<1x16x16xf32> to vector<16x16xf32>
    %c29 = arith.constant 29 : index
    %305 = memref.load %arg3[%c29] : memref<144xf32, #tpu.memory_space<smem>>
    %306 = vector.broadcast %305 : f32 to vector<16x16xf32>
    %307 = arith.mulf %306, %304 : vector<16x16xf32>
    %308 = arith.addf %298, %307 : vector<16x16xf32>
    %c101 = arith.constant 101 : index
    %309 = memref.load %arg3[%c101] : memref<144xf32, #tpu.memory_space<smem>>
    %310 = vector.broadcast %309 : f32 to vector<16x16xf32>
    %311 = arith.mulf %310, %304 : vector<16x16xf32>
    %312 = arith.addf %302, %311 : vector<16x16xf32>
    %c3_112 = arith.constant 3 : index
    %c1_113 = arith.constant 1 : index
    %c0_114 = arith.constant 0 : index
    %313 = vector.load %arg7[%c3_112, %c1_113, %c0_114] : memref<8x18x18xf32, #tpu.memory_space<vmem>>, vector<1x16x16xf32>
    %314 = vector.shape_cast %313 : vector<1x16x16xf32> to vector<16x16xf32>
    %c30 = arith.constant 30 : index
    %315 = memref.load %arg3[%c30] : memref<144xf32, #tpu.memory_space<smem>>
    %316 = vector.broadcast %315 : f32 to vector<16x16xf32>
    %317 = arith.mulf %316, %314 : vector<16x16xf32>
    %318 = arith.addf %308, %317 : vector<16x16xf32>
    %c102 = arith.constant 102 : index
    %319 = memref.load %arg3[%c102] : memref<144xf32, #tpu.memory_space<smem>>
    %320 = vector.broadcast %319 : f32 to vector<16x16xf32>
    %321 = arith.mulf %320, %314 : vector<16x16xf32>
    %322 = arith.addf %312, %321 : vector<16x16xf32>
    %c3_115 = arith.constant 3 : index
    %c1_116 = arith.constant 1 : index
    %c1_117 = arith.constant 1 : index
    %323 = vector.load %arg7[%c3_115, %c1_116, %c1_117] : memref<8x18x18xf32, #tpu.memory_space<vmem>>, vector<1x16x16xf32>
    %324 = vector.shape_cast %323 : vector<1x16x16xf32> to vector<16x16xf32>
    %c31 = arith.constant 31 : index
    %325 = memref.load %arg3[%c31] : memref<144xf32, #tpu.memory_space<smem>>
    %326 = vector.broadcast %325 : f32 to vector<16x16xf32>
    %327 = arith.mulf %326, %324 : vector<16x16xf32>
    %328 = arith.addf %318, %327 : vector<16x16xf32>
    %c103 = arith.constant 103 : index
    %329 = memref.load %arg3[%c103] : memref<144xf32, #tpu.memory_space<smem>>
    %330 = vector.broadcast %329 : f32 to vector<16x16xf32>
    %331 = arith.mulf %330, %324 : vector<16x16xf32>
    %332 = arith.addf %322, %331 : vector<16x16xf32>
    %c3_118 = arith.constant 3 : index
    %c1_119 = arith.constant 1 : index
    %c2_120 = arith.constant 2 : index
    %333 = vector.load %arg7[%c3_118, %c1_119, %c2_120] : memref<8x18x18xf32, #tpu.memory_space<vmem>>, vector<1x16x16xf32>
    %334 = vector.shape_cast %333 : vector<1x16x16xf32> to vector<16x16xf32>
    %c32 = arith.constant 32 : index
    %335 = memref.load %arg3[%c32] : memref<144xf32, #tpu.memory_space<smem>>
    %336 = vector.broadcast %335 : f32 to vector<16x16xf32>
    %337 = arith.mulf %336, %334 : vector<16x16xf32>
    %338 = arith.addf %328, %337 : vector<16x16xf32>
    %c104 = arith.constant 104 : index
    %339 = memref.load %arg3[%c104] : memref<144xf32, #tpu.memory_space<smem>>
    %340 = vector.broadcast %339 : f32 to vector<16x16xf32>
    %341 = arith.mulf %340, %334 : vector<16x16xf32>
    %342 = arith.addf %332, %341 : vector<16x16xf32>
    %c3_121 = arith.constant 3 : index
    %c2_122 = arith.constant 2 : index
    %c0_123 = arith.constant 0 : index
    %343 = vector.load %arg7[%c3_121, %c2_122, %c0_123] : memref<8x18x18xf32, #tpu.memory_space<vmem>>, vector<1x16x16xf32>
    %344 = vector.shape_cast %343 : vector<1x16x16xf32> to vector<16x16xf32>
    %c33 = arith.constant 33 : index
    %345 = memref.load %arg3[%c33] : memref<144xf32, #tpu.memory_space<smem>>
    %346 = vector.broadcast %345 : f32 to vector<16x16xf32>
    %347 = arith.mulf %346, %344 : vector<16x16xf32>
    %348 = arith.addf %338, %347 : vector<16x16xf32>
    %c105 = arith.constant 105 : index
    %349 = memref.load %arg3[%c105] : memref<144xf32, #tpu.memory_space<smem>>
    %350 = vector.broadcast %349 : f32 to vector<16x16xf32>
    %351 = arith.mulf %350, %344 : vector<16x16xf32>
    %352 = arith.addf %342, %351 : vector<16x16xf32>
    %c3_124 = arith.constant 3 : index
    %c2_125 = arith.constant 2 : index
    %c1_126 = arith.constant 1 : index
    %353 = vector.load %arg7[%c3_124, %c2_125, %c1_126] : memref<8x18x18xf32, #tpu.memory_space<vmem>>, vector<1x16x16xf32>
    %354 = vector.shape_cast %353 : vector<1x16x16xf32> to vector<16x16xf32>
    %c34 = arith.constant 34 : index
    %355 = memref.load %arg3[%c34] : memref<144xf32, #tpu.memory_space<smem>>
    %356 = vector.broadcast %355 : f32 to vector<16x16xf32>
    %357 = arith.mulf %356, %354 : vector<16x16xf32>
    %358 = arith.addf %348, %357 : vector<16x16xf32>
    %c106 = arith.constant 106 : index
    %359 = memref.load %arg3[%c106] : memref<144xf32, #tpu.memory_space<smem>>
    %360 = vector.broadcast %359 : f32 to vector<16x16xf32>
    %361 = arith.mulf %360, %354 : vector<16x16xf32>
    %362 = arith.addf %352, %361 : vector<16x16xf32>
    %c3_127 = arith.constant 3 : index
    %c2_128 = arith.constant 2 : index
    %c2_129 = arith.constant 2 : index
    %363 = vector.load %arg7[%c3_127, %c2_128, %c2_129] : memref<8x18x18xf32, #tpu.memory_space<vmem>>, vector<1x16x16xf32>
    %364 = vector.shape_cast %363 : vector<1x16x16xf32> to vector<16x16xf32>
    %c35 = arith.constant 35 : index
    %365 = memref.load %arg3[%c35] : memref<144xf32, #tpu.memory_space<smem>>
    %366 = vector.broadcast %365 : f32 to vector<16x16xf32>
    %367 = arith.mulf %366, %364 : vector<16x16xf32>
    %368 = arith.addf %358, %367 : vector<16x16xf32>
    %c107 = arith.constant 107 : index
    %369 = memref.load %arg3[%c107] : memref<144xf32, #tpu.memory_space<smem>>
    %370 = vector.broadcast %369 : f32 to vector<16x16xf32>
    %371 = arith.mulf %370, %364 : vector<16x16xf32>
    %372 = arith.addf %362, %371 : vector<16x16xf32>
    %c4_130 = arith.constant 4 : index
    %c0_131 = arith.constant 0 : index
    %c0_132 = arith.constant 0 : index
    %373 = vector.load %arg7[%c4_130, %c0_131, %c0_132] : memref<8x18x18xf32, #tpu.memory_space<vmem>>, vector<1x16x16xf32>
    %374 = vector.shape_cast %373 : vector<1x16x16xf32> to vector<16x16xf32>
    %c36 = arith.constant 36 : index
    %375 = memref.load %arg3[%c36] : memref<144xf32, #tpu.memory_space<smem>>
    %376 = vector.broadcast %375 : f32 to vector<16x16xf32>
    %377 = arith.mulf %376, %374 : vector<16x16xf32>
    %378 = arith.addf %368, %377 : vector<16x16xf32>
    %c108 = arith.constant 108 : index
    %379 = memref.load %arg3[%c108] : memref<144xf32, #tpu.memory_space<smem>>
    %380 = vector.broadcast %379 : f32 to vector<16x16xf32>
    %381 = arith.mulf %380, %374 : vector<16x16xf32>
    %382 = arith.addf %372, %381 : vector<16x16xf32>
    %c4_133 = arith.constant 4 : index
    %c0_134 = arith.constant 0 : index
    %c1_135 = arith.constant 1 : index
    %383 = vector.load %arg7[%c4_133, %c0_134, %c1_135] : memref<8x18x18xf32, #tpu.memory_space<vmem>>, vector<1x16x16xf32>
    %384 = vector.shape_cast %383 : vector<1x16x16xf32> to vector<16x16xf32>
    %c37 = arith.constant 37 : index
    %385 = memref.load %arg3[%c37] : memref<144xf32, #tpu.memory_space<smem>>
    %386 = vector.broadcast %385 : f32 to vector<16x16xf32>
    %387 = arith.mulf %386, %384 : vector<16x16xf32>
    %388 = arith.addf %378, %387 : vector<16x16xf32>
    %c109 = arith.constant 109 : index
    %389 = memref.load %arg3[%c109] : memref<144xf32, #tpu.memory_space<smem>>
    %390 = vector.broadcast %389 : f32 to vector<16x16xf32>
    %391 = arith.mulf %390, %384 : vector<16x16xf32>
    %392 = arith.addf %382, %391 : vector<16x16xf32>
    %c4_136 = arith.constant 4 : index
    %c0_137 = arith.constant 0 : index
    %c2_138 = arith.constant 2 : index
    %393 = vector.load %arg7[%c4_136, %c0_137, %c2_138] : memref<8x18x18xf32, #tpu.memory_space<vmem>>, vector<1x16x16xf32>
    %394 = vector.shape_cast %393 : vector<1x16x16xf32> to vector<16x16xf32>
    %c38 = arith.constant 38 : index
    %395 = memref.load %arg3[%c38] : memref<144xf32, #tpu.memory_space<smem>>
    %396 = vector.broadcast %395 : f32 to vector<16x16xf32>
    %397 = arith.mulf %396, %394 : vector<16x16xf32>
    %398 = arith.addf %388, %397 : vector<16x16xf32>
    %c110 = arith.constant 110 : index
    %399 = memref.load %arg3[%c110] : memref<144xf32, #tpu.memory_space<smem>>
    %400 = vector.broadcast %399 : f32 to vector<16x16xf32>
    %401 = arith.mulf %400, %394 : vector<16x16xf32>
    %402 = arith.addf %392, %401 : vector<16x16xf32>
    %c4_139 = arith.constant 4 : index
    %c1_140 = arith.constant 1 : index
    %c0_141 = arith.constant 0 : index
    %403 = vector.load %arg7[%c4_139, %c1_140, %c0_141] : memref<8x18x18xf32, #tpu.memory_space<vmem>>, vector<1x16x16xf32>
    %404 = vector.shape_cast %403 : vector<1x16x16xf32> to vector<16x16xf32>
    %c39 = arith.constant 39 : index
    %405 = memref.load %arg3[%c39] : memref<144xf32, #tpu.memory_space<smem>>
    %406 = vector.broadcast %405 : f32 to vector<16x16xf32>
    %407 = arith.mulf %406, %404 : vector<16x16xf32>
    %408 = arith.addf %398, %407 : vector<16x16xf32>
    %c111 = arith.constant 111 : index
    %409 = memref.load %arg3[%c111] : memref<144xf32, #tpu.memory_space<smem>>
    %410 = vector.broadcast %409 : f32 to vector<16x16xf32>
    %411 = arith.mulf %410, %404 : vector<16x16xf32>
    %412 = arith.addf %402, %411 : vector<16x16xf32>
    %c4_142 = arith.constant 4 : index
    %c1_143 = arith.constant 1 : index
    %c1_144 = arith.constant 1 : index
    %413 = vector.load %arg7[%c4_142, %c1_143, %c1_144] : memref<8x18x18xf32, #tpu.memory_space<vmem>>, vector<1x16x16xf32>
    %414 = vector.shape_cast %413 : vector<1x16x16xf32> to vector<16x16xf32>
    %c40 = arith.constant 40 : index
    %415 = memref.load %arg3[%c40] : memref<144xf32, #tpu.memory_space<smem>>
    %416 = vector.broadcast %415 : f32 to vector<16x16xf32>
    %417 = arith.mulf %416, %414 : vector<16x16xf32>
    %418 = arith.addf %408, %417 : vector<16x16xf32>
    %c112 = arith.constant 112 : index
    %419 = memref.load %arg3[%c112] : memref<144xf32, #tpu.memory_space<smem>>
    %420 = vector.broadcast %419 : f32 to vector<16x16xf32>
    %421 = arith.mulf %420, %414 : vector<16x16xf32>
    %422 = arith.addf %412, %421 : vector<16x16xf32>
    %c4_145 = arith.constant 4 : index
    %c1_146 = arith.constant 1 : index
    %c2_147 = arith.constant 2 : index
    %423 = vector.load %arg7[%c4_145, %c1_146, %c2_147] : memref<8x18x18xf32, #tpu.memory_space<vmem>>, vector<1x16x16xf32>
    %424 = vector.shape_cast %423 : vector<1x16x16xf32> to vector<16x16xf32>
    %c41 = arith.constant 41 : index
    %425 = memref.load %arg3[%c41] : memref<144xf32, #tpu.memory_space<smem>>
    %426 = vector.broadcast %425 : f32 to vector<16x16xf32>
    %427 = arith.mulf %426, %424 : vector<16x16xf32>
    %428 = arith.addf %418, %427 : vector<16x16xf32>
    %c113 = arith.constant 113 : index
    %429 = memref.load %arg3[%c113] : memref<144xf32, #tpu.memory_space<smem>>
    %430 = vector.broadcast %429 : f32 to vector<16x16xf32>
    %431 = arith.mulf %430, %424 : vector<16x16xf32>
    %432 = arith.addf %422, %431 : vector<16x16xf32>
    %c4_148 = arith.constant 4 : index
    %c2_149 = arith.constant 2 : index
    %c0_150 = arith.constant 0 : index
    %433 = vector.load %arg7[%c4_148, %c2_149, %c0_150] : memref<8x18x18xf32, #tpu.memory_space<vmem>>, vector<1x16x16xf32>
    %434 = vector.shape_cast %433 : vector<1x16x16xf32> to vector<16x16xf32>
    %c42 = arith.constant 42 : index
    %435 = memref.load %arg3[%c42] : memref<144xf32, #tpu.memory_space<smem>>
    %436 = vector.broadcast %435 : f32 to vector<16x16xf32>
    %437 = arith.mulf %436, %434 : vector<16x16xf32>
    %438 = arith.addf %428, %437 : vector<16x16xf32>
    %c114 = arith.constant 114 : index
    %439 = memref.load %arg3[%c114] : memref<144xf32, #tpu.memory_space<smem>>
    %440 = vector.broadcast %439 : f32 to vector<16x16xf32>
    %441 = arith.mulf %440, %434 : vector<16x16xf32>
    %442 = arith.addf %432, %441 : vector<16x16xf32>
    %c4_151 = arith.constant 4 : index
    %c2_152 = arith.constant 2 : index
    %c1_153 = arith.constant 1 : index
    %443 = vector.load %arg7[%c4_151, %c2_152, %c1_153] : memref<8x18x18xf32, #tpu.memory_space<vmem>>, vector<1x16x16xf32>
    %444 = vector.shape_cast %443 : vector<1x16x16xf32> to vector<16x16xf32>
    %c43 = arith.constant 43 : index
    %445 = memref.load %arg3[%c43] : memref<144xf32, #tpu.memory_space<smem>>
    %446 = vector.broadcast %445 : f32 to vector<16x16xf32>
    %447 = arith.mulf %446, %444 : vector<16x16xf32>
    %448 = arith.addf %438, %447 : vector<16x16xf32>
    %c115 = arith.constant 115 : index
    %449 = memref.load %arg3[%c115] : memref<144xf32, #tpu.memory_space<smem>>
    %450 = vector.broadcast %449 : f32 to vector<16x16xf32>
    %451 = arith.mulf %450, %444 : vector<16x16xf32>
    %452 = arith.addf %442, %451 : vector<16x16xf32>
    %c4_154 = arith.constant 4 : index
    %c2_155 = arith.constant 2 : index
    %c2_156 = arith.constant 2 : index
    %453 = vector.load %arg7[%c4_154, %c2_155, %c2_156] : memref<8x18x18xf32, #tpu.memory_space<vmem>>, vector<1x16x16xf32>
    %454 = vector.shape_cast %453 : vector<1x16x16xf32> to vector<16x16xf32>
    %c44 = arith.constant 44 : index
    %455 = memref.load %arg3[%c44] : memref<144xf32, #tpu.memory_space<smem>>
    %456 = vector.broadcast %455 : f32 to vector<16x16xf32>
    %457 = arith.mulf %456, %454 : vector<16x16xf32>
    %458 = arith.addf %448, %457 : vector<16x16xf32>
    %c116 = arith.constant 116 : index
    %459 = memref.load %arg3[%c116] : memref<144xf32, #tpu.memory_space<smem>>
    %460 = vector.broadcast %459 : f32 to vector<16x16xf32>
    %461 = arith.mulf %460, %454 : vector<16x16xf32>
    %462 = arith.addf %452, %461 : vector<16x16xf32>
    %c5_157 = arith.constant 5 : index
    %c0_158 = arith.constant 0 : index
    %c0_159 = arith.constant 0 : index
    %463 = vector.load %arg7[%c5_157, %c0_158, %c0_159] : memref<8x18x18xf32, #tpu.memory_space<vmem>>, vector<1x16x16xf32>
    %464 = vector.shape_cast %463 : vector<1x16x16xf32> to vector<16x16xf32>
    %c45 = arith.constant 45 : index
    %465 = memref.load %arg3[%c45] : memref<144xf32, #tpu.memory_space<smem>>
    %466 = vector.broadcast %465 : f32 to vector<16x16xf32>
    %467 = arith.mulf %466, %464 : vector<16x16xf32>
    %468 = arith.addf %458, %467 : vector<16x16xf32>
    %c117 = arith.constant 117 : index
    %469 = memref.load %arg3[%c117] : memref<144xf32, #tpu.memory_space<smem>>
    %470 = vector.broadcast %469 : f32 to vector<16x16xf32>
    %471 = arith.mulf %470, %464 : vector<16x16xf32>
    %472 = arith.addf %462, %471 : vector<16x16xf32>
    %c5_160 = arith.constant 5 : index
    %c0_161 = arith.constant 0 : index
    %c1_162 = arith.constant 1 : index
    %473 = vector.load %arg7[%c5_160, %c0_161, %c1_162] : memref<8x18x18xf32, #tpu.memory_space<vmem>>, vector<1x16x16xf32>
    %474 = vector.shape_cast %473 : vector<1x16x16xf32> to vector<16x16xf32>
    %c46 = arith.constant 46 : index
    %475 = memref.load %arg3[%c46] : memref<144xf32, #tpu.memory_space<smem>>
    %476 = vector.broadcast %475 : f32 to vector<16x16xf32>
    %477 = arith.mulf %476, %474 : vector<16x16xf32>
    %478 = arith.addf %468, %477 : vector<16x16xf32>
    %c118 = arith.constant 118 : index
    %479 = memref.load %arg3[%c118] : memref<144xf32, #tpu.memory_space<smem>>
    %480 = vector.broadcast %479 : f32 to vector<16x16xf32>
    %481 = arith.mulf %480, %474 : vector<16x16xf32>
    %482 = arith.addf %472, %481 : vector<16x16xf32>
    %c5_163 = arith.constant 5 : index
    %c0_164 = arith.constant 0 : index
    %c2_165 = arith.constant 2 : index
    %483 = vector.load %arg7[%c5_163, %c0_164, %c2_165] : memref<8x18x18xf32, #tpu.memory_space<vmem>>, vector<1x16x16xf32>
    %484 = vector.shape_cast %483 : vector<1x16x16xf32> to vector<16x16xf32>
    %c47 = arith.constant 47 : index
    %485 = memref.load %arg3[%c47] : memref<144xf32, #tpu.memory_space<smem>>
    %486 = vector.broadcast %485 : f32 to vector<16x16xf32>
    %487 = arith.mulf %486, %484 : vector<16x16xf32>
    %488 = arith.addf %478, %487 : vector<16x16xf32>
    %c119 = arith.constant 119 : index
    %489 = memref.load %arg3[%c119] : memref<144xf32, #tpu.memory_space<smem>>
    %490 = vector.broadcast %489 : f32 to vector<16x16xf32>
    %491 = arith.mulf %490, %484 : vector<16x16xf32>
    %492 = arith.addf %482, %491 : vector<16x16xf32>
    %c5_166 = arith.constant 5 : index
    %c1_167 = arith.constant 1 : index
    %c0_168 = arith.constant 0 : index
    %493 = vector.load %arg7[%c5_166, %c1_167, %c0_168] : memref<8x18x18xf32, #tpu.memory_space<vmem>>, vector<1x16x16xf32>
    %494 = vector.shape_cast %493 : vector<1x16x16xf32> to vector<16x16xf32>
    %c48 = arith.constant 48 : index
    %495 = memref.load %arg3[%c48] : memref<144xf32, #tpu.memory_space<smem>>
    %496 = vector.broadcast %495 : f32 to vector<16x16xf32>
    %497 = arith.mulf %496, %494 : vector<16x16xf32>
    %498 = arith.addf %488, %497 : vector<16x16xf32>
    %c120 = arith.constant 120 : index
    %499 = memref.load %arg3[%c120] : memref<144xf32, #tpu.memory_space<smem>>
    %500 = vector.broadcast %499 : f32 to vector<16x16xf32>
    %501 = arith.mulf %500, %494 : vector<16x16xf32>
    %502 = arith.addf %492, %501 : vector<16x16xf32>
    %c5_169 = arith.constant 5 : index
    %c1_170 = arith.constant 1 : index
    %c1_171 = arith.constant 1 : index
    %503 = vector.load %arg7[%c5_169, %c1_170, %c1_171] : memref<8x18x18xf32, #tpu.memory_space<vmem>>, vector<1x16x16xf32>
    %504 = vector.shape_cast %503 : vector<1x16x16xf32> to vector<16x16xf32>
    %c49 = arith.constant 49 : index
    %505 = memref.load %arg3[%c49] : memref<144xf32, #tpu.memory_space<smem>>
    %506 = vector.broadcast %505 : f32 to vector<16x16xf32>
    %507 = arith.mulf %506, %504 : vector<16x16xf32>
    %508 = arith.addf %498, %507 : vector<16x16xf32>
    %c121 = arith.constant 121 : index
    %509 = memref.load %arg3[%c121] : memref<144xf32, #tpu.memory_space<smem>>
    %510 = vector.broadcast %509 : f32 to vector<16x16xf32>
    %511 = arith.mulf %510, %504 : vector<16x16xf32>
    %512 = arith.addf %502, %511 : vector<16x16xf32>
    %c5_172 = arith.constant 5 : index
    %c1_173 = arith.constant 1 : index
    %c2_174 = arith.constant 2 : index
    %513 = vector.load %arg7[%c5_172, %c1_173, %c2_174] : memref<8x18x18xf32, #tpu.memory_space<vmem>>, vector<1x16x16xf32>
    %514 = vector.shape_cast %513 : vector<1x16x16xf32> to vector<16x16xf32>
    %c50 = arith.constant 50 : index
    %515 = memref.load %arg3[%c50] : memref<144xf32, #tpu.memory_space<smem>>
    %516 = vector.broadcast %515 : f32 to vector<16x16xf32>
    %517 = arith.mulf %516, %514 : vector<16x16xf32>
    %518 = arith.addf %508, %517 : vector<16x16xf32>
    %c122 = arith.constant 122 : index
    %519 = memref.load %arg3[%c122] : memref<144xf32, #tpu.memory_space<smem>>
    %520 = vector.broadcast %519 : f32 to vector<16x16xf32>
    %521 = arith.mulf %520, %514 : vector<16x16xf32>
    %522 = arith.addf %512, %521 : vector<16x16xf32>
    %c5_175 = arith.constant 5 : index
    %c2_176 = arith.constant 2 : index
    %c0_177 = arith.constant 0 : index
    %523 = vector.load %arg7[%c5_175, %c2_176, %c0_177] : memref<8x18x18xf32, #tpu.memory_space<vmem>>, vector<1x16x16xf32>
    %524 = vector.shape_cast %523 : vector<1x16x16xf32> to vector<16x16xf32>
    %c51 = arith.constant 51 : index
    %525 = memref.load %arg3[%c51] : memref<144xf32, #tpu.memory_space<smem>>
    %526 = vector.broadcast %525 : f32 to vector<16x16xf32>
    %527 = arith.mulf %526, %524 : vector<16x16xf32>
    %528 = arith.addf %518, %527 : vector<16x16xf32>
    %c123 = arith.constant 123 : index
    %529 = memref.load %arg3[%c123] : memref<144xf32, #tpu.memory_space<smem>>
    %530 = vector.broadcast %529 : f32 to vector<16x16xf32>
    %531 = arith.mulf %530, %524 : vector<16x16xf32>
    %532 = arith.addf %522, %531 : vector<16x16xf32>
    %c5_178 = arith.constant 5 : index
    %c2_179 = arith.constant 2 : index
    %c1_180 = arith.constant 1 : index
    %533 = vector.load %arg7[%c5_178, %c2_179, %c1_180] : memref<8x18x18xf32, #tpu.memory_space<vmem>>, vector<1x16x16xf32>
    %534 = vector.shape_cast %533 : vector<1x16x16xf32> to vector<16x16xf32>
    %c52 = arith.constant 52 : index
    %535 = memref.load %arg3[%c52] : memref<144xf32, #tpu.memory_space<smem>>
    %536 = vector.broadcast %535 : f32 to vector<16x16xf32>
    %537 = arith.mulf %536, %534 : vector<16x16xf32>
    %538 = arith.addf %528, %537 : vector<16x16xf32>
    %c124 = arith.constant 124 : index
    %539 = memref.load %arg3[%c124] : memref<144xf32, #tpu.memory_space<smem>>
    %540 = vector.broadcast %539 : f32 to vector<16x16xf32>
    %541 = arith.mulf %540, %534 : vector<16x16xf32>
    %542 = arith.addf %532, %541 : vector<16x16xf32>
    %c5_181 = arith.constant 5 : index
    %c2_182 = arith.constant 2 : index
    %c2_183 = arith.constant 2 : index
    %543 = vector.load %arg7[%c5_181, %c2_182, %c2_183] : memref<8x18x18xf32, #tpu.memory_space<vmem>>, vector<1x16x16xf32>
    %544 = vector.shape_cast %543 : vector<1x16x16xf32> to vector<16x16xf32>
    %c53 = arith.constant 53 : index
    %545 = memref.load %arg3[%c53] : memref<144xf32, #tpu.memory_space<smem>>
    %546 = vector.broadcast %545 : f32 to vector<16x16xf32>
    %547 = arith.mulf %546, %544 : vector<16x16xf32>
    %548 = arith.addf %538, %547 : vector<16x16xf32>
    %c125 = arith.constant 125 : index
    %549 = memref.load %arg3[%c125] : memref<144xf32, #tpu.memory_space<smem>>
    %550 = vector.broadcast %549 : f32 to vector<16x16xf32>
    %551 = arith.mulf %550, %544 : vector<16x16xf32>
    %552 = arith.addf %542, %551 : vector<16x16xf32>
    %c6_184 = arith.constant 6 : index
    %c0_185 = arith.constant 0 : index
    %c0_186 = arith.constant 0 : index
    %553 = vector.load %arg7[%c6_184, %c0_185, %c0_186] : memref<8x18x18xf32, #tpu.memory_space<vmem>>, vector<1x16x16xf32>
    %554 = vector.shape_cast %553 : vector<1x16x16xf32> to vector<16x16xf32>
    %c54 = arith.constant 54 : index
    %555 = memref.load %arg3[%c54] : memref<144xf32, #tpu.memory_space<smem>>
    %556 = vector.broadcast %555 : f32 to vector<16x16xf32>
    %557 = arith.mulf %556, %554 : vector<16x16xf32>
    %558 = arith.addf %548, %557 : vector<16x16xf32>
    %c126 = arith.constant 126 : index
    %559 = memref.load %arg3[%c126] : memref<144xf32, #tpu.memory_space<smem>>
    %560 = vector.broadcast %559 : f32 to vector<16x16xf32>
    %561 = arith.mulf %560, %554 : vector<16x16xf32>
    %562 = arith.addf %552, %561 : vector<16x16xf32>
    %c6_187 = arith.constant 6 : index
    %c0_188 = arith.constant 0 : index
    %c1_189 = arith.constant 1 : index
    %563 = vector.load %arg7[%c6_187, %c0_188, %c1_189] : memref<8x18x18xf32, #tpu.memory_space<vmem>>, vector<1x16x16xf32>
    %564 = vector.shape_cast %563 : vector<1x16x16xf32> to vector<16x16xf32>
    %c55 = arith.constant 55 : index
    %565 = memref.load %arg3[%c55] : memref<144xf32, #tpu.memory_space<smem>>
    %566 = vector.broadcast %565 : f32 to vector<16x16xf32>
    %567 = arith.mulf %566, %564 : vector<16x16xf32>
    %568 = arith.addf %558, %567 : vector<16x16xf32>
    %c127 = arith.constant 127 : index
    %569 = memref.load %arg3[%c127] : memref<144xf32, #tpu.memory_space<smem>>
    %570 = vector.broadcast %569 : f32 to vector<16x16xf32>
    %571 = arith.mulf %570, %564 : vector<16x16xf32>
    %572 = arith.addf %562, %571 : vector<16x16xf32>
    %c6_190 = arith.constant 6 : index
    %c0_191 = arith.constant 0 : index
    %c2_192 = arith.constant 2 : index
    %573 = vector.load %arg7[%c6_190, %c0_191, %c2_192] : memref<8x18x18xf32, #tpu.memory_space<vmem>>, vector<1x16x16xf32>
    %574 = vector.shape_cast %573 : vector<1x16x16xf32> to vector<16x16xf32>
    %c56 = arith.constant 56 : index
    %575 = memref.load %arg3[%c56] : memref<144xf32, #tpu.memory_space<smem>>
    %576 = vector.broadcast %575 : f32 to vector<16x16xf32>
    %577 = arith.mulf %576, %574 : vector<16x16xf32>
    %578 = arith.addf %568, %577 : vector<16x16xf32>
    %c128 = arith.constant 128 : index
    %579 = memref.load %arg3[%c128] : memref<144xf32, #tpu.memory_space<smem>>
    %580 = vector.broadcast %579 : f32 to vector<16x16xf32>
    %581 = arith.mulf %580, %574 : vector<16x16xf32>
    %582 = arith.addf %572, %581 : vector<16x16xf32>
    %c6_193 = arith.constant 6 : index
    %c1_194 = arith.constant 1 : index
    %c0_195 = arith.constant 0 : index
    %583 = vector.load %arg7[%c6_193, %c1_194, %c0_195] : memref<8x18x18xf32, #tpu.memory_space<vmem>>, vector<1x16x16xf32>
    %584 = vector.shape_cast %583 : vector<1x16x16xf32> to vector<16x16xf32>
    %c57 = arith.constant 57 : index
    %585 = memref.load %arg3[%c57] : memref<144xf32, #tpu.memory_space<smem>>
    %586 = vector.broadcast %585 : f32 to vector<16x16xf32>
    %587 = arith.mulf %586, %584 : vector<16x16xf32>
    %588 = arith.addf %578, %587 : vector<16x16xf32>
    %c129 = arith.constant 129 : index
    %589 = memref.load %arg3[%c129] : memref<144xf32, #tpu.memory_space<smem>>
    %590 = vector.broadcast %589 : f32 to vector<16x16xf32>
    %591 = arith.mulf %590, %584 : vector<16x16xf32>
    %592 = arith.addf %582, %591 : vector<16x16xf32>
    %c6_196 = arith.constant 6 : index
    %c1_197 = arith.constant 1 : index
    %c1_198 = arith.constant 1 : index
    %593 = vector.load %arg7[%c6_196, %c1_197, %c1_198] : memref<8x18x18xf32, #tpu.memory_space<vmem>>, vector<1x16x16xf32>
    %594 = vector.shape_cast %593 : vector<1x16x16xf32> to vector<16x16xf32>
    %c58 = arith.constant 58 : index
    %595 = memref.load %arg3[%c58] : memref<144xf32, #tpu.memory_space<smem>>
    %596 = vector.broadcast %595 : f32 to vector<16x16xf32>
    %597 = arith.mulf %596, %594 : vector<16x16xf32>
    %598 = arith.addf %588, %597 : vector<16x16xf32>
    %c130 = arith.constant 130 : index
    %599 = memref.load %arg3[%c130] : memref<144xf32, #tpu.memory_space<smem>>
    %600 = vector.broadcast %599 : f32 to vector<16x16xf32>
    %601 = arith.mulf %600, %594 : vector<16x16xf32>
    %602 = arith.addf %592, %601 : vector<16x16xf32>
    %c6_199 = arith.constant 6 : index
    %c1_200 = arith.constant 1 : index
    %c2_201 = arith.constant 2 : index
    %603 = vector.load %arg7[%c6_199, %c1_200, %c2_201] : memref<8x18x18xf32, #tpu.memory_space<vmem>>, vector<1x16x16xf32>
    %604 = vector.shape_cast %603 : vector<1x16x16xf32> to vector<16x16xf32>
    %c59 = arith.constant 59 : index
    %605 = memref.load %arg3[%c59] : memref<144xf32, #tpu.memory_space<smem>>
    %606 = vector.broadcast %605 : f32 to vector<16x16xf32>
    %607 = arith.mulf %606, %604 : vector<16x16xf32>
    %608 = arith.addf %598, %607 : vector<16x16xf32>
    %c131 = arith.constant 131 : index
    %609 = memref.load %arg3[%c131] : memref<144xf32, #tpu.memory_space<smem>>
    %610 = vector.broadcast %609 : f32 to vector<16x16xf32>
    %611 = arith.mulf %610, %604 : vector<16x16xf32>
    %612 = arith.addf %602, %611 : vector<16x16xf32>
    %c6_202 = arith.constant 6 : index
    %c2_203 = arith.constant 2 : index
    %c0_204 = arith.constant 0 : index
    %613 = vector.load %arg7[%c6_202, %c2_203, %c0_204] : memref<8x18x18xf32, #tpu.memory_space<vmem>>, vector<1x16x16xf32>
    %614 = vector.shape_cast %613 : vector<1x16x16xf32> to vector<16x16xf32>
    %c60 = arith.constant 60 : index
    %615 = memref.load %arg3[%c60] : memref<144xf32, #tpu.memory_space<smem>>
    %616 = vector.broadcast %615 : f32 to vector<16x16xf32>
    %617 = arith.mulf %616, %614 : vector<16x16xf32>
    %618 = arith.addf %608, %617 : vector<16x16xf32>
    %c132 = arith.constant 132 : index
    %619 = memref.load %arg3[%c132] : memref<144xf32, #tpu.memory_space<smem>>
    %620 = vector.broadcast %619 : f32 to vector<16x16xf32>
    %621 = arith.mulf %620, %614 : vector<16x16xf32>
    %622 = arith.addf %612, %621 : vector<16x16xf32>
    %c6_205 = arith.constant 6 : index
    %c2_206 = arith.constant 2 : index
    %c1_207 = arith.constant 1 : index
    %623 = vector.load %arg7[%c6_205, %c2_206, %c1_207] : memref<8x18x18xf32, #tpu.memory_space<vmem>>, vector<1x16x16xf32>
    %624 = vector.shape_cast %623 : vector<1x16x16xf32> to vector<16x16xf32>
    %c61 = arith.constant 61 : index
    %625 = memref.load %arg3[%c61] : memref<144xf32, #tpu.memory_space<smem>>
    %626 = vector.broadcast %625 : f32 to vector<16x16xf32>
    %627 = arith.mulf %626, %624 : vector<16x16xf32>
    %628 = arith.addf %618, %627 : vector<16x16xf32>
    %c133 = arith.constant 133 : index
    %629 = memref.load %arg3[%c133] : memref<144xf32, #tpu.memory_space<smem>>
    %630 = vector.broadcast %629 : f32 to vector<16x16xf32>
    %631 = arith.mulf %630, %624 : vector<16x16xf32>
    %632 = arith.addf %622, %631 : vector<16x16xf32>
    %c6_208 = arith.constant 6 : index
    %c2_209 = arith.constant 2 : index
    %c2_210 = arith.constant 2 : index
    %633 = vector.load %arg7[%c6_208, %c2_209, %c2_210] : memref<8x18x18xf32, #tpu.memory_space<vmem>>, vector<1x16x16xf32>
    %634 = vector.shape_cast %633 : vector<1x16x16xf32> to vector<16x16xf32>
    %c62 = arith.constant 62 : index
    %635 = memref.load %arg3[%c62] : memref<144xf32, #tpu.memory_space<smem>>
    %636 = vector.broadcast %635 : f32 to vector<16x16xf32>
    %637 = arith.mulf %636, %634 : vector<16x16xf32>
    %638 = arith.addf %628, %637 : vector<16x16xf32>
    %c134 = arith.constant 134 : index
    %639 = memref.load %arg3[%c134] : memref<144xf32, #tpu.memory_space<smem>>
    %640 = vector.broadcast %639 : f32 to vector<16x16xf32>
    %641 = arith.mulf %640, %634 : vector<16x16xf32>
    %642 = arith.addf %632, %641 : vector<16x16xf32>
    %c7_211 = arith.constant 7 : index
    %c0_212 = arith.constant 0 : index
    %c0_213 = arith.constant 0 : index
    %643 = vector.load %arg7[%c7_211, %c0_212, %c0_213] : memref<8x18x18xf32, #tpu.memory_space<vmem>>, vector<1x16x16xf32>
    %644 = vector.shape_cast %643 : vector<1x16x16xf32> to vector<16x16xf32>
    %c63 = arith.constant 63 : index
    %645 = memref.load %arg3[%c63] : memref<144xf32, #tpu.memory_space<smem>>
    %646 = vector.broadcast %645 : f32 to vector<16x16xf32>
    %647 = arith.mulf %646, %644 : vector<16x16xf32>
    %648 = arith.addf %638, %647 : vector<16x16xf32>
    %c135 = arith.constant 135 : index
    %649 = memref.load %arg3[%c135] : memref<144xf32, #tpu.memory_space<smem>>
    %650 = vector.broadcast %649 : f32 to vector<16x16xf32>
    %651 = arith.mulf %650, %644 : vector<16x16xf32>
    %652 = arith.addf %642, %651 : vector<16x16xf32>
    %c7_214 = arith.constant 7 : index
    %c0_215 = arith.constant 0 : index
    %c1_216 = arith.constant 1 : index
    %653 = vector.load %arg7[%c7_214, %c0_215, %c1_216] : memref<8x18x18xf32, #tpu.memory_space<vmem>>, vector<1x16x16xf32>
    %654 = vector.shape_cast %653 : vector<1x16x16xf32> to vector<16x16xf32>
    %c64 = arith.constant 64 : index
    %655 = memref.load %arg3[%c64] : memref<144xf32, #tpu.memory_space<smem>>
    %656 = vector.broadcast %655 : f32 to vector<16x16xf32>
    %657 = arith.mulf %656, %654 : vector<16x16xf32>
    %658 = arith.addf %648, %657 : vector<16x16xf32>
    %c136 = arith.constant 136 : index
    %659 = memref.load %arg3[%c136] : memref<144xf32, #tpu.memory_space<smem>>
    %660 = vector.broadcast %659 : f32 to vector<16x16xf32>
    %661 = arith.mulf %660, %654 : vector<16x16xf32>
    %662 = arith.addf %652, %661 : vector<16x16xf32>
    %c7_217 = arith.constant 7 : index
    %c0_218 = arith.constant 0 : index
    %c2_219 = arith.constant 2 : index
    %663 = vector.load %arg7[%c7_217, %c0_218, %c2_219] : memref<8x18x18xf32, #tpu.memory_space<vmem>>, vector<1x16x16xf32>
    %664 = vector.shape_cast %663 : vector<1x16x16xf32> to vector<16x16xf32>
    %c65 = arith.constant 65 : index
    %665 = memref.load %arg3[%c65] : memref<144xf32, #tpu.memory_space<smem>>
    %666 = vector.broadcast %665 : f32 to vector<16x16xf32>
    %667 = arith.mulf %666, %664 : vector<16x16xf32>
    %668 = arith.addf %658, %667 : vector<16x16xf32>
    %c137 = arith.constant 137 : index
    %669 = memref.load %arg3[%c137] : memref<144xf32, #tpu.memory_space<smem>>
    %670 = vector.broadcast %669 : f32 to vector<16x16xf32>
    %671 = arith.mulf %670, %664 : vector<16x16xf32>
    %672 = arith.addf %662, %671 : vector<16x16xf32>
    %c7_220 = arith.constant 7 : index
    %c1_221 = arith.constant 1 : index
    %c0_222 = arith.constant 0 : index
    %673 = vector.load %arg7[%c7_220, %c1_221, %c0_222] : memref<8x18x18xf32, #tpu.memory_space<vmem>>, vector<1x16x16xf32>
    %674 = vector.shape_cast %673 : vector<1x16x16xf32> to vector<16x16xf32>
    %c66 = arith.constant 66 : index
    %675 = memref.load %arg3[%c66] : memref<144xf32, #tpu.memory_space<smem>>
    %676 = vector.broadcast %675 : f32 to vector<16x16xf32>
    %677 = arith.mulf %676, %674 : vector<16x16xf32>
    %678 = arith.addf %668, %677 : vector<16x16xf32>
    %c138 = arith.constant 138 : index
    %679 = memref.load %arg3[%c138] : memref<144xf32, #tpu.memory_space<smem>>
    %680 = vector.broadcast %679 : f32 to vector<16x16xf32>
    %681 = arith.mulf %680, %674 : vector<16x16xf32>
    %682 = arith.addf %672, %681 : vector<16x16xf32>
    %c7_223 = arith.constant 7 : index
    %c1_224 = arith.constant 1 : index
    %c1_225 = arith.constant 1 : index
    %683 = vector.load %arg7[%c7_223, %c1_224, %c1_225] : memref<8x18x18xf32, #tpu.memory_space<vmem>>, vector<1x16x16xf32>
    %684 = vector.shape_cast %683 : vector<1x16x16xf32> to vector<16x16xf32>
    %c67 = arith.constant 67 : index
    %685 = memref.load %arg3[%c67] : memref<144xf32, #tpu.memory_space<smem>>
    %686 = vector.broadcast %685 : f32 to vector<16x16xf32>
    %687 = arith.mulf %686, %684 : vector<16x16xf32>
    %688 = arith.addf %678, %687 : vector<16x16xf32>
    %c139 = arith.constant 139 : index
    %689 = memref.load %arg3[%c139] : memref<144xf32, #tpu.memory_space<smem>>
    %690 = vector.broadcast %689 : f32 to vector<16x16xf32>
    %691 = arith.mulf %690, %684 : vector<16x16xf32>
    %692 = arith.addf %682, %691 : vector<16x16xf32>
    %c7_226 = arith.constant 7 : index
    %c1_227 = arith.constant 1 : index
    %c2_228 = arith.constant 2 : index
    %693 = vector.load %arg7[%c7_226, %c1_227, %c2_228] : memref<8x18x18xf32, #tpu.memory_space<vmem>>, vector<1x16x16xf32>
    %694 = vector.shape_cast %693 : vector<1x16x16xf32> to vector<16x16xf32>
    %c68 = arith.constant 68 : index
    %695 = memref.load %arg3[%c68] : memref<144xf32, #tpu.memory_space<smem>>
    %696 = vector.broadcast %695 : f32 to vector<16x16xf32>
    %697 = arith.mulf %696, %694 : vector<16x16xf32>
    %698 = arith.addf %688, %697 : vector<16x16xf32>
    %c140 = arith.constant 140 : index
    %699 = memref.load %arg3[%c140] : memref<144xf32, #tpu.memory_space<smem>>
    %700 = vector.broadcast %699 : f32 to vector<16x16xf32>
    %701 = arith.mulf %700, %694 : vector<16x16xf32>
    %702 = arith.addf %692, %701 : vector<16x16xf32>
    %c7_229 = arith.constant 7 : index
    %c2_230 = arith.constant 2 : index
    %c0_231 = arith.constant 0 : index
    %703 = vector.load %arg7[%c7_229, %c2_230, %c0_231] : memref<8x18x18xf32, #tpu.memory_space<vmem>>, vector<1x16x16xf32>
    %704 = vector.shape_cast %703 : vector<1x16x16xf32> to vector<16x16xf32>
    %c69 = arith.constant 69 : index
    %705 = memref.load %arg3[%c69] : memref<144xf32, #tpu.memory_space<smem>>
    %706 = vector.broadcast %705 : f32 to vector<16x16xf32>
    %707 = arith.mulf %706, %704 : vector<16x16xf32>
    %708 = arith.addf %698, %707 : vector<16x16xf32>
    %c141 = arith.constant 141 : index
    %709 = memref.load %arg3[%c141] : memref<144xf32, #tpu.memory_space<smem>>
    %710 = vector.broadcast %709 : f32 to vector<16x16xf32>
    %711 = arith.mulf %710, %704 : vector<16x16xf32>
    %712 = arith.addf %702, %711 : vector<16x16xf32>
    %c7_232 = arith.constant 7 : index
    %c2_233 = arith.constant 2 : index
    %c1_234 = arith.constant 1 : index
    %713 = vector.load %arg7[%c7_232, %c2_233, %c1_234] : memref<8x18x18xf32, #tpu.memory_space<vmem>>, vector<1x16x16xf32>
    %714 = vector.shape_cast %713 : vector<1x16x16xf32> to vector<16x16xf32>
    %c70 = arith.constant 70 : index
    %715 = memref.load %arg3[%c70] : memref<144xf32, #tpu.memory_space<smem>>
    %716 = vector.broadcast %715 : f32 to vector<16x16xf32>
    %717 = arith.mulf %716, %714 : vector<16x16xf32>
    %718 = arith.addf %708, %717 : vector<16x16xf32>
    %c142 = arith.constant 142 : index
    %719 = memref.load %arg3[%c142] : memref<144xf32, #tpu.memory_space<smem>>
    %720 = vector.broadcast %719 : f32 to vector<16x16xf32>
    %721 = arith.mulf %720, %714 : vector<16x16xf32>
    %722 = arith.addf %712, %721 : vector<16x16xf32>
    %c7_235 = arith.constant 7 : index
    %c2_236 = arith.constant 2 : index
    %c2_237 = arith.constant 2 : index
    %723 = vector.load %arg7[%c7_235, %c2_236, %c2_237] : memref<8x18x18xf32, #tpu.memory_space<vmem>>, vector<1x16x16xf32>
    %724 = vector.shape_cast %723 : vector<1x16x16xf32> to vector<16x16xf32>
    %c71 = arith.constant 71 : index
    %725 = memref.load %arg3[%c71] : memref<144xf32, #tpu.memory_space<smem>>
    %726 = vector.broadcast %725 : f32 to vector<16x16xf32>
    %727 = arith.mulf %726, %724 : vector<16x16xf32>
    %728 = arith.addf %718, %727 : vector<16x16xf32>
    %c143 = arith.constant 143 : index
    %729 = memref.load %arg3[%c143] : memref<144xf32, #tpu.memory_space<smem>>
    %730 = vector.broadcast %729 : f32 to vector<16x16xf32>
    %731 = arith.mulf %730, %724 : vector<16x16xf32>
    %732 = arith.addf %722, %731 : vector<16x16xf32>
    %733 = arith.truncf %728 : vector<16x16xf32> to vector<16x16xbf16>
    %c0_238 = arith.constant 0 : index
    %c0_239 = arith.constant 0 : index
    %c0_240 = arith.constant 0 : index
    %c0_241 = arith.constant 0 : index
    %734 = vector.load %arg5[%c0_238, %c0_239, %c0_240, %c0_241] : memref<1x2x16x16xbf16, #tpu.memory_space<vmem>>, vector<1x1x16x16xbf16>
    %735 = vector.shape_cast %734 : vector<1x1x16x16xbf16> to vector<16x16xbf16>
    %736 = vector.shape_cast %733 : vector<16x16xbf16> to vector<1x1x16x16xbf16>
    tpu.vector_store %arg5[%c0_238, %c0_239, %c0_240, %c0_241], %736 {strides = array<i32>} : memref<1x2x16x16xbf16, #tpu.memory_space<vmem>>, vector<1x1x16x16xbf16>,
    %737 = vector.shape_cast %728 : vector<16x16xf32> to vector<1x16x16xf32>
    %cst_242 = arith.constant dense<0.000000e+00> : vector<1xf32>
    %738 = vector.multi_reduction <add>, %737, %cst_242 [1, 2] : vector<1x16x16xf32> to vector<1xf32>
    %739 = vector.shape_cast %738 : vector<1xf32> to vector<1x1x1xf32>
    %740 = vector.extract %739[0, 0, 0] : f32 from vector<1x1x1xf32>
    %741 = vector.broadcast %740 : f32 to vector<1x1xf32>
    %cst_243 = arith.constant 3.906250e-03 : f32
    %742 = vector.broadcast %cst_243 : f32 to vector<1x1xf32>
    %743 = arith.mulf %741, %742 : vector<1x1xf32>
    %744 = vector.broadcast %743 : vector<1x1xf32> to vector<16x16xf32>
    %745 = arith.subf %728, %744 : vector<16x16xf32>
    %746 = arith.mulf %745, %745 : vector<16x16xf32>
    %747 = vector.shape_cast %746 : vector<16x16xf32> to vector<1x16x16xf32>
    %cst_244 = arith.constant dense<0.000000e+00> : vector<1xf32>
    %748 = vector.multi_reduction <add>, %747, %cst_244 [1, 2] : vector<1x16x16xf32> to vector<1xf32>
    %749 = vector.shape_cast %748 : vector<1xf32> to vector<1x1x1xf32>
    %750 = vector.extract %749[0, 0, 0] : f32 from vector<1x1x1xf32>
    %751 = vector.broadcast %750 : f32 to vector<1x1xf32>
    %752 = tpu.concatenate %741, %751 in 1 : vector<1x1xf32>, vector<1x1xf32> -> vector<1x2xf32>
    %753 = arith.truncf %732 : vector<16x16xf32> to vector<16x16xbf16>
    %c0_245 = arith.constant 0 : index
    %c1_246 = arith.constant 1 : index
    %c0_247 = arith.constant 0 : index
    %c0_248 = arith.constant 0 : index
    %754 = vector.load %arg5[%c0_245, %c1_246, %c0_247, %c0_248] : memref<1x2x16x16xbf16, #tpu.memory_space<vmem>>, vector<1x1x16x16xbf16>
    %755 = vector.shape_cast %754 : vector<1x1x16x16xbf16> to vector<16x16xbf16>
    %756 = vector.shape_cast %753 : vector<16x16xbf16> to vector<1x1x16x16xbf16>
    tpu.vector_store %arg5[%c0_245, %c1_246, %c0_247, %c0_248], %756 {strides = array<i32>} : memref<1x2x16x16xbf16, #tpu.memory_space<vmem>>, vector<1x1x16x16xbf16>,
    %757 = vector.shape_cast %732 : vector<16x16xf32> to vector<1x16x16xf32>
    %cst_249 = arith.constant dense<0.000000e+00> : vector<1xf32>
    %758 = vector.multi_reduction <add>, %757, %cst_249 [1, 2] : vector<1x16x16xf32> to vector<1xf32>
    %759 = vector.shape_cast %758 : vector<1xf32> to vector<1x1x1xf32>
    %760 = vector.extract %759[0, 0, 0] : f32 from vector<1x1x1xf32>
    %761 = vector.broadcast %760 : f32 to vector<1x1xf32>
    %cst_250 = arith.constant 3.906250e-03 : f32
    %762 = vector.broadcast %cst_250 : f32 to vector<1x1xf32>
    %763 = arith.mulf %761, %762 : vector<1x1xf32>
    %764 = vector.broadcast %763 : vector<1x1xf32> to vector<16x16xf32>
    %765 = arith.subf %732, %764 : vector<16x16xf32>
    %766 = arith.mulf %765, %765 : vector<16x16xf32>
    %767 = vector.shape_cast %766 : vector<16x16xf32> to vector<1x16x16xf32>
    %cst_251 = arith.constant dense<0.000000e+00> : vector<1xf32>
    %768 = vector.multi_reduction <add>, %767, %cst_251 [1, 2] : vector<1x16x16xf32> to vector<1xf32>
    %769 = vector.shape_cast %768 : vector<1xf32> to vector<1x1x1xf32>
    %770 = vector.extract %769[0, 0, 0] : f32 from vector<1x1x1xf32>
    %771 = vector.broadcast %770 : f32 to vector<1x1xf32>
    %772 = tpu.concatenate %761, %771 in 1 : vector<1x1xf32>, vector<1x1xf32> -> vector<1x2xf32>
    %773 = tpu.concatenate %752, %772 in 0 : vector<1x2xf32>, vector<1x2xf32> -> vector<2x2xf32>
    %c0_252 = arith.constant 0 : index
    %c0_253 = arith.constant 0 : index
    %c0_254 = arith.constant 0 : index
    %c0_255 = arith.constant 0 : index
    %774 = vector.load %arg6[%c0_252, %c0_253, %c0_254, %c0_255] : memref<1x1x2x2xf32, #tpu.memory_space<vmem>>, vector<1x1x2x2xf32>
    %775 = vector.shape_cast %774 : vector<1x1x2x2xf32> to vector<2x2xf32>
    %776 = vector.shape_cast %773 : vector<2x2xf32> to vector<1x1x2x2xf32>
    tpu.vector_store %arg6[%c0_252, %c0_253, %c0_254, %c0_255], %776 {strides = array<i32>} : memref<1x1x2x2xf32, #tpu.memory_space<vmem>>, vector<1x1x2x2xf32>,
    return
  }
  func.func @transform_0(%arg0: i32, %arg1: i32) -> (i32, i32, i32, i32) {
    %c0_i32 = arith.constant 0 : i32
    %c0_i32_0 = arith.constant 0 : i32
    %c0_i32_1 = arith.constant 0 : i32
    return %arg0, %c0_i32, %arg1, %c0_i32_0 : i32, i32, i32, i32
  }
  func.func @transform_1(%arg0: i32, %arg1: i32) -> i32 {
    %c0_i32 = arith.constant 0 : i32
    %c0_i32_0 = arith.constant 0 : i32
    return %c0_i32 : i32
  }
  func.func @transform_2(%arg0: i32, %arg1: i32) -> i32 {
    %c0_i32 = arith.constant 0 : i32
    %c0_i32_0 = arith.constant 0 : i32
    return %c0_i32 : i32
  }
  func.func @transform_3(%arg0: i32, %arg1: i32) -> (i32, i32, i32, i32) {
    %c0_i32 = arith.constant 0 : i32
    %c0_i32_0 = arith.constant 0 : i32
    %c0_i32_1 = arith.constant 0 : i32
    return %arg0, %c0_i32, %arg1, %c0_i32_0 : i32, i32, i32, i32
  }
  func.func @transform_4(%arg0: i32, %arg1: i32) -> (i32, i32, i32, i32) {
    %c0_i32 = arith.constant 0 : i32
    %c0_i32_0 = arith.constant 0 : i32
    %c0_i32_1 = arith.constant 0 : i32
    return %arg0, %arg1, %c0_i32, %c0_i32_0 : i32, i32, i32, i32
  }
}

module attributes {stable_mosaic.version = 11 : i64} {
  func.func @_bn_sigmoid_kernel(%arg0: i32, %arg1: i32, %arg2: memref<1x2x16x16xbf16, #tpu.memory_space<vmem>>, %arg3: memref<2xf32, #tpu.memory_space<smem>>, %arg4: memref<2xf32, #tpu.memory_space<smem>>, %arg5: memref<1x2x16x16xf32, #tpu.memory_space<vmem>>) attributes {dimension_semantics = [#tpu.dimension_semantics<parallel>, #tpu.dimension_semantics<parallel>], iteration_bounds = array<i64: 2, 1>, scalar_prefetch = 0 : i64, scratch_operands = 0 : i64, tpu.core_type = #tpu.core_type<tc>, window_params = [{transform_indices = @transform_0, window_bounds = array<i64: 1, 2, 16, 16>}, {transform_indices = @transform_1, window_bounds = array<i64: 2>}, {transform_indices = @transform_2, window_bounds = array<i64: 2>}, {transform_indices = @transform_3, window_bounds = array<i64: 1, 2, 16, 16>}]} {
    %c0 = arith.constant 0 : index
    %c0_0 = arith.constant 0 : index
    %c0_1 = arith.constant 0 : index
    %c0_2 = arith.constant 0 : index
    %0 = vector.load %arg2[%c0, %c0_0, %c0_1, %c0_2] : memref<1x2x16x16xbf16, #tpu.memory_space<vmem>>, vector<1x1x16x16xbf16>
    %1 = vector.shape_cast %0 : vector<1x1x16x16xbf16> to vector<16x16xbf16>
    %2 = arith.extf %1 : vector<16x16xbf16> to vector<16x16xf32>
    %c0_3 = arith.constant 0 : index
    %3 = memref.load %arg3[%c0_3] : memref<2xf32, #tpu.memory_space<smem>>
    %4 = vector.broadcast %3 : f32 to vector<16x16xf32>
    %5 = arith.mulf %2, %4 : vector<16x16xf32>
    %c0_4 = arith.constant 0 : index
    %6 = memref.load %arg4[%c0_4] : memref<2xf32, #tpu.memory_space<smem>>
    %7 = vector.broadcast %6 : f32 to vector<16x16xf32>
    %8 = arith.addf %5, %7 : vector<16x16xf32>
    %cst = arith.constant 0.000000e+00 : f32
    %9 = vector.broadcast %cst : f32 to vector<16x16xf32>
    %10 = arith.subf %9, %8 : vector<16x16xf32>
    %11 = math.exp %10 : vector<16x16xf32>
    %cst_5 = arith.constant 1.000000e+00 : f32
    %12 = vector.broadcast %cst_5 : f32 to vector<16x16xf32>
    %13 = arith.addf %12, %11 : vector<16x16xf32>
    %14 = tpu.reciprocal %13 {approx = true} : vector<16x16xf32> -> vector<16x16xf32>
    %cst_6 = arith.constant 3.000000e-01 : f32
    %15 = vector.broadcast %cst_6 : f32 to vector<16x16xf32>
    %16 = arith.mulf %15, %14 : vector<16x16xf32>
    %c0_7 = arith.constant 0 : index
    %c0_8 = arith.constant 0 : index
    %c0_9 = arith.constant 0 : index
    %c0_10 = arith.constant 0 : index
    %17 = vector.load %arg5[%c0_7, %c0_8, %c0_9, %c0_10] : memref<1x2x16x16xf32, #tpu.memory_space<vmem>>, vector<1x1x16x16xf32>
    %18 = vector.shape_cast %17 : vector<1x1x16x16xf32> to vector<16x16xf32>
    %19 = vector.shape_cast %16 : vector<16x16xf32> to vector<1x1x16x16xf32>
    tpu.vector_store %arg5[%c0_7, %c0_8, %c0_9, %c0_10], %19 {strides = array<i32>} : memref<1x2x16x16xf32, #tpu.memory_space<vmem>>, vector<1x1x16x16xf32>,
    %c0_11 = arith.constant 0 : index
    %c1 = arith.constant 1 : index
    %c0_12 = arith.constant 0 : index
    %c0_13 = arith.constant 0 : index
    %20 = vector.load %arg2[%c0_11, %c1, %c0_12, %c0_13] : memref<1x2x16x16xbf16, #tpu.memory_space<vmem>>, vector<1x1x16x16xbf16>
    %21 = vector.shape_cast %20 : vector<1x1x16x16xbf16> to vector<16x16xbf16>
    %22 = arith.extf %21 : vector<16x16xbf16> to vector<16x16xf32>
    %c1_14 = arith.constant 1 : index
    %23 = memref.load %arg3[%c1_14] : memref<2xf32, #tpu.memory_space<smem>>
    %24 = vector.broadcast %23 : f32 to vector<16x16xf32>
    %25 = arith.mulf %22, %24 : vector<16x16xf32>
    %c1_15 = arith.constant 1 : index
    %26 = memref.load %arg4[%c1_15] : memref<2xf32, #tpu.memory_space<smem>>
    %27 = vector.broadcast %26 : f32 to vector<16x16xf32>
    %28 = arith.addf %25, %27 : vector<16x16xf32>
    %cst_16 = arith.constant 0.000000e+00 : f32
    %29 = vector.broadcast %cst_16 : f32 to vector<16x16xf32>
    %30 = arith.subf %29, %28 : vector<16x16xf32>
    %31 = math.exp %30 : vector<16x16xf32>
    %cst_17 = arith.constant 1.000000e+00 : f32
    %32 = vector.broadcast %cst_17 : f32 to vector<16x16xf32>
    %33 = arith.addf %32, %31 : vector<16x16xf32>
    %34 = tpu.reciprocal %33 {approx = true} : vector<16x16xf32> -> vector<16x16xf32>
    %cst_18 = arith.constant 3.000000e-01 : f32
    %35 = vector.broadcast %cst_18 : f32 to vector<16x16xf32>
    %36 = arith.mulf %35, %34 : vector<16x16xf32>
    %c0_19 = arith.constant 0 : index
    %c1_20 = arith.constant 1 : index
    %c0_21 = arith.constant 0 : index
    %c0_22 = arith.constant 0 : index
    %37 = vector.load %arg5[%c0_19, %c1_20, %c0_21, %c0_22] : memref<1x2x16x16xf32, #tpu.memory_space<vmem>>, vector<1x1x16x16xf32>
    %38 = vector.shape_cast %37 : vector<1x1x16x16xf32> to vector<16x16xf32>
    %39 = vector.shape_cast %36 : vector<16x16xf32> to vector<1x1x16x16xf32>
    tpu.vector_store %arg5[%c0_19, %c1_20, %c0_21, %c0_22], %39 {strides = array<i32>} : memref<1x2x16x16xf32, #tpu.memory_space<vmem>>, vector<1x1x16x16xf32>,
    return
  }
  func.func @transform_0(%arg0: i32, %arg1: i32) -> (i32, i32, i32, i32) {
    %c0_i32 = arith.constant 0 : i32
    %c0_i32_0 = arith.constant 0 : i32
    %c0_i32_1 = arith.constant 0 : i32
    return %arg0, %c0_i32, %arg1, %c0_i32_0 : i32, i32, i32, i32
  }
  func.func @transform_1(%arg0: i32, %arg1: i32) -> i32 {
    %c0_i32 = arith.constant 0 : i32
    %c0_i32_0 = arith.constant 0 : i32
    return %c0_i32 : i32
  }
  func.func @transform_2(%arg0: i32, %arg1: i32) -> i32 {
    %c0_i32 = arith.constant 0 : i32
    %c0_i32_0 = arith.constant 0 : i32
    return %c0_i32 : i32
  }
  func.func @transform_3(%arg0: i32, %arg1: i32) -> (i32, i32, i32, i32) {
    %c0_i32 = arith.constant 0 : i32
    %c0_i32_0 = arith.constant 0 : i32
    %c0_i32_1 = arith.constant 0 : i32
    return %arg0, %c0_i32, %arg1, %c0_i32_0 : i32, i32, i32, i32
  }
}

</mosaic_0001>

<bundles_post_ra>
// kernel: get_disp_forward.3
= control target key start
LH: loop header
LB: loop body
LE: loop exit
PB: predicated region body
PF: predicated region fallthrough
CT: control target
= control target key end

     0   :  { %8 = vsyncpa [#allocation4], 0  ;;  %s796_s0 = inlined_call_operand.vmem [shape: bf16[2,2,16,16], index: 0, kind: input, shape index: {}]   ;;  %s797_s1 = inlined_call_operand.vmem [shape: f32[2], index: 1, kind: input, shape index: {}]   ;;  %s798_s2 = inlined_call_operand.vmem [shape: f32[2], index: 2, kind: input, shape index: {}]   ;;  %s799_s3 = inlined_call_operand.hbm [shape: f32[2,2,16,16], index: 3, kind: output, shape index: {}]  }
   0x1   :  { %9 = vsyncpa [#allocation6], 0 }
   0x2   :  { %10 = vsyncpa [#allocation3], 0 }
   0x3   :  { %12 = vsyncpa [#allocation3 + $0x1], 0  ;;  %s671_s12 = smov 0   ;;  %s673_s13 = smov 0  }
   0x4   :  { %s675_s14 = smov 0   ;;  %s677_s15 = smov 0  }
   0x5   :  { %s679_s16 = smov 0   ;;  %s681_s17 = smov 0  }
   0x6 LB: > { %s401_s18 = sadd.s32 4294967295, %s645_s17   ;;  %s402_s19 = sadd.s32 4294967294, %s645_s17   ;;  %s645_s17 = sphi %s681_s17, %s18_s17   ;;  %s641_s16 = sphi %s679_s16, %s807_s16   ;;  %s637_s15 = sphi %s677_s15, %s806_s15   ;;  %s633_s14 = sphi %s675_s14, %s805_s14   ;;  %s629_s13 = sphi %s673_s13, %s804_s13   ;;  %s625_s12 = sphi %s671_s12, %s803_s12  }
   0x7   : > { %s30_s20 = sadd.s32 1, %s641_s16  ;;  %s109_s21 = sadd.s32 1, %s633_s14 }
   0x8   : > { %p32_p0 = scmp.ge.s32.totalorder %s30_s20, 2  ;;  %p119_p1 = scmp.ne.s32.totalorder %s633_s14, %s629_s13 }
   0x9   : > { %p120_p2 = scmp.eq.s32.totalorder %s401_s18, 1  ;;  %p125_p3 = scmp.ne.s32.totalorder %s629_s13, %s625_s12 }
   0xa   : > { %s809_s20 = smov (%p32_p0, %s30_s20), 0  ;;  %p126_p5 = scmp.eq.s32.totalorder %s402_s19, 1 }
   0xb   : > { %p711_p4 = por %p120_p2, %p119_p1  ;;  %s104_s23 = ssub.s32 %s641_s16, %s809_s20 }
   0xc   : > { %p403_p6 = scmp.ge.s32.totalorder %s645_s17, 1  ;;  %p107_p7 = scmp.eq.s32.totalorder %s104_s23, 0 }
   0xd   : > { %p718_p8 = por %p126_p5, %p125_p3  ;;  %p133_p9 = scmp.lt.s32.totalorder %s645_s17, 3 }
   0xe   : > { %s724_s25 = scalar_select %p107_p7, %s633_s14, %s109_s21  }
   0xf   : > { %p134_p10 = pnand %p403_p6, %p133_p9  ;;  %p726_p11 = scmp.eq.s32.totalorder %s401_s18, 0 }
  0x10   : > { %s145_s29 = sshll.u32 %s797_s1, 4  ;;  %s155_s5 = sshll.u32 %s798_s2, 4  ;;  %s146_s29 = int_to_ptr.vmem [resolvable:$true] %s145_s29  ;;  %s156_s5 = int_to_ptr.vmem [resolvable:$true] %s155_s5 }
  0x11   : > { %p445_p12 = pneg %p134_p10  ;;  %s647_s6 = smov [#allocation2]  }
  0x12   : > { %s648_s7 = smov [#allocation5]   ;;  %181 = sbr.rel (%p134_p10) target bundleno = 70 (0x46), region = 32 }
  0x13   : > { %p446_p13 = pnand %p726_p11, %p445_p12 }
  0x15   : > { %448 = dma.vmem_to_smem (!%p446_p13), %s146_s29, 16, %s647_s6, [#allocation4]  }
  0x16   : > { %451 = dma.vmem_to_smem (!%p446_p13), %s156_s5, 16, %s648_s7, [#allocation6]  }
  0x17   : > { %612 = dma.done.wait (%p726_p11), [#allocation4], 16  }
  0x18   : > { %614 = vsyncadd (%p726_p11), [#allocation4], 4294967280 }
  0x19   : > { %616 = dma.done.wait (%p726_p11), [#allocation6], 16  }
  0x1a   : > { %618 = vsyncadd (%p726_p11), [#allocation6], 4294967280 }
  0x1b   : > { %193 = sfence }
  0x1c   : > { %p217_p0 = scmp.lt.s32.totalorder %s637_s15, 1  ;;  %s231_s8 = sld [smem:[#allocation2]]  ;;  %vm251_vm0 = vcmask 130048  }
  0x1d   : > { %s235_s9 = sld [smem:[#allocation5]]  ;;  %s213_s26 = sand.u32 1, %s629_s13  }
  0x1e   : > { %s218_s10 = scalar_select %p217_p0, %s637_s15, 1 }
  0x1f   : > { %s415_s23 = sld [smem:[#allocation2 + $0x1]]  ;;  %s410_s28 = sshll.u32 %s213_s26, 5 }
  0x20   : > { %s424_s11 = sshll.u32 %s218_s10, 4  ;;  %s416_s27 = sld [smem:[#allocation5 + $0x1]] }
  0x21   : > { %s224_s21 = scalar_lea.vmem %s796_s0, %s424_s11  ;;  %s425_s29 = sshll.u32 %s637_s15, 5 }
  0x22   : > { %v427_v0 = vld [vmem:[%s224_s21] sm:$0xff]   ;;  %v232_v1 = vstv %s231_s8  ;;  %v434_v2 = vld [vmem:[%s224_s21 + $0x8] sm:$0xff]   ;;  %s296_s5 = scalar_lea.hbm %s799_s3, %s425_s29  ;;  %s215_s6 = scalar_lea.vmem [#allocation7], %s410_s28 }
  0x23   : > { %v428_v3 = vunpack.c.l.bf16 %v427_v0  ;;  %v429_v4 = vunpack.c.h.bf16 %v427_v0  ;;  %v236_v5 = vstv %s235_s9  ;;  %v432_v6 = vunpack.c.l.bf16 %v434_v2  ;;  %s297_s7 = sshll.u32 %s215_s6, 4  ;;  %s299_s8 = sshll.u32 %s296_s5, 4  ;;  %s298_s7 = int_to_ptr.vmem [resolvable:$true] %s297_s7  ;;  %s300_s8 = int_to_ptr.hbm [resolvable:$true] %s299_s8 }
  0x24   : > { %v433_v7 = vunpack.c.h.bf16 %v434_v2  ;;  %s283_s15 = scalar_lea.sflag [#allocation3], %s213_s26  ;;  %s573_s9 = sshra.s32 %s300_s8, 4  ;;  %s574_s9 = int_to_ptr.hbm [resolvable:$true] %s573_s9 }
  0x25   : > { %v233_v8 = vmul.f32 %v428_v3, %v232_v1  ;;  %v234_v9 = vmul.f32 %v429_v4, %v232_v1  ;;  %v260_v12 = vstv %s415_s23  ;;  %s575_s10 = scalar_lea.hbm %s574_s9, 32  ;;  %s579_s19 = scalar_lea.hbm %s799_s3, 64 }
  0x26   : > { %v261_v13 = vmul.f32 %v432_v6, %v260_v12  ;;  %v264_v14 = vstv %s416_s27  ;;  %v262_v15 = vmul.f32 %v433_v7, %v260_v12  ;;  %p576_p1 = scmp.ne.s32.totalorder %s574_s9, %s575_s10  ;;  %p580_p5 = scmp.lt.s32.totalorder %s574_s9, %s799_s3 }
  0x27   : > { %v237_v10 = vadd.f32 %v236_v5, %v233_v8  ;;  %v238_v11 = vadd.f32 %v236_v5, %v234_v9  ;;  %p581_p6 = scmp.lt.s32.totalorder %s579_s19, %s575_s10 }
  0x28   : > { %v265_v18 = vadd.f32 %v264_v14, %v261_v13  ;;  %v266_v19 = vadd.f32 %v264_v14, %v262_v15  ;;  %p577_p2 = pnand %p576_p1, %p711_p4 }
  0x29   : > { %v239_v16 = vsub.f32 0.0, %v237_v10  ;;  %v240_v17 = vsub.f32 0.0, %v238_v11  ;;  %p582_p7 = por %p581_p6, %p580_p5 }
  0x2a   : > { %v267_v22 = vsub.f32 0.0, %v265_v18  ;;  %v268_v23 = vsub.f32 0.0, %v266_v19  ;;  %p578_p3 = pneg %p577_p2 }
  0x2b   : > { %v241_v20 = vmul.f32 1.442695, %v239_v16  ;;  %v243_v21 = vmul.f32 1.442695, %v240_v17 }
  0x2c   : > { %v269_v24 = vmul.f32 1.442695, %v267_v22  ;;  %v271_v25 = vmul.f32 1.442695, %v268_v23  ;;  %p583_p9 = pnand %p582_p7, %p578_p3 }
  0x2d   : > { %513 = vpow2.f32 %v241_v20 }
  0x2e   : > { %515 = vpow2.f32 %v243_v21 }
  0x2f   : > { %517 = vpow2.f32 %v269_v24 }
  0x30   : > { %519 = vpow2.f32 %v271_v25 }
  0x33   : > { %v514_v26 = vpop.eup %513 }
  0x34   : > { %v516_v27 = vpop.eup %515  ;;  %v245_v28 = vadd.f32 1.0, %v514_v26 }
  0x35   : > { %v246_v29 = vadd.f32 1.0, %v516_v27  ;;  %v518_v30 = vpop.eup %517 }
  0x36   : > { %521 = vrcp.f32 %v245_v28  ;;  %v520_v31 = vpop.eup %519  ;;  %v273_v32 = vadd.f32 1.0, %v518_v30 }
  0x37   : > { %523 = vrcp.f32 %v246_v29  ;;  %v274_v33 = vadd.f32 1.0, %v520_v31 }
  0x38   : > { %525 = vrcp.f32 %v273_v32 }
  0x39   : > { %527 = vrcp.f32 %v274_v33 }
  0x3c   : > { %v522_v34 = vpop.eup %521 }
  0x3d   : > { %v524_v35 = vpop.eup %523  ;;  %v249_v36 = vmul.f32 0.3, %v522_v34 }
  0x3e   : > { %v250_v37 = vmul.f32 0.3, %v524_v35  ;;  %v526_v38 = vpop.eup %525 }
  0x3f   : > { %252 = vst.msk [vmem:[%s215_s6] sm:$0xff] %vm251_vm0, %v249_v36  ;;  %v528_v39 = vpop.eup %527  ;;  %v277_v40 = vmul.f32 0.3, %v526_v38 }
  0x40   : > { %253 = vst.msk [vmem:[%s215_s6 + $0x8] sm:$0xff] %vm251_vm0, %v250_v37  ;;  %v278_v41 = vmul.f32 0.3, %v528_v39 }
  0x41   : > { %417 = vst.msk [vmem:[%s215_s6 + $0x10] sm:$0xff] %vm251_vm0, %v277_v40 }
  0x42   : > { %418 = vst.msk [vmem:[%s215_s6 + $0x18] sm:$0xff] %vm251_vm0, %v278_v41 }
  0x43   : > { %586 = shalt.err (!%p583_p9)
}
  0x44   : > { %s649_s27 = smov 128   ;;  %s650_s26 = smov 8  }
  0x45   : > { %443 = dma.vmem_to_hbm [thread:$0]  (%p711_p4), %s298_s7, 512, %s300_s8, %s283_s15, %s649_s27, %s649_s27, %s650_s26  }
  0x46 PF: > { %p460_p10 = scmp.ge.s32.totalorder %s645_s17, 2  ;;  %s314_s28 = sand.u32 1, %s625_s12  }
  0x47   : > { %s315_s29 = scalar_lea.sflag [#allocation3], %s314_s28 }
  0x48   : > { %p453_p11 = pnand %p460_p10, %p718_p8 }
  0x4a   : > { %p454_p12 = pneg %p453_p11 }
  0x4c   : > { %620 = dma.done.wait (%p454_p12), %s315_s29, 512  }
  0x4d   : > { %622 = vsyncadd (%p454_p12), %s315_s29, 4294966784  ;;  %s18_s17 = sadd.s32 1, %s645_s17   ;;  %s803_s12 = smov %s629_s13 }
  0x4e   : > { %p15_p13 = scmp.ge.s32.totalorder %s18_s17, 4   ;;  %s804_s13 = smov %s633_s14 }
  0x4f   : > { %s805_s14 = smov %s724_s25  ;;  %s806_s15 = smov %s641_s16 }
  0x50   : > { %s807_s16 = smov %s809_s20  ;;  %17 = sbr.rel (!%p15_p13) target bundleno = 6 (0x6), region = 78 }
  0x55   :  { %321 = vsyncpa [#allocation3], 1 }
  0x56   :  { %323 = vsyncpa [#allocation3 + $0x1], 1 }
  0x57   :  { %324 = vsyncpa [#allocation4], 1 }
  0x58   :  { %326 = vsyncpa [#allocation4 + $0x1], 1 }
  0x59   :  { %327 = vsyncpa [#allocation6], 1 }

// kernel: get_disp_forward.2
= control target key start
LH: loop header
LB: loop body
LE: loop exit
PB: predicated region body
PF: predicated region fallthrough
CT: control target
= control target key end

     0   :  { %10 = vsyncpa [#allocation4], 0  ;;  %s4305_s0 = inlined_call_operand.hbm [shape: f32[2,8,16,16], index: 0, kind: input, shape index: {}]   ;;  %s4306_s1 = inlined_call_operand.vmem [shape: f32[144], index: 1, kind: input, shape index: {}]   ;;  %s4307_s2 = inlined_call_operand.vmem [shape: f32[2], index: 2, kind: input, shape index: {}]   ;;  %s4308_s3 = inlined_call_operand.vmem [shape: bf16[2,2,16,16], index: 3, kind: output, shape index: {0}]   ;;  %s4309_s4 = inlined_call_operand.vmem [shape: f32[2,1,2,2], index: 4, kind: output, shape index: {1}]  }
   0x1   :  { %12 = vsyncpa [#allocation4 + $0x1], 0 }
   0x2   :  { %13 = vsyncpa [#allocation5], 0 }
   0x3   :  { %14 = vsyncpa [#allocation8], 0  ;;  %s2848_s15 = smov 0   ;;  %s2850_s16 = smov 0  }
   0x4   :  { %s2852_s17 = smov 0   ;;  %s2854_s18 = smov 0  }
   0x5   :  { %s2856_s19 = smov 0   ;;  %s2858_s20 = smov 0  }
   0x6 LB: > { %s2391_s21 = sadd.s32 4294967295, %s2813_s20   ;;  %s41_s22 = sadd.s32 1, %s2801_s17  ;;  %s2813_s20 = sphi %s2858_s20, %s20_s20   ;;  %s2809_s19 = sphi %s2856_s19, %s4328_s19   ;;  %s2805_s18 = sphi %s2854_s18, %s4327_s18   ;;  %s2801_s17 = sphi %s2852_s17, %s4326_s17   ;;  %s2797_s16 = sphi %s2850_s16, %s4325_s16   ;;  %s2793_s15 = sphi %s2848_s15, %s4324_s15  }
   0x7   : > { %p48_p0 = scmp.ne.s32.totalorder %s2801_s17, %s2797_s16  ;;  %p49_p1 = scmp.eq.s32.totalorder %s2813_s20, 0 }
   0x8   : > { %p54_p2 = scmp.ne.s32.totalorder %s2797_s16, %s2793_s15  ;;  %p2882_p3 = scmp.eq.s32.totalorder %s2391_s21, 0 }
   0x9   : > { %p50_p4 = por %p49_p1, %p48_p0  ;;  %p2393_p5 = scmp.ge.s32.totalorder %s2813_s20, 1 }
   0xa   : > { %p2889_p6 = por %p2882_p3, %p54_p2  ;;  %p163_p7 = scmp.lt.s32.totalorder %s2813_s20, 3 }
   0xb   : > { %s175_s27 = sshll.u32 %s4306_s1, 4  ;;  %p2588_p10 = scmp.lt.s32.totalorder %s2813_s20, 2  ;;  %s176_s27 = int_to_ptr.vmem [resolvable:$true] %s175_s27 }
   0xc   : > { %p2897_p8 = pnand %p2393_p5, %p163_p7  ;;  %s185_s5 = sshll.u32 %s4307_s2, 4  ;;  %s186_s5 = int_to_ptr.vmem [resolvable:$true] %s185_s5 }
   0xd   : > { %p2909_p12 = pnand %p2588_p10, %p50_p4  ;;  %s2815_s7 = smov [#allocation6]  }
   0xe   : > { %p2575_p9 = pneg %p2897_p8  ;;  %s2816_s8 = smov [#allocation7]  }
   0xf   : > { %s196_s9 = sand.u32 1, %s2801_s17   ;;  %s32_s10 = sadd.s32 1, %s2809_s19 }
  0x10   : > { %p2576_p11 = pnand %p2575_p9, %p2882_p3  ;;  %p34_p13 = scmp.ge.s32.totalorder %s32_s10, 2 }
  0x11   : > { %s2397_s11 = sshll.u32 %s196_s9, 7  ;;  %s2555_s12 = sshll.u32 %s2809_s19, 7 }
  0x12   : > { %2578 = dma.vmem_to_smem (!%p2576_p11), %s176_s27, 32, %s2815_s7, [#allocation5]  }
  0x13   : > { %2581 = dma.vmem_to_smem (!%p2576_p11), %s186_s5, 16, %s2816_s8, [#allocation8]  }
  0x14   : > { %s4330_s10 = smov (%p34_p13, %s32_s10), 0  ;;  %s207_s15 = scalar_lea.hbm %s4305_s0, %s2555_s12 }
  0x15   : > { %s200_s21 = scalar_lea.vmem [#allocation3], %s2397_s11  ;;  %s36_s26 = ssub.s32 %s2809_s19, %s4330_s10 }
  0x16   : > { %s210_s25 = sshll.u32 %s200_s21, 4  ;;  %s208_s27 = sshll.u32 %s207_s15, 4  ;;  %s209_s27 = int_to_ptr.hbm [resolvable:$true] %s208_s27  ;;  %s211_s25 = int_to_ptr.vmem [resolvable:$true] %s210_s25 }
  0x17   : > { %p39_p0 = scmp.eq.s32.totalorder %s36_s26, 0  ;;  %s197_s30 = scalar_lea.sflag [#allocation4], %s196_s9 }
  0x18   : > { %s2817_s5 = smov 128   ;;  %s2818_s7 = smov 8  }
  0x19   : > { %s2926_s29 = scalar_select %p39_p0, %s2801_s17, %s41_s22  }
  0x1a   : > { %2585 = dma.hbm_to_vmem [thread:$0]  (!%p2909_p12), %s209_s27, 2048, %s211_s25, %s197_s30, %s2817_s5, %s2817_s5, %s2818_s7  }
  0x1b   : > { %222 = sbr.rel (%p2897_p8) target bundleno = 1191 (0x4a7), region = 32 }
  0x20   : > { %s224_s8 = sand.u32 1, %s2797_s16  }
  0x21   : > { %s2401_s11 = sshll.u32 %s224_s8, 7  ;;  %s225_s12 = scalar_lea.sflag [#allocation4], %s224_s8 }
  0x22   : > { %s2933_s13 = scalar_lea.vmem [#allocation3], %s2401_s11 }
  0x23   : > { %2780 = dma.done.wait (%p2889_p6), %s225_s12, 2048  }
  0x24   : > { %2782 = vsyncadd (%p2889_p6), %s225_s12, 4294965248 }
  0x25   : > { %2784 = dma.done.wait (%p2882_p3), [#allocation5], 32  }
  0x26   : > { %2786 = vsyncadd (%p2882_p3), [#allocation5], 4294967264 }
  0x27   : > { %2788 = dma.done.wait (%p2882_p3), [#allocation8], 16  }
  0x28   : > { %2790 = vsyncadd (%p2882_p3), [#allocation8], 4294967280 }
  0x29   : > { %244 = sfence }
  0x2a   : > { %v294_v0 = vld [vmem:[%s2933_s13] sm:$0xff]  ;;  %v296_v1 = vld [vmem:[%s2933_s13 + $0x10] sm:$0xff]  ;;  %s2819_s22 = smov 1   ;;  %vm391_vm0 = vcmask 131080   ;;  %v2820_v3 = vmov 0.0   ;;  %v295_v4 = vld [vmem:[%s2933_s13 + $0x8] sm:$0xff] }
  0x2b   : > { %326 = vrot.lane.b32.xlu0 %v294_v0, %s2819_s22  ;;  %330 = vrot.lane.b32.xlu1 %v296_v1, %s2819_s22  ;;  %v298_v2 = vld [vmem:[%s2933_s13 + $0x20] sm:$0xff]  ;;  %392 = vst.msk [vmem:[#allocation2] sm:$0x1] %vm391_vm0, %v2820_v3  ;;  %v297_v5 = vld [vmem:[%s2933_s13 + $0x18] sm:$0xff]  ;;  %vm374_vm1 = vcmask 138248   ;;  %vm408_vm2 = vcmask 7168  }
  0x2c   : > { %334 = vrot.lane.b32.xlu2 %v298_v2, %s2819_s22  ;;  %393 = vst.msk [vmem:[#allocation2 + $0x18] sm:$0x1] %vm391_vm0, %v2820_v3  ;;  %v299_v6 = vld [vmem:[%s2933_s13 + $0x28] sm:$0xff]  ;;  %v300_v7 = vld [vmem:[%s2933_s13 + $0x30] sm:$0xff]  ;;  %v301_v8 = vld [vmem:[%s2933_s13 + $0x38] sm:$0xff]  ;;  %s2410_s23 = sld [smem:[#allocation6 + $0x49]] }
  0x2d   : > { %394 = vst.msk [vmem:[#allocation2 + $0x30] sm:$0x1] %vm391_vm0, %v2820_v3  ;;  %v302_v9 = vld [vmem:[%s2933_s13 + $0x40] sm:$0xff]  ;;  %v303_v10 = vld [vmem:[%s2933_s13 + $0x48] sm:$0xff]  ;;  %v304_v11 = vld [vmem:[%s2933_s13 + $0x50] sm:$0xff]  ;;  %vm434_vm3 = vcmask 146568  }
  0x2e   : > { %395 = vst.msk [vmem:[#allocation2 + $0x48] sm:$0x1] %vm391_vm0, %v2820_v3  ;;  %v306_v12 = vld [vmem:[%s2933_s13 + $0x60] sm:$0xff]  ;;  %v305_v13 = vld [vmem:[%s2933_s13 + $0x58] sm:$0xff]  ;;  %v307_v14 = vld [vmem:[%s2933_s13 + $0x68] sm:$0xff]  ;;  %s2409_s24 = sld [smem:[#allocation6 + $0x1]] }
  0x2f   : > { %396 = vst.msk [vmem:[#allocation2 + $0x60] sm:$0x1] %vm391_vm0, %v2820_v3  ;;  %v309_v15 = vld [vmem:[%s2933_s13 + $0x78] sm:$0xff]  ;;  %v308_v16 = vld [vmem:[%s2933_s13 + $0x70] sm:$0xff]  ;;  %vm411_vm4 = vcmask 1024   ;;  %s2411_s28 = sld [smem:[#allocation6 + $0x2]] }
  0x30   : > { %397 = vst.msk [vmem:[#allocation2 + $0x78] sm:$0x1] %vm391_vm0, %v2820_v3  ;;  %vm437_vm5 = vcmask 140424   ;;  %s2821_s6 = smov 127   ;;  %s2415_s9 = sld [smem:[#allocation6 + $0x4]]  ;;  %vm2153_vm6 = vcmask 125952  }
  0x31   : > { %398 = vst.msk [vmem:[#allocation2 + $0x90] sm:$0x1] %vm391_vm0, %v2820_v3  ;;  %s2412_s14 = sld [smem:[#allocation6 + $0x4a]]  ;;  %s2822_s15 = smov 126   ;;  %vm2156_vm7 = vcmask 130048   ;;  %vm2229_vm8 = vcmask 1040384  }
  0x32   : > { %399 = vst.msk [vmem:[#allocation2 + $0xa8] sm:$0x1] %vm391_vm0, %v2820_v3  ;;  %v493_v19 = vstv %s2410_s23  ;;  %s3041_s21 = sld [smem:[#allocation6 + $0x4c]]  ;;  %p278_p1 = scmp.lt.s32.totalorder %s2805_s18, 1  ;;  %vm2231_vm9 = vcmask 9216  }
  0x33   : > { %328 = vrot.lane.b32.xlu0 %v295_v4, %s2819_s22  ;;  %332 = vrot.lane.b32.xlu1 %v297_v5, %s2819_s22  ;;  %400 = vst.msk [vmem:[#allocation2 + $0x11] sm:$0x1] %vm391_vm0, %v2820_v3  ;;  %s3048_s25 = sld [smem:[#allocation6 + $0x4d]] }
  0x34   : > { %336 = vrot.lane.b32.xlu2 %v299_v6, %s2819_s22  ;;  %401 = vst.msk [vmem:[#allocation2 + $0x29] sm:$0x1] %vm391_vm0, %v2820_v3  ;;  %v479_v20 = vstv %s2409_s24  ;;  %s3054_s26 = sld [smem:[#allocation6 + $0x5]]  ;;  %s4332_s18 = smov (!%p278_p1, %s2805_s18), 1 }
  0x35   : > { %402 = vst.msk [vmem:[#allocation2 + $0x41] sm:$0x1] %vm391_vm0, %v2820_v3  ;;  %v507_v24 = vstv %s2411_s28  ;;  %s3069_s27 = sld [smem:[#allocation6 + $0x7]] }
  0x36   : > { %403 = vst.msk [vmem:[#allocation2 + $0x59] sm:$0x1] %vm391_vm0, %v2820_v3  ;;  %v549_v30 = vstv %s2415_s9  ;;  %s3086_s30 = sld [smem:[#allocation6 + $0x8]] }
  0x37   : > { %404 = vst.msk [vmem:[#allocation2 + $0x71] sm:$0x1] %vm391_vm0, %v2820_v3  ;;  %v521_v31 = vstv %s2412_s14  ;;  %s3094_s5 = sld [smem:[#allocation6 + $0x4f]] }
  0x38   : > { %405 = vst.msk [vmem:[#allocation2 + $0x89] sm:$0x1] %vm391_vm0, %v2820_v3  ;;  %v563_v36 = vstv %s3041_s21  ;;  %s3117_s7 = sld [smem:[#allocation6 + $0x50]] }
  0x39   : > { %406 = vst.msk [vmem:[#allocation2 + $0xa1] sm:$0x1] %vm391_vm0, %v2820_v3  ;;  %v591_v41 = vstv %s3048_s25  ;;  %s3129_s8 = sld [smem:[#allocation6 + $0x52]] }
  0x3a   : > { %407 = vst.msk [vmem:[#allocation2 + $0xb9] sm:$0x1] %vm391_vm0, %v2820_v3  ;;  %v577_v42 = vstv %s3054_s26  ;;  %s3133_s11 = sld [smem:[#allocation6 + $0xa]] }
  0x3b   : > { %338 = vrot.lane.b32.xlu0 %v300_v7, %s2819_s22  ;;  %340 = vrot.lane.b32.xlu1 %v301_v8, %s2819_s22  ;;  %v619_v49 = vstv %s3069_s27  ;;  %s3155_s12 = sld [smem:[#allocation6 + $0xb]] }
  0x3c   : > { %342 = vrot.lane.b32.xlu2 %v302_v9, %s2819_s22  ;;  %v647_v55 = vstv %s3086_s30  ;;  %s3172_s13 = sld [smem:[#allocation6 + $0xd]] }
  0x3d   : > { %v633_v56 = vstv %s3094_s5  ;;  %s3206_s23 = sld [smem:[#allocation6 + $0x55]] }
  0x3e   : > { %v661_v61 = vstv %s3117_s7  ;;  %s3225_s24 = sld [smem:[#allocation6 + $0x10]] }
  0x3f   : > { %v704_v5 = vstv %s3129_s8  ;;  %s3233_s28 = sld [smem:[#allocation6 + $0xe]] }
  0x40   : > { %v690_v6 = vstv %s3133_s11  ;;  %s2441_s9 = sld [smem:[#allocation6 + $0x11]] }
  0x41   : > { %s3265_s14 = sld [smem:[#allocation6 + $0x14]] }
  0x42   : > { %s2445_s21 = sld [smem:[#allocation6 + $0x13]] }
  0x43   : > { %344 = vrot.lane.b32.xlu0 %v303_v10, %s2819_s22  ;;  %346 = vrot.lane.b32.xlu1 %v304_v11, %s2819_s22  ;;  %s3281_s25 = sld [smem:[#allocation6 + $0x16]] }
  0x44   : > { %348 = vrot.lane.b32.xlu2 %v305_v13, %s2819_s22  ;;  %s3290_s26 = sld [smem:[#allocation6 + $0x19]] }
  0x45   : > { %s3302_s27 = sld [smem:[#allocation6 + $0x17]] }
  0x46   : > { %s3318_s30 = sld [smem:[#allocation6 + $0x1a]] }
  0x47   : > { %s3331_s5 = sld [smem:[#allocation6 + $0x1d]] }
  0x48   : > { %s3337_s7 = sld [smem:[#allocation6 + $0x1c]] }
  0x49   : > { %s3355_s8 = sld [smem:[#allocation6 + $0x1f]] }
  0x4a   : > { %s3368_s11 = sld [smem:[#allocation6 + $0x22]] }
  0x4b   : > { %350 = vrot.lane.b32.xlu0 %v306_v12, %s2819_s22  ;;  %352 = vrot.lane.b32.xlu1 %v307_v14, %s2819_s22  ;;  %v718_v14 = vstv %s3155_s12  ;;  %s3376_s12 = sld [smem:[#allocation6 + $0x20]] }
  0x4c   : > { %354 = vrot.lane.b32.xlu2 %v308_v16, %s2819_s22 }
  0x53   : > { %356 = vrot.lane.b32.xlu0 %v309_v15, %s2819_s22  ;;  %s3180_s22 = sld [smem:[#allocation6 + $0x53]] }
  0x86   : > { %v335_v43 = vpop.permute.xlu2 %334 }
  0x87   : > { %379 = vst.msk [vmem:[#allocation2 + $0x31] sm:$0xff] %vm374_vm1, %v335_v43  ;;  %v858_v43 = vstv %s2441_s9  ;;  %s2413_s9 = sld [smem:[#allocation6 + $0x3]] }
  0x88   : > { %416 = vst.msk [vmem:[#allocation2 + $0x30] sm:$0xff] %vm408_vm2, %v2820_v3 }
  0x89   : > { %442 = vst.msk [vmem:[#allocation2 + $0x30] sm:$0xff] %vm434_vm3, %v2820_v3 }
  0x8e   : > { %v337_v50 = vpop.permute.xlu2 %336 }
  0x8f   : > { %380 = vst.msk [vmem:[#allocation2 + $0x39] sm:$0xff] %vm374_vm1, %v337_v50  ;;  %v929_v50 = vstv %s3265_s14  ;;  %s3441_s14 = sld [smem:[#allocation6 + $0x28]] }
  0x90   : > { %417 = vst.msk [vmem:[#allocation2 + $0x38] sm:$0xff] %vm408_vm2, %v2820_v3 }
  0x91   : > { %418 = vst.msk [vmem:[#allocation2 + $0x40] sm:$0x3] %vm411_vm4, %v2820_v3 }
  0x92   : > { %443 = vst.msk [vmem:[#allocation2 + $0x38] sm:$0xff] %vm434_vm3, %v2820_v3 }
  0x93   : > { %444 = vst.msk [vmem:[#allocation2 + $0x40] sm:$0x3] %vm437_vm5, %v2820_v3 }
  0x96   : > { %v343_v57 = vpop.permute.xlu2 %342 }
  0x97   : > { %383 = vst.msk [vmem:[#allocation2 + $0x61] sm:$0xff] %vm374_vm1, %v343_v57 }
  0x98   : > { %422 = vst.msk [vmem:[#allocation2 + $0x60] sm:$0xff] %vm408_vm2, %v2820_v3 }
  0x99   : > { %448 = vst.msk [vmem:[#allocation2 + $0x60] sm:$0xff] %vm434_vm3, %v2820_v3 }
  0x9d   : > { %v327_v17 = vpop.permute.xlu0 %326  ;;  %v331_v37 = vpop.permute.xlu1 %330 }
  0x9e   : > { %375 = vst.msk [vmem:[#allocation2 + $0x1] sm:$0xff] %vm374_vm1, %v327_v17  ;;  %v349_v62 = vpop.permute.xlu2 %348 }
  0x9f   : > { %409 = vst.msk [vmem:[#allocation2] sm:$0xff] %vm408_vm2, %v2820_v3 }
  0xa0   : > { %435 = vst.msk [vmem:[#allocation2] sm:$0xff] %vm434_vm3, %v2820_v3 }
  0xa1   : > { %377 = vst.msk [vmem:[#allocation2 + $0x19] sm:$0xff] %vm374_vm1, %v331_v37 }
  0xa2   : > { %413 = vst.msk [vmem:[#allocation2 + $0x18] sm:$0xff] %vm408_vm2, %v2820_v3 }
  0xa3   : > { %439 = vst.msk [vmem:[#allocation2 + $0x18] sm:$0xff] %vm434_vm3, %v2820_v3 }
  0xa4   : > { %386 = vst.msk [vmem:[#allocation2 + $0x81] sm:$0xff] %vm374_vm1, %v349_v62 }
  0xa5   : > { %v329_v18 = vpop.permute.xlu0 %328  ;;  %v333_v44 = vpop.permute.xlu1 %332  ;;  %427 = vst.msk [vmem:[#allocation2 + $0x88] sm:$0x3] %vm411_vm4, %v2820_v3 }
  0xa6   : > { %376 = vst.msk [vmem:[#allocation2 + $0x9] sm:$0xff] %vm374_vm1, %v329_v18  ;;  %v355_v8 = vpop.permute.xlu2 %354 }
  0xa7   : > { %410 = vst.msk [vmem:[#allocation2 + $0x8] sm:$0xff] %vm408_vm2, %v2820_v3  ;;  %v3019_v21 = vld [vmem:[#allocation2] sm:$0xff] }
  0xa8   : > { %412 = vst.msk [vmem:[#allocation2 + $0x10] sm:$0x3] %vm411_vm4, %v2820_v3  ;;  %v494_v22 = vmul.f32 %v493_v19, %v3019_v21  ;;  %v480_v23 = vmul.f32 %v479_v20, %v3019_v21  ;;  %v522_v33 = vmul.f32 %v521_v31, %v3019_v21  ;;  %v508_v34 = vmul.f32 %v507_v24, %v3019_v21 }
  0xa9   : > { %436 = vst.msk [vmem:[#allocation2 + $0x8] sm:$0xff] %vm434_vm3, %v2820_v3 }
  0xaa   : > { %438 = vst.msk [vmem:[#allocation2 + $0x10] sm:$0x3] %vm437_vm5, %v2820_v3  ;;  %498 = vrot.lane.b32.xlu0 %v494_v22, %s2821_s6  ;;  %484 = vrot.lane.b32.xlu1 %v480_v23, %s2821_s6  ;;  %v3151_v4 = vld [vmem:[#allocation2 + $0x18] sm:$0xff]  ;;  %v732_v22 = vstv %s3180_s22  ;;  %s3398_s22 = sld [smem:[#allocation6 + $0x23]] }
  0xab   : > { %378 = vst.msk [vmem:[#allocation2 + $0x21] sm:$0xff] %vm374_vm1, %v333_v44  ;;  %v705_v9 = vmul.f32 %v704_v5, %v3151_v4  ;;  %v691_v10 = vmul.f32 %v690_v6, %v3151_v4 }
  0xac   : > { %414 = vst.msk [vmem:[#allocation2 + $0x20] sm:$0xff] %vm408_vm2, %v2820_v3 }
  0xad   : > { %415 = vst.msk [vmem:[#allocation2 + $0x28] sm:$0x3] %vm411_vm4, %v2820_v3  ;;  %v339_v1 = vpop.permute.xlu0 %338  ;;  %v341_v7 = vpop.permute.xlu1 %340 }
  0xae   : > { %440 = vst.msk [vmem:[#allocation2 + $0x20] sm:$0xff] %vm434_vm3, %v2820_v3 }
  0xaf   : > { %441 = vst.msk [vmem:[#allocation2 + $0x28] sm:$0x3] %vm437_vm5, %v2820_v3 }
  0xb0   : > { %v3031_v25 = vld [vmem:[#allocation2 + $0x8] sm:$0xff]  ;;  %453 = vst.msk [vmem:[#allocation2 + $0x88] sm:$0x3] %vm437_vm5, %v2820_v3 }
  0xb1   : > { %v509_v26 = vmul.f32 %v507_v24, %v3031_v25  ;;  %v495_v27 = vmul.f32 %v493_v19, %v3031_v25  ;;  %v481_v28 = vmul.f32 %v479_v20, %v3031_v25  ;;  %v3039_v29 = vld [vmem:[#allocation2 + $0x1] sm:$0xff]  ;;  %v3051_v35 = vld [vmem:[#allocation2 + $0x9] sm:$0xff]  ;;  %v523_v40 = vmul.f32 %v521_v31, %v3031_v25  ;;  %381 = vst.msk [vmem:[#allocation2 + $0x49] sm:$0xff] %vm374_vm1, %v339_v1 }
  0xb2   : > { %v550_v32 = vmul.f32 %v549_v30, %v3039_v29  ;;  %v565_v38 = vmul.f32 %v563_v36, %v3051_v35  ;;  %v551_v39 = vmul.f32 %v549_v30, %v3051_v35  ;;  %v592_v45 = vmul.f32 %v591_v41, %v3039_v29  ;;  %v3091_v48 = vld [vmem:[#allocation2 + $0xa] sm:$0xff]  ;;  %v3113_v54 = vld [vmem:[#allocation2 + $0x2] sm:$0xff]  ;;  %419 = vst.msk [vmem:[#allocation2 + $0x48] sm:$0xff] %vm408_vm2, %v2820_v3 }
  0xb3   : > { %514 = vrot.lane.b32.xlu0 %v509_v26, %s2822_s15  ;;  %500 = vrot.lane.b32.xlu1 %v495_v27, %s2821_s6  ;;  %v578_v46 = vmul.f32 %v577_v42, %v3039_v29  ;;  %v564_v47 = vmul.f32 %v563_v36, %v3039_v29  ;;  %v621_v51 = vmul.f32 %v619_v49, %v3091_v48  ;;  %v760_v20 = vstv %s3172_s13  ;;  %s3387_s13 = sld [smem:[#allocation6]] }
  0xb4   : > { %486 = vrot.lane.b32.xlu2 %v481_v28, %s2821_s6  ;;  %v593_v52 = vmul.f32 %v591_v41, %v3051_v35  ;;  %v579_v53 = vmul.f32 %v577_v42, %v3051_v35  ;;  %v648_v58 = vmul.f32 %v647_v55, %v3113_v54  ;;  %v634_v59 = vmul.f32 %v633_v56, %v3113_v54 }
  0xb5   : > { %v620_v60 = vmul.f32 %v619_v49, %v3113_v54  ;;  %v663_v63 = vmul.f32 %v661_v61, %v3091_v48  ;;  %v649_v0 = vmul.f32 %v647_v55, %v3091_v48  ;;  %v635_v2 = vmul.f32 %v633_v56, %v3091_v48  ;;  %445 = vst.msk [vmem:[#allocation2 + $0x48] sm:$0xff] %vm434_vm3, %v2820_v3  ;;  %v345_v12 = vpop.permute.xlu0 %344  ;;  %v3177_v13 = vld [vmem:[#allocation2 + $0x20] sm:$0xff]  ;;  %v347_v15 = vpop.permute.xlu1 %346  ;;  %v3278_v49 = vld [vmem:[#allocation2 + $0x30] sm:$0xff] }
  0xb6   : > { %382 = vst.msk [vmem:[#allocation2 + $0x51] sm:$0xff] %vm374_vm1, %v341_v7  ;;  %v662_v11 = vmul.f32 %v661_v61, %v3113_v54  ;;  %v720_v16 = vmul.f32 %v718_v14, %v3177_v13  ;;  %v706_v17 = vmul.f32 %v704_v5, %v3177_v13  ;;  %v692_v18 = vmul.f32 %v690_v6, %v3177_v13  ;;  %v3202_v19 = vld [vmem:[#allocation2 + $0x19] sm:$0xff]  ;;  %v3230_v30 = vld [vmem:[#allocation2 + $0x21] sm:$0xff]  ;;  %v3315_v6 = vld [vmem:[#allocation2 + $0x31] sm:$0xff] }
  0xb7   : > { %389 = vst.msk [vmem:[#allocation2 + $0xa9] sm:$0xff] %vm374_vm1, %v355_v8  ;;  %v761_v24 = vmul.f32 %v760_v20, %v3202_v19  ;;  %v733_v26 = vmul.f32 %v732_v22, %v3151_v4  ;;  %v719_v28 = vmul.f32 %v718_v14, %v3151_v4  ;;  %v774_v31 = vstv %s3206_s23  ;;  %v3256_v37 = vld [vmem:[#allocation2 + $0x1a] sm:$0xff]  ;;  %s3406_s23 = sld [smem:[#allocation7]] }
  0xb8   : > { %431 = vst.msk [vmem:[#allocation2 + $0xa8] sm:$0xff] %vm408_vm2, %v2820_v3  ;;  %v734_v36 = vmul.f32 %v732_v22, %v3177_v13  ;;  %v775_v42 = vmul.f32 %v774_v31, %v3202_v19  ;;  %v859_v56 = vmul.f32 %v858_v43, %v3256_v37  ;;  %v3300_v61 = vld [vmem:[#allocation2 + $0x38] sm:$0xff]  ;;  %v1041_v5 = vstv %s3290_s26  ;;  %s3470_s26 = sld [smem:[#allocation6 + $0x29]] }
  0xb9   : > { %457 = vst.msk [vmem:[#allocation2 + $0xa8] sm:$0xff] %vm434_vm3, %v2820_v3  ;;  %v999_v7 = vstv %s3302_s27  ;;  %s3481_s27 = sld [smem:[#allocation6 + $0x9]] }
  0xba   : > { %420 = vst.msk [vmem:[#allocation2 + $0x50] sm:$0xff] %vm408_vm2, %v2820_v3 }
  0xbb   : > { %554 = vrot.lane.b32.xlu0 %v550_v32, %s2821_s6  ;;  %526 = vrot.lane.b32.xlu1 %v522_v33, %s2822_s15  ;;  %421 = vst.msk [vmem:[#allocation2 + $0x58] sm:$0x3] %vm411_vm4, %v2820_v3  ;;  %v776_v33 = vmul.f32 %v774_v31, %v3230_v30 }
  0xbc   : > { %512 = vrot.lane.b32.xlu2 %v508_v34, %s2822_s15  ;;  %446 = vst.msk [vmem:[#allocation2 + $0x50] sm:$0xff] %vm434_vm3, %v2820_v3  ;;  %v762_v34 = vmul.f32 %v760_v20, %v3230_v30 }
  0xbd   : > { %447 = vst.msk [vmem:[#allocation2 + $0x58] sm:$0x3] %vm437_vm5, %v2820_v3  ;;  %v351_v23 = vpop.permute.xlu0 %350  ;;  %v353_v27 = vpop.permute.xlu1 %352 }
  0xbe   : > { %384 = vst.msk [vmem:[#allocation2 + $0x69] sm:$0xff] %vm374_vm1, %v345_v12  ;;  %v1000_v12 = vmul.f32 %v999_v7, %v3315_v6 }
  0xbf   : > { %423 = vst.msk [vmem:[#allocation2 + $0x68] sm:$0xff] %vm408_vm2, %v2820_v3 }
  0xc0   : > { %424 = vst.msk [vmem:[#allocation2 + $0x70] sm:$0x3] %vm411_vm4, %v2820_v3 }
  0xc1   : > { %449 = vst.msk [vmem:[#allocation2 + $0x68] sm:$0xff] %vm434_vm3, %v2820_v3 }
  0xc2   : > { %450 = vst.msk [vmem:[#allocation2 + $0x70] sm:$0x3] %vm437_vm5, %v2820_v3 }
  0xc3   : > { %570 = vrot.lane.b32.xlu0 %v565_v38, %s2821_s6  ;;  %556 = vrot.lane.b32.xlu1 %v551_v39, %s2821_s6  ;;  %385 = vst.msk [vmem:[#allocation2 + $0x79] sm:$0xff] %vm374_vm1, %v347_v15  ;;  %v830_v38 = vstv %s3225_s24  ;;  %v788_v39 = vstv %s3233_s28  ;;  %v3334_v15 = vld [vmem:[#allocation2 + $0x3a] sm:$0xff]  ;;  %s3414_s24 = sld [smem:[#allocation6 + $0x26]] }
  0xc4   : > { %528 = vrot.lane.b32.xlu2 %v523_v40, %s2822_s15  ;;  %425 = vst.msk [vmem:[#allocation2 + $0x78] sm:$0xff] %vm408_vm2, %v2820_v3  ;;  %v831_v40 = vmul.f32 %v830_v38, %v3256_v37  ;;  %v789_v41 = vmul.f32 %v788_v39, %v3202_v19  ;;  %s3420_s28 = sld [smem:[#allocation6 + $0x25]] }
  0xc5   : > { %426 = vst.msk [vmem:[#allocation2 + $0x80] sm:$0xff] %vm408_vm2, %v2820_v3  ;;  %v357_v32 = vpop.permute.xlu0 %356 }
  0xc6   : > { %451 = vst.msk [vmem:[#allocation2 + $0x78] sm:$0xff] %vm434_vm3, %v2820_v3 }
  0xc7   : > { %452 = vst.msk [vmem:[#allocation2 + $0x80] sm:$0xff] %vm434_vm3, %v2820_v3 }
  0xc8   : > { %387 = vst.msk [vmem:[#allocation2 + $0x91] sm:$0xff] %vm374_vm1, %v351_v23  ;;  %v1043_v23 = vmul.f32 %v1041_v5, %v3334_v15 }
  0xc9   : > { %428 = vst.msk [vmem:[#allocation2 + $0x90] sm:$0xff] %vm408_vm2, %v2820_v3 }
  0xca   : > { %454 = vst.msk [vmem:[#allocation2 + $0x90] sm:$0xff] %vm434_vm3, %v2820_v3 }
  0xcb   : > { %596 = vrot.lane.b32.xlu0 %v592_v45, %s2822_s15  ;;  %582 = vrot.lane.b32.xlu1 %v578_v46, %s2822_s15  ;;  %388 = vst.msk [vmem:[#allocation2 + $0x99] sm:$0xff] %vm374_vm1, %v353_v27  ;;  %v1140_v27 = vstv %s3331_s5  ;;  %s3508_s5 = sld [smem:[#allocation6 + $0xc]] }
  0xcc   : > { %568 = vrot.lane.b32.xlu2 %v564_v47, %s2821_s6  ;;  %429 = vst.msk [vmem:[#allocation2 + $0x98] sm:$0xff] %vm408_vm2, %v2820_v3  ;;  %v790_v47 = vmul.f32 %v788_v39, %v3230_v30  ;;  %v3371_v39 = vld [vmem:[#allocation2 + $0x50] sm:$0xff] }
  0xcd   : > { %430 = vst.msk [vmem:[#allocation2 + $0xa0] sm:$0x3] %vm411_vm4, %v2820_v3 }
  0xce   : > { %455 = vst.msk [vmem:[#allocation2 + $0x98] sm:$0xff] %vm434_vm3, %v2820_v3 }
  0xcf   : > { %456 = vst.msk [vmem:[#allocation2 + $0xa0] sm:$0x3] %vm437_vm5, %v2820_v3 }
  0xd0   : > { %390 = vst.msk [vmem:[#allocation2 + $0xb1] sm:$0xff] %vm374_vm1, %v357_v32 }
  0xd1   : > { %432 = vst.msk [vmem:[#allocation2 + $0xb0] sm:$0xff] %vm408_vm2, %v2820_v3 }
  0xd2   : > { %433 = vst.msk [vmem:[#allocation2 + $0xb8] sm:$0x3] %vm411_vm4, %v2820_v3 }
  0xd3   : > { %626 = vrot.lane.b32.xlu0 %v621_v51, %s2821_s6  ;;  %598 = vrot.lane.b32.xlu1 %v593_v52, %s2822_s15  ;;  %458 = vst.msk [vmem:[#allocation2 + $0xb0] sm:$0xff] %vm434_vm3, %v2820_v3  ;;  %v901_v51 = vstv %s2445_s21  ;;  %s3453_s21 = sld [smem:[#allocation6 + $0x6]] }
  0xd4   : > { %584 = vrot.lane.b32.xlu2 %v579_v53, %s2822_s15  ;;  %459 = vst.msk [vmem:[#allocation2 + $0xb8] sm:$0x3] %vm437_vm5, %v2820_v3  ;;  %v3268_v3 = vld [vmem:[#allocation2 + $0x22] sm:$0xff]  ;;  %v930_v53 = vmul.f32 %v929_v50, %v3278_v49  ;;  %v902_v55 = vmul.f32 %v901_v51, %v3278_v49  ;;  %v903_v1 = vmul.f32 %v901_v51, %v3300_v61 }
  0xd5   : > { %v860_v45 = vmul.f32 %v858_v43, %v3268_v3  ;;  %v832_v46 = vmul.f32 %v830_v38, %v3268_v3  ;;  %v3392_v51 = vld [vmem:[#allocation2 + $0x49] sm:$0xff] }
  0xdb   : > { %652 = vrot.lane.b32.xlu0 %v648_v58, %s2822_s15  ;;  %638 = vrot.lane.b32.xlu1 %v634_v59, %s2821_s6  ;;  %v3297_v59 = vld [vmem:[#allocation2 + $0x39] sm:$0xff] }
  0xdc   : > { %624 = vrot.lane.b32.xlu2 %v620_v60, %s2821_s6  ;;  %v971_v60 = vstv %s3281_s25  ;;  %s3460_s25 = sld [smem:[#allocation6 + $0x2b]] }
  0xdd   : > { %v972_v14 = vmul.f32 %v971_v60, %v3315_v6 }
  0xe3   : > { %668 = vrot.lane.b32.xlu0 %v663_v63, %s2822_s15  ;;  %654 = vrot.lane.b32.xlu1 %v649_v0, %s2822_s15  ;;  %v973_v63 = vmul.f32 %v971_v60, %v3297_v59  ;;  %v931_v0 = vmul.f32 %v929_v50, %v3300_v61 }
  0xe4   : > { %640 = vrot.lane.b32.xlu2 %v635_v2, %s2821_s6  ;;  %v3312_v2 = vld [vmem:[#allocation2 + $0x32] sm:$0xff] }
  0xeb   : > { %709 = vrot.lane.b32.xlu0 %v705_v9, %s2821_s6  ;;  %695 = vrot.lane.b32.xlu1 %v691_v10, %s2821_s6 }
  0xec   : > { %666 = vrot.lane.b32.xlu2 %v662_v11, %s2822_s15  ;;  %v1042_v11 = vmul.f32 %v1041_v5, %v3312_v2 }
  0xf3   : > { %725 = vrot.lane.b32.xlu0 %v720_v16, %s2822_s15  ;;  %711 = vrot.lane.b32.xlu1 %v706_v17, %s2821_s6  ;;  %v1069_v16 = vstv %s3318_s30  ;;  %s3495_s30 = sld [smem:[#allocation6 + $0x2c]] }
  0xf4   : > { %697 = vrot.lane.b32.xlu2 %v692_v18, %s2821_s6  ;;  %v1071_v22 = vmul.f32 %v1069_v16, %v3334_v15  ;;  %v1070_v38 = vmul.f32 %v1069_v16, %v3312_v2 }
  0xfb   : > { %765 = vrot.lane.b32.xlu0 %v761_v24, %s2821_s6  ;;  %737 = vrot.lane.b32.xlu1 %v733_v26, %s2822_s15  ;;  %v1001_v24 = vmul.f32 %v999_v7, %v3297_v59  ;;  %v3351_v26 = vld [vmem:[#allocation2 + $0x48] sm:$0xff] }
  0xfc   : > { %723 = vrot.lane.b32.xlu2 %v719_v28, %s2822_s15  ;;  %v1112_v28 = vstv %s3337_s7  ;;  %s3512_s7 = sld [smem:[#allocation6 + $0x2f]] }
  0xfd   : > { %v1114_v50 = vmul.f32 %v1112_v28, %v3371_v39 }
 0x103   : > { %781 = vrot.lane.b32.xlu0 %v776_v33, %s2821_s6  ;;  %767 = vrot.lane.b32.xlu1 %v762_v34, %s2821_s6  ;;  %v1141_v34 = vmul.f32 %v1140_v27, %v3351_v26 }
 0x104   : > { %739 = vrot.lane.b32.xlu2 %v734_v36, %s2822_s15  ;;  %v1113_v36 = vmul.f32 %v1112_v28, %v3351_v26 }
 0x10b   : > { %835 = vrot.lane.b32.xlu0 %v831_v40, %s2821_s6  ;;  %793 = vrot.lane.b32.xlu1 %v789_v41, %s2822_s15  ;;  %v3373_v40 = vld [vmem:[#allocation2 + $0x51] sm:$0xff]  ;;  %v1182_v41 = vstv %s3355_s8  ;;  %s3521_s8 = sld [smem:[#allocation6 + $0x2e]] }
 0x10c   : > { %779 = vrot.lane.b32.xlu2 %v775_v42, %s2821_s6  ;;  %v1183_v7 = vmul.f32 %v1182_v41, %v3392_v51 }
 0x10e   : > { %v3270_v44 = vpop.permute.xlu2 %486 }
 0x113   : > { %865 = vrot.lane.b32.xlu0 %v860_v45, %s2822_s15  ;;  %837 = vrot.lane.b32.xlu1 %v832_v46, %s2821_s6  ;;  %v1184_v46 = vmul.f32 %v1182_v41, %v3373_v40 }
 0x114   : > { %795 = vrot.lane.b32.xlu2 %v790_v47, %s2822_s15  ;;  %v1142_v47 = vmul.f32 %v1140_v27, %v3371_v39  ;;  %v461_v27 = vstv %s3406_s23  ;;  %s3565_s23 = sld [smem:[#allocation6 + $0x12]] }
 0x116   : > { %v3283_v52 = vpop.permute.xlu2 %512 }
 0x11b   : > { %934 = vrot.lane.b32.xlu0 %v930_v53, %s2822_s15  ;;  %906 = vrot.lane.b32.xlu1 %v902_v55, %s2821_s6  ;;  %v3394_v53 = vld [vmem:[#allocation2 + $0x4a] sm:$0xff]  ;;  %v1252_v55 = vstv %s3368_s11  ;;  %s3533_s11 = sld [smem:[#allocation6 + $0xf]] }
 0x11c   : > { %863 = vrot.lane.b32.xlu2 %v859_v56, %s2822_s15  ;;  %v3293_v57 = vpop.permute.xlu1 %484  ;;  %v3295_v58 = vpop.permute.xlu0 %498  ;;  %v1210_v56 = vstv %s3376_s12  ;;  %s3540_s12 = sld [smem:[#allocation6 + $0x31]] }
 0x11d   : > { %v1211_v5 = vmul.f32 %v1210_v56, %v3392_v51 }
 0x11e   : > { %v3304_v62 = vpop.permute.xlu2 %528 }
 0x123   : > { %978 = vrot.lane.b32.xlu0 %v973_v63, %s2821_s6  ;;  %936 = vrot.lane.b32.xlu1 %v931_v0, %s2822_s15 }
 0x124   : > { %908 = vrot.lane.b32.xlu2 %v903_v1, %s2821_s6  ;;  %v1253_v1 = vmul.f32 %v1252_v55, %v3394_v53 }
 0x125   : > { %v3320_v8 = vpop.permute.xlu1 %500  ;;  %v3322_v9 = vpop.permute.xlu0 %514 }
 0x126   : > { %v3324_v10 = vpop.permute.xlu2 %568 }
 0x12b   : > { %1046 = vrot.lane.b32.xlu0 %v1042_v11, %s2821_s6  ;;  %1004 = vrot.lane.b32.xlu1 %v1000_v12, %s2822_s15  ;;  %v467_v11 = vstv %s3387_s13  ;;  %v3417_v12 = vld [vmem:[#allocation2 + $0x52] sm:$0xff]  ;;  %s3554_s13 = sld [smem:[#allocation6 + $0x34]] }
 0x12c   : > { %976 = vrot.lane.b32.xlu2 %v972_v14, %s2821_s6  ;;  %v1280_v14 = vstv %s3398_s22  ;;  %s3563_s22 = sld [smem:[#allocation6 + $0x32]] }
 0x12d   : > { %v3339_v17 = vpop.permute.xlu1 %526  ;;  %v3341_v18 = vpop.permute.xlu0 %554  ;;  %v1282_v28 = vmul.f32 %v1280_v14, %v3417_v12 }
 0x12e   : > { %v3343_v20 = vpop.permute.xlu2 %584 }
 0x133   : > { %1076 = vrot.lane.b32.xlu0 %v1071_v22, %s2822_s15  ;;  %1048 = vrot.lane.b32.xlu1 %v1043_v23, %s2821_s6  ;;  %v468_v23 = vmul.f32 %v467_v11, %v3019_v21  ;;  %v3437_v21 = vld [vmem:[#allocation2 + $0x60] sm:$0xff] }
 0x134   : > { %1006 = vrot.lane.b32.xlu2 %v1001_v24, %s2822_s15 }
 0x135   : > { %v3357_v31 = vpop.permute.xlu1 %556  ;;  %v3359_v32 = vpop.permute.xlu0 %570  ;;  %v470_v41 = vadd.f32 %v468_v23, %v461_v27  ;;  %v1281_v23 = vmul.f32 %v1280_v14, %v3394_v53  ;;  %v3465_v14 = vld [vmem:[#allocation2 + $0x69] sm:$0xff] }
 0x136   : > { %v3361_v33 = vpop.permute.xlu2 %624 }
 0x13b   : > { %1145 = vrot.lane.b32.xlu0 %v1141_v34, %s2822_s15  ;;  %1117 = vrot.lane.b32.xlu1 %v1113_v36, %s2821_s6  ;;  %v1254_v34 = vmul.f32 %v1252_v55, %v3417_v12  ;;  %v1212_v36 = vmul.f32 %v1210_v56, %v3373_v40 }
 0x13c   : > { %1074 = vrot.lane.b32.xlu2 %v1070_v38, %s2822_s15  ;;  %v469_v38 = vmul.f32 %v467_v11, %v3031_v25  ;;  %v490_v25 = vadd.f32 %v3293_v57, %v470_v41 }
 0x13d   : > { %v3378_v42 = vpop.permute.xlu1 %582  ;;  %v3380_v43 = vpop.permute.xlu0 %596 }
 0x13e   : > { %v3382_v45 = vpop.permute.xlu2 %640  ;;  %v471_v56 = vadd.f32 %v469_v38, %v461_v27  ;;  %v3468_v38 = vld [vmem:[#allocation2 + $0x68] sm:$0xff] }
 0x143   : > { %1189 = vrot.lane.b32.xlu0 %v1184_v46, %s2821_s6  ;;  %1147 = vrot.lane.b32.xlu1 %v1142_v47, %s2822_s15  ;;  %v1351_v46 = vstv %s3414_s24  ;;  %v1323_v47 = vstv %s3420_s28  ;;  %s3580_s24 = sld [smem:[#allocation6 + $0x35]] }
 0x144   : > { %1119 = vrot.lane.b32.xlu2 %v1114_v50, %s2821_s6  ;;  %v1324_v11 = vmul.f32 %v1323_v47, %v3437_v21  ;;  %s2449_s28 = sld [smem:[#allocation6 + $0x15]] }
 0x145   : > { %v3400_v60 = vpop.permute.xlu1 %598  ;;  %v3402_v63 = vpop.permute.xlu0 %626 }
 0x146   : > { %v3404_v0 = vpop.permute.xlu2 %666 }
 0x14b   : > { %1257 = vrot.lane.b32.xlu0 %v1253_v1, %s2821_s6  ;;  %1215 = vrot.lane.b32.xlu1 %v1211_v5, %s2822_s15  ;;  %v537_v5 = vstv %s2413_s9  ;;  %s3589_s9 = sld [smem:[#allocation6 + $0x38]] }
 0x14c   : > { %1187 = vrot.lane.b32.xlu2 %v1183_v7, %s2821_s6  ;;  %v1352_v7 = vmul.f32 %v1351_v46, %v3437_v21  ;;  %v538_v27 = vmul.f32 %v537_v5, %v3039_v29 }
 0x14d   : > { %v3422_v16 = vpop.permute.xlu1 %638  ;;  %v3424_v22 = vpop.permute.xlu0 %652 }
 0x14e   : > { %v3427_v24 = vpop.permute.xlu2 %697 }
 0x153   : > { %1287 = vrot.lane.b32.xlu0 %v1282_v28, %s2822_s15  ;;  %1259 = vrot.lane.b32.xlu1 %v1254_v34, %s2821_s6  ;;  %v491_v28 = vadd.f32 %v3270_v44, %v471_v56  ;;  %v518_v34 = vadd.f32 %v3283_v52, %v490_v25  ;;  %v1393_v44 = vstv %s3441_s14  ;;  %s3596_s14 = sld [smem:[#allocation6 + $0x37]] }
 0x154   : > { %1217 = vrot.lane.b32.xlu2 %v1212_v36, %s2822_s15  ;;  %v539_v36 = vmul.f32 %v537_v5, %v3051_v35  ;;  %v1353_v35 = vmul.f32 %v1351_v46, %v3468_v38  ;;  %v1463_v46 = vstv %s3460_s25  ;;  %s3612_s25 = sld [smem:[#allocation6 + $0x3a]] }
 0x155   : > { %v3443_v50 = vpop.permute.xlu1 %654  ;;  %v3445_v55 = vpop.permute.xlu0 %668  ;;  %v519_v57 = vadd.f32 %v3322_v9, %v491_v28  ;;  %v540_v41 = vadd.f32 %v538_v27, %v518_v34  ;;  %v1395_v9 = vmul.f32 %v1393_v44, %v3465_v14  ;;  %v1421_v27 = vstv %s3470_s26  ;;  %s3620_s26 = sld [smem:[#allocation6 + $0x3d]] }
 0x156   : > { %v3448_v1 = vpop.permute.xlu2 %723 }
 0x157   : > { %v560_v25 = vadd.f32 %v3341_v18, %v540_v41  ;;  %v541_v5 = vadd.f32 %v539_v36, %v519_v57  ;;  %v3489_v18 = vld [vmem:[#allocation2 + $0x62] sm:$0xff] }
 0x159   : > { %v588_v34 = vadd.f32 %v3378_v42, %v560_v25 }
 0x15b   : > { %1356 = vrot.lane.b32.xlu0 %v1352_v7, %s2822_s15  ;;  %1328 = vrot.lane.b32.xlu1 %v1324_v11, %s2821_s6  ;;  %v1325_v7 = vmul.f32 %v1323_v47, %v3468_v38  ;;  %v607_v11 = vstv %s3453_s21  ;;  %v3492_v47 = vld [vmem:[#allocation2 + $0x61] sm:$0xff]  ;;  %s3604_s21 = sld [smem:[#allocation6 + $0x18]] }
 0x15c   : > { %1285 = vrot.lane.b32.xlu2 %v1281_v23, %s2822_s15  ;;  %v561_v23 = vadd.f32 %v3357_v31, %v541_v5  ;;  %v608_v28 = vmul.f32 %v607_v11, %v3113_v54  ;;  %v609_v36 = vmul.f32 %v607_v11, %v3091_v48  ;;  %v1394_v25 = vmul.f32 %v1393_v44, %v3492_v47  ;;  %v3518_v44 = vld [vmem:[#allocation2 + $0x6a] sm:$0xff] }
 0x15d   : > { %v696_v29 = vpop.permute.xlu1 %695  ;;  %v3472_v52 = vpop.permute.xlu0 %709  ;;  %v678_v5 = vstv %s3481_s27  ;;  %s3629_s27 = sld [smem:[#allocation6 + $0x3b]] }
 0x15e   : > { %v3474_v56 = vpop.permute.xlu2 %739  ;;  %v589_v42 = vadd.f32 %v3343_v20, %v561_v23  ;;  %v610_v57 = vadd.f32 %v608_v28, %v588_v34  ;;  %v679_v11 = vmul.f32 %v678_v5, %v3151_v4  ;;  %v680_v34 = vmul.f32 %v678_v5, %v3177_v13  ;;  %v3536_v13 = vld [vmem:[#allocation2 + $0x78] sm:$0xff] }
 0x15f   : > { %4314 = vst [vmem:[#allocation12_spill] sm:$0xff] %v3474_v56 }
 0x160   : > { %v630_v56 = vadd.f32 %v3361_v33, %v610_v57  ;;  %v1491_v33 = vstv %s3495_s30  ;;  %v1423_v57 = vmul.f32 %v1421_v27, %v3465_v14  ;;  %s3631_s30 = sld [smem:[#allocation6 + $0x1b]] }
 0x161   : > { %v1493_v4 = vmul.f32 %v1491_v33, %v3518_v44 }
 0x162   : > { %v658_v20 = vadd.f32 %v3424_v22, %v630_v56  ;;  %v1465_v56 = vmul.f32 %v1463_v46, %v3518_v44 }
 0x163   : > { %1400 = vrot.lane.b32.xlu0 %v1395_v9, %s2821_s6  ;;  %1358 = vrot.lane.b32.xlu1 %v1353_v35, %s2822_s15  ;;  %v1464_v9 = vmul.f32 %v1463_v46, %v3489_v18  ;;  %v1422_v35 = vmul.f32 %v1421_v27, %v3492_v47 }
 0x164   : > { %1330 = vrot.lane.b32.xlu2 %v1325_v7, %s2821_s6  ;;  %v611_v7 = vadd.f32 %v609_v36, %v589_v42  ;;  %v681_v42 = vadd.f32 %v679_v11, %v658_v20 }
 0x165   : > { %v3497_v31 = vpop.permute.xlu1 %711  ;;  %v726_v54 = vpop.permute.xlu0 %725 }
 0x166   : > { %4315 = vst [vmem:[#allocation13_spill] sm:$0xff] %v3497_v31  ;;  %v3501_v41 = vpop.permute.xlu2 %779  ;;  %v631_v48 = vadd.f32 %v3402_v63, %v611_v7  ;;  %v3626_v31 = vld [vmem:[#allocation2 + $0x99] sm:$0xff] }
 0x167   : > { %4316 = vst [vmem:[#allocation14_spill] sm:$0xff] %v3501_v41  ;;  %v3624_v41 = vld [vmem:[#allocation2 + $0x98] sm:$0xff] }
 0x168   : > { %v659_v63 = vadd.f32 %v3443_v50, %v631_v48  ;;  %v1562_v50 = vstv %s3512_s7  ;;  %s3648_s7 = sld [smem:[#allocation6 + $0x3e]] }
 0x169   : > { %v1563_v20 = vmul.f32 %v1562_v50, %v3536_v13 }
 0x16a   : > { %v682_v36 = vadd.f32 %v680_v34, %v659_v63 }
 0x16b   : > { %1468 = vrot.lane.b32.xlu0 %v1464_v9, %s2821_s6  ;;  %1426 = vrot.lane.b32.xlu1 %v1422_v35, %s2822_s15  ;;  %v701_v9 = vadd.f32 %v696_v29, %v681_v42  ;;  %v748_v35 = vstv %s3508_s5  ;;  %s3639_s5 = sld [smem:[#allocation6 + $0x1e]] }
 0x16c   : > { %1398 = vrot.lane.b32.xlu2 %v1394_v25, %s2821_s6  ;;  %v1534_v25 = vstv %s3521_s8  ;;  %v702_v5 = vadd.f32 %v3427_v24, %v682_v36  ;;  %v749_v7 = vmul.f32 %v748_v35, %v3202_v19  ;;  %v750_v63 = vmul.f32 %v748_v35, %v3230_v30  ;;  %v3558_v36 = vld [vmem:[#allocation2 + $0x81] sm:$0xff]  ;;  %s3659_s8 = sld [smem:[#allocation6 + $0x41]] }
 0x16d   : > { %v3523_v23 = vpop.permute.xlu1 %737  ;;  %v766_v28 = vpop.permute.xlu0 %765  ;;  %v729_v29 = vadd.f32 %v3448_v1, %v701_v9  ;;  %v1535_v11 = vmul.f32 %v1534_v25, %v3536_v13  ;;  %v818_v1 = vstv %s3533_s11  ;;  %v3561_v9 = vld [vmem:[#allocation2 + $0x80] sm:$0xff]  ;;  %s3665_s11 = sld [smem:[#allocation6 + $0x40]] }
 0x16e   : > { %4317 = vst [vmem:[#allocation15_spill] sm:$0xff] %v3523_v23  ;;  %v796_v22 = vpop.permute.xlu2 %795  ;;  %v730_v34 = vadd.f32 %v726_v54, %v702_v5  ;;  %v1604_v54 = vstv %s3540_s12  ;;  %v1913_v23 = vstv %s3648_s7  ;;  %s3673_s12 = sld [smem:[#allocation6 + $0x21]] }
 0x16f   : > { %s3771_s7 = sld [smem:[#allocation6 + $0x5e]] }
 0x170   : > { %v752_v42 = vadd.f32 %v750_v63, %v730_v34  ;;  %v1536_v34 = vmul.f32 %v1534_v25, %v3561_v9  ;;  %v889_v25 = vstv %s3565_s23  ;;  %s3698_s23 = sld [smem:[#allocation6 + $0x44]] }
 0x173   : > { %1498 = vrot.lane.b32.xlu0 %v1493_v4, %s2822_s15  ;;  %1470 = vrot.lane.b32.xlu1 %v1465_v56, %s2821_s6  ;;  %v1492_v4 = vmul.f32 %v1491_v33, %v3489_v18  ;;  %v751_v56 = vadd.f32 %v749_v7, %v729_v29  ;;  %v1606_v7 = vmul.f32 %v1604_v54, %v3558_v36 }
 0x174   : > { %1428 = vrot.lane.b32.xlu2 %v1423_v57, %s2822_s15  ;;  %v819_v57 = vmul.f32 %v818_v1, %v3256_v37 }
 0x175   : > { %v768_v46 = vpop.permute.xlu1 %767  ;;  %v3542_v27 = vpop.permute.xlu0 %781  ;;  %v771_v24 = vadd.f32 %v766_v28, %v751_v56 }
 0x176   : > { %4318 = vst [vmem:[#allocation16_spill] sm:$0xff] %v3542_v27  ;;  %v864_v48 = vpop.permute.xlu2 %863  ;;  %v772_v29 = vadd.f32 %v768_v46, %v752_v42  ;;  %v3574_v46 = vld [vmem:[#allocation2 + $0x7a] sm:$0xff]  ;;  %v3593_v27 = vld [vmem:[#allocation2 + $0x82] sm:$0xff] }
 0x177   : > { %v3577_v42 = vld [vmem:[#allocation2 + $0x79] sm:$0xff] }
 0x178   : > { %v800_v63 = vadd.f32 %v796_v22, %v772_v29 }
 0x17b   : > { %1567 = vrot.lane.b32.xlu0 %v1563_v20, %s2822_s15  ;;  %1539 = vrot.lane.b32.xlu1 %v1535_v11, %s2821_s6  ;;  %v1564_v20 = vmul.f32 %v1562_v50, %v3561_v9 }
 0x17c   : > { %1496 = vrot.lane.b32.xlu2 %v1492_v4, %s2822_s15  ;;  %v820_v4 = vmul.f32 %v818_v1, %v3268_v3 }
 0x17d   : > { %v794_v33 = vpop.permute.xlu1 %793  ;;  %v836_v35 = vpop.permute.xlu0 %835 }
 0x17e   : > { %v799_v28 = vadd.f32 %v794_v33, %v771_v24  ;;  %v909_v5 = vpop.permute.xlu2 %908  ;;  %v1674_v24 = vstv %s3554_s13  ;;  %v1632_v33 = vstv %s3563_s22  ;;  %s3681_s13 = sld [smem:[#allocation6 + $0x43]] }
 0x17f   : > { %v1675_v29 = vmul.f32 %v1674_v24, %v3574_v46  ;;  %s3689_s22 = sld [smem:[#allocation6 + $0x56]] }
 0x180   : > { %v821_v11 = vadd.f32 %v819_v57, %v799_v28  ;;  %v822_v57 = vadd.f32 %v820_v4, %v800_v63 }
 0x182   : > { %v841_v56 = vadd.f32 %v836_v35, %v821_v11  ;;  %v1633_v35 = vmul.f32 %v1632_v33, %v3577_v42  ;;  %v890_v11 = vmul.f32 %v889_v25, %v3278_v49 }
 0x183   : > { %1611 = vrot.lane.b32.xlu0 %v1606_v7, %s2821_s6  ;;  %1569 = vrot.lane.b32.xlu1 %v1564_v20, %s2822_s15  ;;  %v1605_v20 = vmul.f32 %v1604_v54, %v3577_v42 }
 0x184   : > { %1541 = vrot.lane.b32.xlu2 %v1536_v34, %s2821_s6  ;;  %v869_v28 = vadd.f32 %v864_v48, %v841_v56  ;;  %v891_v34 = vmul.f32 %v889_v25, %v3300_v61  ;;  %v1702_v48 = vstv %s3580_s24  ;;  %s3700_s24 = sld [smem:[#allocation6 + $0x24]] }
 0x185   : > { %v838_v50 = vpop.permute.xlu1 %837  ;;  %v866_v22 = vpop.permute.xlu0 %865 }
 0x186   : > { %v977_v1 = vpop.permute.xlu2 %976  ;;  %v842_v7 = vadd.f32 %v838_v50, %v822_v57  ;;  %v892_v4 = vadd.f32 %v890_v11, %v869_v28  ;;  %v1634_v28 = vmul.f32 %v1632_v33, %v3558_v36 }
 0x188   : > { %v870_v63 = vadd.f32 %v866_v22, %v842_v7  ;;  %v959_v22 = vstv %s2449_s28  ;;  %s3708_s28 = sld [smem:[#allocation6 + $0x27]] }
 0x18a   : > { %v893_v25 = vadd.f32 %v891_v34, %v870_v63  ;;  %v1745_v34 = vstv %s3596_s14  ;;  %s3725_s14 = sld [smem:[#allocation6 + $0x58]] }
 0x18b   : > { %1679 = vrot.lane.b32.xlu0 %v1675_v29, %s2821_s6  ;;  %1637 = vrot.lane.b32.xlu1 %v1633_v35, %s2822_s15  ;;  %v1704_v29 = vmul.f32 %v1702_v48, %v3593_v27  ;;  %v1676_v35 = vmul.f32 %v1674_v24, %v3593_v27  ;;  %v1773_v24 = vstv %s3589_s9  ;;  %s3715_s9 = sld [smem:[#allocation6 + $0x46]] }
 0x18c   : > { %1609 = vrot.lane.b32.xlu2 %v1605_v20, %s2821_s6  ;;  %v960_v20 = vmul.f32 %v959_v22, %v3315_v6  ;;  %v913_v11 = vadd.f32 %v909_v5, %v893_v25  ;;  %v1703_v25 = vmul.f32 %v1702_v48, %v3574_v46 }
 0x18d   : > { %v907_v54 = vpop.permute.xlu1 %906  ;;  %v935_v56 = vpop.permute.xlu0 %934 }
 0x18e   : > { %v912_v50 = vadd.f32 %v907_v54, %v892_v4  ;;  %v1007_v57 = vpop.permute.xlu2 %1006  ;;  %v961_v4 = vmul.f32 %v959_v22, %v3297_v59  ;;  %v3608_v54 = vld [vmem:[#allocation2 + $0x90] sm:$0xff] }
 0x190   : > { %v940_v7 = vadd.f32 %v935_v56, %v912_v50  ;;  %v1774_v50 = vmul.f32 %v1773_v24, %v3608_v54 }
 0x193   : > { %1709 = vrot.lane.b32.xlu0 %v1704_v29, %s2822_s15  ;;  %1681 = vrot.lane.b32.xlu1 %v1676_v35, %s2821_s6  ;;  %v1746_v29 = vmul.f32 %v1745_v34, %v3608_v54  ;;  %v962_v35 = vadd.f32 %v960_v20, %v940_v7  ;;  %v1815_v7 = vstv %s3612_s25  ;;  %s3745_s25 = sld [smem:[#allocation6 + $0x59]] }
 0x194   : > { %1639 = vrot.lane.b32.xlu2 %v1634_v28, %s2822_s15  ;;  %v1029_v28 = vstv %s3604_s21  ;;  %s3732_s21 = sld [smem:[#allocation6 + $0x47]] }
 0x195   : > { %v937_v33 = vpop.permute.xlu1 %936  ;;  %v979_v6 = vpop.permute.xlu0 %978 }
 0x196   : > { %v941_v63 = vadd.f32 %v937_v33, %v913_v11  ;;  %v1075_v56 = vpop.permute.xlu2 %1074  ;;  %v982_v11 = vadd.f32 %v977_v1, %v962_v35  ;;  %v1030_v33 = vmul.f32 %v1029_v28, %v3312_v2  ;;  %v1775_v1 = vmul.f32 %v1773_v24, %v3624_v41  ;;  %v3644_v24 = vld [vmem:[#allocation2 + $0x92] sm:$0xff] }
 0x197   : > { %v1031_v35 = vmul.f32 %v1029_v28, %v3334_v15 }
 0x198   : > { %v963_v5 = vadd.f32 %v961_v4, %v941_v63  ;;  %v1817_v63 = vmul.f32 %v1815_v7, %v3626_v31 }
 0x19a   : > { %v983_v22 = vadd.f32 %v979_v6, %v963_v5 }
 0x19b   : > { %1778 = vrot.lane.b32.xlu0 %v1774_v50, %s2822_s15  ;;  %1750 = vrot.lane.b32.xlu1 %v1746_v29, %s2821_s6  ;;  %v1747_v29 = vmul.f32 %v1745_v34, %v3624_v41  ;;  %v1100_v34 = vstv %s3631_s30  ;;  %s3757_s30 = sld [smem:[#allocation6 + $0x5c]] }
 0x19c   : > { %1707 = vrot.lane.b32.xlu2 %v1703_v25, %s2822_s15  ;;  %v1011_v2 = vadd.f32 %v1007_v57, %v983_v22  ;;  %v1885_v57 = vstv %s3620_s26  ;;  %v1843_v22 = vstv %s3629_s27  ;;  %s2491_s26 = sld [smem:[#allocation6 + $0x2a]] }
 0x19d   : > { %v1005_v48 = vpop.permute.xlu1 %1004  ;;  %v1047_v20 = vpop.permute.xlu0 %1046  ;;  %s3753_s27 = sld [smem:[#allocation6 + $0x5b]] }
 0x19e   : > { %v1010_v4 = vadd.f32 %v1005_v48, %v982_v11  ;;  %v1120_v6 = vpop.permute.xlu2 %1119  ;;  %v1033_v25 = vadd.f32 %v1031_v35, %v1011_v2  ;;  %v3642_v11 = vld [vmem:[#allocation2 + $0x91] sm:$0xff] }
 0x1a0   : > { %v1032_v50 = vadd.f32 %v1030_v33, %v1010_v4  ;;  %v1886_v4 = vmul.f32 %v1885_v57, %v3644_v24 }
 0x1a2   : > { %v1052_v5 = vadd.f32 %v1047_v20, %v1032_v50  ;;  %v1102_v20 = vmul.f32 %v1100_v34, %v3371_v39  ;;  %v1816_v50 = vmul.f32 %v1815_v7, %v3642_v11 }
 0x1a3   : > { %1822 = vrot.lane.b32.xlu0 %v1817_v63, %s2821_s6  ;;  %1780 = vrot.lane.b32.xlu1 %v1775_v1, %s2822_s15  ;;  %v1844_v63 = vmul.f32 %v1843_v22, %v3642_v11 }
 0x1a4   : > { %1752 = vrot.lane.b32.xlu2 %v1747_v29, %s2821_s6  ;;  %v1080_v1 = vadd.f32 %v1075_v56, %v1052_v5  ;;  %v1101_v29 = vmul.f32 %v1100_v34, %v3351_v26 }
 0x1a5   : > { %v1049_v15 = vpop.permute.xlu1 %1048  ;;  %v1077_v28 = vpop.permute.xlu0 %1076 }
 0x1a6   : > { %v1053_v33 = vadd.f32 %v1049_v15, %v1033_v25  ;;  %v1188_v48 = vpop.permute.xlu2 %1187  ;;  %v1170_v25 = vstv %s3639_s5  ;;  %v1103_v39 = vadd.f32 %v1101_v29, %v1080_v1  ;;  %v3662_v15 = vld [vmem:[#allocation2 + $0x9a] sm:$0xff]  ;;  %s3765_s5 = sld [smem:[#allocation6 + $0x2d]] }
 0x1a8   : > { %v1081_v2 = vadd.f32 %v1077_v28, %v1053_v33  ;;  %v1171_v28 = vmul.f32 %v1170_v25, %v3392_v51  ;;  %v1915_v33 = vmul.f32 %v1913_v23, %v3662_v15  ;;  %v1984_v51 = vstv %s3659_s8  ;;  %s3783_s8 = sld [smem:[#allocation6 + $0x5f]] }
 0x1aa   : > { %v1104_v35 = vadd.f32 %v1102_v20, %v1081_v2  ;;  %v1887_v20 = vmul.f32 %v1885_v57, %v3662_v15  ;;  %v3677_v2 = vld [vmem:[#allocation2 + $0xa8] sm:$0xff] }
 0x1ab   : > { %1890 = vrot.lane.b32.xlu0 %v1886_v4, %s2821_s6  ;;  %1848 = vrot.lane.b32.xlu1 %v1844_v63, %s2822_s15  ;;  %v1845_v63 = vmul.f32 %v1843_v22, %v3626_v31 }
 0x1ac   : > { %1820 = vrot.lane.b32.xlu2 %v1816_v50, %s2821_s6  ;;  %v1124_v56 = vadd.f32 %v1120_v6, %v1104_v35  ;;  %v1172_v6 = vmul.f32 %v1170_v25, %v3373_v40  ;;  %v1956_v50 = vstv %s3665_s11  ;;  %v1914_v40 = vmul.f32 %v1913_v23, %v3644_v24  ;;  %s3788_s11 = sld [smem:[#allocation6 + $0x61]] }
 0x1ad   : > { %v1118_v7 = vpop.permute.xlu1 %1117  ;;  %v1146_v26 = vpop.permute.xlu0 %1145 }
 0x1ae   : > { %v1218_v5 = vpop.permute.xlu2 %1217  ;;  %v1123_v34 = vadd.f32 %v1118_v7, %v1103_v39  ;;  %v1985_v7 = vmul.f32 %v1984_v51, %v3677_v2 }
 0x1b0   : > { %v1151_v4 = vadd.f32 %v1146_v26, %v1123_v34  ;;  %v1957_v26 = vmul.f32 %v1956_v50, %v3677_v2 }
 0x1b2   : > { %v1173_v1 = vadd.f32 %v1171_v28, %v1151_v4  ;;  %v3696_v4 = vld [vmem:[#allocation2 + $0xb0] sm:$0xff] }
 0x1b3   : > { %1920 = vrot.lane.b32.xlu0 %v1915_v33, %s2822_s15  ;;  %1892 = vrot.lane.b32.xlu1 %v1887_v20, %s2821_s6  ;;  %v3693_v33 = vld [vmem:[#allocation2 + $0xb1] sm:$0xff]  ;;  %v2026_v20 = vstv %s3681_s13  ;;  %s3799_s13 = sld [smem:[#allocation6 + $0x62]] }
 0x1b4   : > { %1850 = vrot.lane.b32.xlu2 %v1845_v63, %s2822_s15  ;;  %v1193_v57 = vadd.f32 %v1188_v48, %v1173_v1  ;;  %v1240_v48 = vstv %s3673_s12  ;;  %s2503_s12 = sld [smem:[#allocation6 + $0x30]] }
 0x1b5   : > { %v1148_v22 = vpop.permute.xlu1 %1147  ;;  %v1190_v29 = vpop.permute.xlu0 %1189 }
 0x1b6   : > { %v1286_v35 = vpop.permute.xlu2 %1285  ;;  %v1152_v39 = vadd.f32 %v1148_v22, %v1124_v56  ;;  %v1241_v56 = vmul.f32 %v1240_v48, %v3394_v53  ;;  %v1986_v53 = vmul.f32 %v1984_v51, %v3696_v4  ;;  %v2054_v51 = vstv %s3698_s23  ;;  %s3814_s23 = sld [smem:[#allocation6 + $0x64]] }
 0x1b8   : > { %v1174_v34 = vadd.f32 %v1172_v6, %v1152_v39 }
 0x1ba   : > { %v1194_v25 = vadd.f32 %v1190_v29, %v1174_v34  ;;  %v1958_v29 = vmul.f32 %v1956_v50, %v3696_v4  ;;  %v3712_v34 = vld [vmem:[#allocation2 + $0xa9] sm:$0xff] }
 0x1bb   : > { %1989 = vrot.lane.b32.xlu0 %v1985_v7, %s2822_s15  ;;  %1961 = vrot.lane.b32.xlu1 %v1957_v26, %s2821_s6  ;;  %v1242_v7 = vmul.f32 %v1240_v48, %v3417_v12 }
 0x1bc   : > { %v1222_v28 = vadd.f32 %v1218_v5, %v1194_v25  ;;  %1918 = vrot.lane.b32.xlu2 %v1914_v40, %s2822_s15  ;;  %v2028_v5 = vmul.f32 %v2026_v20, %v3693_v33  ;;  %v1311_v40 = vstv %s3700_s24  ;;  %s3818_s24 = sld [smem:[#allocation6 + $0x65]] }
 0x1bd   : > { %v1216_v23 = vpop.permute.xlu1 %1215  ;;  %v1258_v63 = vpop.permute.xlu0 %1257 }
 0x1be   : > { %v1221_v1 = vadd.f32 %v1216_v23, %v1193_v57  ;;  %v1331_v6 = vpop.permute.xlu2 %1330  ;;  %v802_v57 = vstv %s3689_s22  ;;  %v1244_v12 = vadd.f32 %v1242_v7, %v1222_v28  ;;  %v2055_v23 = vmul.f32 %v2054_v51, %v3712_v34  ;;  %s2509_s22 = sld [smem:[#allocation6 + $0x33]] }
 0x1bf   : > { %v1313_v28 = vmul.f32 %v1311_v40, %v3468_v38  ;;  %v804_v38 = vmul.f32 %v802_v57, %v3230_v30 }
 0x1c0   : > { %v1243_v22 = vadd.f32 %v1241_v56, %v1221_v1  ;;  %v803_v56 = vmul.f32 %v802_v57, %v3202_v19  ;;  %v1312_v1 = vmul.f32 %v1311_v40, %v3437_v21 }
 0x1c2   : > { %v1263_v39 = vadd.f32 %v1258_v63, %v1243_v22  ;;  %v2027_v63 = vmul.f32 %v2026_v20, %v3712_v34  ;;  %v3729_v22 = vld [vmem:[#allocation2 + $0xb2] sm:$0xff] }
 0x1c3   : > { %2033 = vrot.lane.b32.xlu0 %v2028_v5, %s2821_s6  ;;  %1991 = vrot.lane.b32.xlu1 %v1986_v53, %s2822_s15  ;;  %v1381_v5 = vstv %s3708_s28  ;;  %s3831_s28 = sld [smem:[#allocation6 + $0x36]] }
 0x1c4   : > { %v1291_v26 = vadd.f32 %v1286_v35, %v1263_v39  ;;  %1963 = vrot.lane.b32.xlu2 %v1958_v29, %s2821_s6  ;;  %v2096_v29 = vstv %s3715_s9  ;;  %s3837_s9 = sld [smem:[#allocation6 + $0x67]] }
 0x1c5   : > { %v1260_v50 = vpop.permute.xlu1 %1259  ;;  %v1288_v25 = vpop.permute.xlu0 %1287 }
 0x1c6   : > { %v1399_v48 = vpop.permute.xlu2 %1398  ;;  %v1264_v35 = vadd.f32 %v1260_v50, %v1244_v12  ;;  %v1314_v19 = vadd.f32 %v1312_v1, %v1291_v26  ;;  %v1382_v50 = vmul.f32 %v1381_v5, %v3492_v47  ;;  %v2098_v12 = vmul.f32 %v2096_v29, %v3729_v22 }
 0x1c7   : > { %v2056_v26 = vmul.f32 %v2054_v51, %v3693_v33  ;;  %v2124_v47 = vstv %s3732_s21  ;;  %s3854_s21 = sld [smem:[#allocation6 + $0x6a]] }
 0x1c8   : > { %v1292_v53 = vadd.f32 %v1288_v25, %v1264_v35  ;;  %v844_v35 = vstv %s3725_s14  ;;  %s3849_s14 = sld [smem:[#allocation6 + $0x68]] }
 0x1ca   : > { %v1315_v40 = vadd.f32 %v1313_v28, %v1292_v53  ;;  %v1383_v53 = vmul.f32 %v1381_v5, %v3465_v14 }
 0x1cb   : > { %807 = vrot.lane.b32.xlu0 %v803_v56, %s2822_s15  ;;  %2059 = vrot.lane.b32.xlu1 %v2055_v23, %s2822_s15 }
 0x1cc   : > { %2031 = vrot.lane.b32.xlu2 %v2027_v63, %s2821_s6  ;;  %v1335_v23 = vadd.f32 %v1331_v6, %v1315_v40  ;;  %v3742_v63 = vld [vmem:[#allocation2 + $0xaa] sm:$0xff] }
 0x1cd   : > { %v1329_v21 = vpop.permute.xlu1 %1328  ;;  %v1357_v20 = vpop.permute.xlu0 %1356  ;;  %v2097_v6 = vmul.f32 %v2096_v29, %v3742_v63  ;;  %v846_v29 = vmul.f32 %v844_v35, %v3268_v3 }
 0x1ce   : > { %v1334_v39 = vadd.f32 %v1329_v21, %v1314_v19  ;;  %v1429_v7 = vpop.permute.xlu2 %1428  ;;  %v845_v19 = vmul.f32 %v844_v35, %v3256_v37  ;;  %v2125_v21 = vmul.f32 %v2124_v47, %v3742_v63  ;;  %v943_v35 = vstv %s3757_s30  ;;  %s3878_s30 = sld [smem:[#allocation6 + $0x6b]] }
 0x1d0   : > { %v1362_v25 = vadd.f32 %v1357_v20, %v1334_v39 }
 0x1d2   : > { %v1384_v56 = vadd.f32 %v1382_v50, %v1362_v25  ;;  %v1451_v50 = vstv %s2491_s26  ;;  %s3858_s26 = sld [smem:[#allocation6 + $0x48]] }
 0x1d3   : > { %2103 = vrot.lane.b32.xlu0 %v2098_v12, %s2821_s6  ;;  %809 = vrot.lane.b32.xlu1 %v804_v38, %s2822_s15  ;;  %v2126_v38 = vmul.f32 %v2124_v47, %v3729_v22  ;;  %v1453_v25 = vmul.f32 %v1451_v50, %v3518_v44 }
 0x1d4   : > { %2061 = vrot.lane.b32.xlu2 %v2056_v26, %s2822_s15  ;;  %v1404_v1 = vadd.f32 %v1399_v48, %v1384_v56  ;;  %v872_v48 = vstv %s3745_s25  ;;  %v1452_v56 = vmul.f32 %v1451_v50, %v3489_v18  ;;  %v945_v50 = vmul.f32 %v943_v35, %v3300_v61  ;;  %s3856_s25 = sld [smem:[#allocation6 + $0x39]] }
 0x1d5   : > { %v1359_v30 = vpop.permute.xlu1 %1358  ;;  %v1401_v57 = vpop.permute.xlu0 %1400  ;;  %v874_v12 = vmul.f32 %v872_v48, %v3268_v3 }
 0x1d6   : > { %v1363_v28 = vadd.f32 %v1359_v30, %v1335_v23  ;;  %v1497_v51 = vpop.permute.xlu2 %1496  ;;  %v915_v23 = vstv %s3753_s27  ;;  %s3871_s27 = sld [smem:[#allocation7 + $0x1]] }
 0x1d7   : > { %v916_v30 = vmul.f32 %v915_v23, %v3278_v49 }
 0x1d8   : > { %v1385_v20 = vadd.f32 %v1383_v53, %v1363_v28  ;;  %v3777_v53 = vld [vmem:[#allocation2 + $0x1a] sm:$0xff] }
 0x1d9   : > { %v873_v18 = vmul.f32 %v3777_v53, %v872_v48 }
 0x1da   : > { %v1405_v5 = vadd.f32 %v1401_v57, %v1385_v20  ;;  %v944_v57 = vmul.f32 %v943_v35, %v3278_v49  ;;  %v985_v49 = vstv %s3771_s7  ;;  %v1592_v35 = vstv %s2503_s12  ;;  %s3893_s7 = sld [smem:[#allocation6 + $0x4b]] }
 0x1db   : > { %849 = vrot.lane.b32.xlu0 %v845_v19, %s2821_s6  ;;  %2129 = vrot.lane.b32.xlu1 %v2125_v21, %s2822_s15  ;;  %v1522_v19 = vstv %s3765_s5  ;;  %s3891_s5 = sld [smem:[#allocation6 + $0x3c]] }
 0x1dc   : > { %2101 = vrot.lane.b32.xlu2 %v2097_v6, %s2821_s6  ;;  %v1433_v40 = vadd.f32 %v1429_v7, %v1405_v5  ;;  %v1524_v6 = vmul.f32 %v1522_v19, %v3561_v9  ;;  %v1523_v9 = vmul.f32 %v1522_v19, %v3536_v13  ;;  %s3922_s12 = sld [smem:[#allocation6 + $0x3f]] }
 0x1dd   : > { %v1427_v14 = vpop.permute.xlu1 %1426  ;;  %v1469_v37 = vpop.permute.xlu0 %1468 }
 0x1de   : > { %v1542_v39 = vpop.permute.xlu2 %1541  ;;  %v1432_v26 = vadd.f32 %v1427_v14, %v1404_v1  ;;  %v1455_v47 = vadd.f32 %v1453_v25, %v1433_v40 }
 0x1e0   : > { %v1454_v1 = vadd.f32 %v1452_v56, %v1432_v26  ;;  %v1013_v26 = vstv %s3783_s8  ;;  %v1055_v56 = vstv %s3788_s11  ;;  %s3902_s8 = sld [smem:[#allocation6 + $0x6d]] }
 0x1e1   : > { %s3913_s11 = sld [smem:[#allocation6 + $0x4e]] }
 0x1e2   : > { %v1474_v21 = vadd.f32 %v1469_v37, %v1454_v1  ;;  %v1593_v1 = vmul.f32 %v1592_v35, %v3577_v42  ;;  %v1662_v42 = vstv %s2509_s22  ;;  %s3938_s22 = sld [smem:[#allocation6 + $0x51]] }
 0x1e3   : > { %851 = vrot.lane.b32.xlu1 %v846_v29, %s2821_s6  ;;  %879 = vrot.lane.b32.xlu0 %v874_v12, %s2822_s15  ;;  %v987_v29 = vmul.f32 %v985_v49, %v3297_v59 }
 0x1e4   : > { %2131 = vrot.lane.b32.xlu2 %v2126_v38, %s2822_s15  ;;  %v1502_v12 = vadd.f32 %v1497_v51, %v1474_v21  ;;  %v917_v38 = vmul.f32 %v915_v23, %v3300_v61  ;;  %v1594_v61 = vmul.f32 %v1592_v35, %v3558_v36  ;;  %v3804_v23 = vld [vmem:[#allocation2 + $0x31] sm:$0xff]  ;;  %v1083_v36 = vstv %s3799_s13  ;;  %s3927_s13 = sld [smem:[#allocation6 + $0x6e]] }
 0x1e5   : > { %v1471_v3 = vpop.permute.xlu1 %1470  ;;  %v1499_v7 = vpop.permute.xlu0 %1498  ;;  %v1154_v35 = vstv %s3818_s24  ;;  %s3949_s24 = sld [smem:[#allocation6 + $0x70]] }
 0x1e6   : > { %v3773_v44 = vpop.permute.xlu2 %1609  ;;  %v1475_v28 = vadd.f32 %v1471_v3, %v1455_v47  ;;  %v1525_v40 = vadd.f32 %v1523_v9, %v1502_v12  ;;  %v1014_v47 = vmul.f32 %v3804_v23, %v1013_v26 }
 0x1e8   : > { %v1503_v20 = vadd.f32 %v1499_v7, %v1475_v28 }
 0x1ea   : > { %v1526_v37 = vadd.f32 %v1524_v6, %v1503_v20 }
 0x1eb   : > { %920 = vrot.lane.b32.xlu1 %v916_v30, %s2821_s6  ;;  %948 = vrot.lane.b32.xlu0 %v944_v57, %s2822_s15  ;;  %v3807_v30 = vld [vmem:[#allocation2 + $0x32] sm:$0xff]  ;;  %v986_v57 = vmul.f32 %v3804_v23, %v985_v49 }
 0x1ec   : > { %877 = vrot.lane.b32.xlu2 %v873_v18, %s2822_s15  ;;  %v1546_v25 = vadd.f32 %v1542_v39, %v1526_v37  ;;  %v1056_v39 = vmul.f32 %v3807_v30, %v1055_v56 }
 0x1ed   : > { %v1540_v14 = vpop.permute.xlu1 %1539  ;;  %v1568_v48 = vpop.permute.xlu0 %1567 }
 0x1ee   : > { %v1640_v5 = vpop.permute.xlu2 %1639  ;;  %v1545_v3 = vadd.f32 %v1540_v14, %v1525_v40  ;;  %v3820_v14 = vld [vmem:[#allocation2 + $0x3a] sm:$0xff] }
 0x1f0   : > { %v1573_v28 = vadd.f32 %v1568_v48, %v1545_v3  ;;  %v1057_v48 = vmul.f32 %v3820_v14, %v1055_v56  ;;  %v1126_v56 = vstv %s3814_s23  ;;  %s3944_s23 = sld [smem:[#allocation6 + $0x42]] }
 0x1f2   : > { %v1595_v6 = vadd.f32 %v1593_v1, %v1573_v28  ;;  %v1196_v28 = vstv %s3837_s9  ;;  %s3971_s9 = sld [smem:[#allocation6 + $0x71]] }
 0x1f3   : > { %950 = vrot.lane.b32.xlu1 %v945_v50, %s2822_s15  ;;  %992 = vrot.lane.b32.xlu0 %v987_v29, %s2821_s6  ;;  %v1085_v50 = vmul.f32 %v3820_v14, %v1083_v36  ;;  %v3824_v29 = vld [vmem:[#allocation2 + $0x39] sm:$0xff] }
 0x1f4   : > { %922 = vrot.lane.b32.xlu2 %v917_v38, %s2821_s6  ;;  %v1015_v12 = vmul.f32 %v3824_v29, %v1013_v26  ;;  %v1615_v9 = vadd.f32 %v3773_v44, %v1595_v6  ;;  %v1664_v38 = vmul.f32 %v1662_v42, %v3593_v27  ;;  %v3862_v6 = vld [vmem:[#allocation2 + $0x50] sm:$0xff] }
 0x1f5   : > { %v1570_v59 = vpop.permute.xlu1 %1569  ;;  %v1612_v51 = vpop.permute.xlu0 %1611 }
 0x1f6   : > { %v1574_v7 = vadd.f32 %v1570_v59, %v1546_v25  ;;  %v3801_v13 = vpop.permute.xlu2 %1707  ;;  %v1663_v25 = vmul.f32 %v1662_v42, %v3574_v46  ;;  %v3841_v59 = vld [vmem:[#allocation2 + $0x48] sm:$0xff] }
 0x1f7   : > { %v1155_v3 = vmul.f32 %v3841_v59, %v1154_v35 }
 0x1f8   : > { %v1596_v18 = vadd.f32 %v1594_v61, %v1574_v7  ;;  %v1084_v61 = vmul.f32 %v3807_v30, %v1083_v36 }
 0x1fa   : > { %v1616_v20 = vadd.f32 %v1612_v51, %v1596_v18  ;;  %v1127_v51 = vmul.f32 %v3841_v59, %v1126_v56 }
 0x1fb   : > { %1018 = vrot.lane.b32.xlu1 %v1014_v47, %s2822_s15  ;;  %1060 = vrot.lane.b32.xlu0 %v1056_v39, %s2821_s6  ;;  %v1733_v47 = vstv %s3831_s28  ;;  %s3963_s28 = sld [smem:[#allocation6 + $0x54]] }
 0x1fc   : > { %990 = vrot.lane.b32.xlu2 %v986_v57, %s2821_s6  ;;  %v1644_v37 = vadd.f32 %v1640_v5, %v1616_v20  ;;  %v1735_v57 = vmul.f32 %v1733_v47, %v3624_v41  ;;  %v1156_v41 = vmul.f32 %v3862_v6, %v1154_v35  ;;  %v473_v35 = vstv %s3858_s26  ;;  %s4013_s26 = sld [smem:[#allocation6 + $0x74]] }
 0x1fd   : > { %v1638_v19 = vpop.permute.xlu1 %1637  ;;  %v1680_v21 = vpop.permute.xlu0 %1679 }
 0x1fe   : > { %v1753_v49 = vpop.permute.xlu2 %1752  ;;  %v1643_v40 = vadd.f32 %v1638_v19, %v1615_v9  ;;  %v1666_v26 = vadd.f32 %v1664_v38, %v1644_v37  ;;  %v1224_v38 = vstv %s3849_s14  ;;  %s3973_s14 = sld [smem:[#allocation6 + $0x45]] }
 0x200   : > { %v1665_v7 = vadd.f32 %v1663_v25, %v1643_v40  ;;  %v1266_v40 = vstv %s3854_s21  ;;  %s3985_s21 = sld [smem:[#allocation6 + $0x57]] }
 0x202   : > { %v1685_v39 = vadd.f32 %v1680_v21, %v1665_v7  ;;  %v3865_v21 = vld [vmem:[#allocation2 + $0x51] sm:$0xff]  ;;  %v3885_v7 = vld [vmem:[#allocation2 + $0x49] sm:$0xff] }
 0x203   : > { %1062 = vrot.lane.b32.xlu1 %v1057_v48, %s2821_s6  ;;  %1090 = vrot.lane.b32.xlu0 %v1085_v50, %s2822_s15  ;;  %v1198_v20 = vmul.f32 %v3865_v21, %v1196_v28  ;;  %v1734_v50 = vmul.f32 %v1733_v47, %v3608_v54  ;;  %v1197_v47 = vmul.f32 %v3885_v7, %v1196_v28  ;;  %v2658_v28 = vld [vmem:[#allocation2 + $0x8] sm:$0xff] }
 0x204   : > { %1020 = vrot.lane.b32.xlu2 %v1015_v12, %s2822_s15  ;;  %v1713_v42 = vadd.f32 %v3801_v13, %v1685_v39  ;;  %v1128_v12 = vmul.f32 %v3862_v6, %v1126_v56  ;;  %v1803_v13 = vstv %s3856_s25  ;;  %v463_v39 = vstv %s3871_s27  ;;  %s3990_s25 = sld [smem:[#allocation6 + $0x73]]  ;;  %s2556_s27 = sshll.u32 %s4332_s18, 4 }
 0x205   : > { %v1682_v5 = vpop.permute.xlu1 %1681  ;;  %v1710_v44 = vpop.permute.xlu0 %1709 }
 0x206   : > { %v3839_v27 = vpop.permute.xlu2 %1820  ;;  %v1686_v46 = vadd.f32 %v1682_v5, %v1666_v26  ;;  %v1736_v37 = vadd.f32 %v1734_v50, %v1713_v42  ;;  %v1805_v26 = vmul.f32 %v1803_v13, %v3626_v31  ;;  %v1804_v31 = vmul.f32 %v1803_v13, %v3642_v11 }
 0x208   : > { %v1714_v1 = vadd.f32 %v1710_v44, %v1686_v46  ;;  %v3888_v46 = vld [vmem:[#allocation2 + $0x4a] sm:$0xff] }
 0x20a   : > { %v1737_v48 = vadd.f32 %v1735_v57, %v1714_v1 }
 0x20b   : > { %1131 = vrot.lane.b32.xlu1 %v1127_v51, %s2821_s6  ;;  %1159 = vrot.lane.b32.xlu0 %v1155_v3, %s2822_s15  ;;  %v2655_v51 = vld [vmem:[#allocation2] sm:$0xff] }
 0x20c   : > { %1088 = vrot.lane.b32.xlu2 %v1084_v61, %s2822_s15  ;;  %v1757_v9 = vadd.f32 %v1753_v49, %v1737_v48  ;;  %v474_v3 = vmul.f32 %v2655_v51, %v473_v35  ;;  %v1225_v49 = vmul.f32 %v3885_v7, %v1224_v38  ;;  %v1267_v61 = vmul.f32 %v3888_v46, %v1266_v40 }
 0x20d   : > { %v1751_v18 = vpop.permute.xlu1 %1750  ;;  %v1779_v36 = vpop.permute.xlu0 %1778  ;;  %v475_v48 = vmul.f32 %v2658_v28, %v473_v35  ;;  %v2660_v35 = vld [vmem:[#allocation2 + $0x1] sm:$0xff] }
 0x20e   : > { %v3860_v19 = vpop.permute.xlu2 %1850  ;;  %v1756_v56 = vadd.f32 %v1751_v18, %v1736_v37  ;;  %v476_v18 = vadd.f32 %v474_v3, %v463_v39  ;;  %v1873_v37 = vstv %s3891_s5  ;;  %s4153_s5 = sld [smem:[#allocation6 + $0x69]] }
 0x20f   : > { %v1875_v3 = vmul.f32 %v1873_v37, %v3662_v15 }
 0x210   : > { %v1784_v57 = vadd.f32 %v1779_v36, %v1756_v56  ;;  %v543_v56 = vstv %s3893_s7  ;;  %s4028_s7 = scalar_lea.vmem %s4308_s3, %s2556_s27  ;;  %s4130_s27 = sld [smem:[#allocation6 + $0x82]] }
 0x212   : > { %v1806_v50 = vadd.f32 %v1804_v31, %v1784_v57  ;;  %v3932_v31 = vld [vmem:[#allocation2 + $0x60] sm:$0xff] }
 0x213   : > { %1161 = vrot.lane.b32.xlu1 %v1156_v41, %s2822_s15  ;;  %1203 = vrot.lane.b32.xlu0 %v1198_v20, %s2821_s6  ;;  %v1294_v41 = vstv %s3878_s30  ;;  %s4146_s30 = sld [smem:[#allocation6 + $0x83]] }
 0x214   : > { %1133 = vrot.lane.b32.xlu2 %v1128_v12, %s2821_s6  ;;  %v504_v12 = vadd.f32 %v3295_v58, %v476_v18  ;;  %v1826_v58 = vadd.f32 %v3839_v27, %v1806_v50 }
 0x215   : > { %v1781_v25 = vpop.permute.xlu1 %1780  ;;  %v1823_v54 = vpop.permute.xlu0 %1822 }
 0x216   : > { %v3882_v5 = vpop.permute.xlu2 %1918  ;;  %v1785_v44 = vadd.f32 %v1781_v25, %v1757_v9  ;;  %v3908_v9 = vld [vmem:[#allocation2 + $0x52] sm:$0xff] }
 0x217   : > { %v1268_v13 = vmul.f32 %v3908_v9, %v1266_v40  ;;  %v1296_v25 = vmul.f32 %v3908_v9, %v1294_v41 }
 0x218   : > { %v1807_v1 = vadd.f32 %v1805_v26, %v1785_v44  ;;  %v1226_v44 = vmul.f32 %v3865_v21, %v1224_v38  ;;  %v544_v26 = vmul.f32 %v2660_v35, %v543_v56  ;;  %v1874_v38 = vmul.f32 %v1873_v37, %v3644_v24 }
 0x21a   : > { %v1827_v11 = vadd.f32 %v1823_v54, %v1807_v1  ;;  %v532_v54 = vadd.f32 %v3339_v17, %v504_v12  ;;  %v1337_v17 = vstv %s3902_s8  ;;  %v613_v1 = vstv %s3913_s11  ;;  %v2663_v12 = vld [vmem:[#allocation2 + $0x2] sm:$0xff]  ;;  %s4038_s8 = sld [smem:[#allocation6 + $0x76]] }
 0x21b   : > { %1229 = vrot.lane.b32.xlu1 %v1225_v49, %s2822_s15  ;;  %1271 = vrot.lane.b32.xlu0 %v1267_v61, %s2821_s6  ;;  %v477_v49 = vadd.f32 %v475_v48, %v463_v39  ;;  %v1338_v57 = vmul.f32 %v3932_v31, %v1337_v17  ;;  %v2662_v48 = vld [vmem:[#allocation2 + $0x9] sm:$0xff]  ;;  %s4041_s11 = sld [smem:[#allocation6 + $0x5a]] }
 0x21c   : > { %1201 = vrot.lane.b32.xlu2 %v1197_v47, %s2821_s6  ;;  %v1855_v51 = vadd.f32 %v3860_v19, %v1827_v11  ;;  %v546_v19 = vadd.f32 %v544_v26, %v532_v54  ;;  %v545_v50 = vmul.f32 %v2662_v48, %v543_v56 }
 0x21d   : > { %v1849_v20 = vpop.permute.xlu1 %1848  ;;  %v1891_v42 = vpop.permute.xlu0 %1890  ;;  %v505_v39 = vadd.f32 %v3320_v8, %v477_v49  ;;  %v614_v8 = vmul.f32 %v2663_v12, %v613_v1 }
 0x21e   : > { %v3904_v36 = vpop.permute.xlu2 %1963  ;;  %v1854_v40 = vadd.f32 %v1849_v20, %v1826_v58  ;;  %v1877_v15 = vadd.f32 %v1875_v3, %v1855_v51  ;;  %v1295_v20 = vmul.f32 %v3888_v46, %v1294_v41  ;;  %v574_v28 = vadd.f32 %v3324_v10, %v546_v19  ;;  %v3956_v58 = vld [vmem:[#allocation2 + $0x68] sm:$0xff] }
 0x21f   : > { %v533_v11 = vadd.f32 %v3304_v62, %v505_v39  ;;  %v1365_v10 = vstv %s3927_s13  ;;  %v1339_v3 = vmul.f32 %v3956_v58, %v1337_v17  ;;  %s4062_s13 = sld [smem:[#allocation6 + $0x77]] }
 0x220   : > { %v1876_v24 = vadd.f32 %v1874_v38, %v1854_v40  ;;  %v602_v37 = vadd.f32 %v3380_v43, %v574_v28  ;;  %v1366_v54 = vmul.f32 %v3932_v31, %v1365_v10  ;;  %v2665_v38 = vld [vmem:[#allocation2 + $0xa] sm:$0xff] }
 0x221   : > { %v547_v43 = vadd.f32 %v545_v50, %v533_v11  ;;  %v615_v19 = vmul.f32 %v2665_v38, %v613_v1  ;;  %v1367_v50 = vmul.f32 %v3956_v58, %v1365_v10  ;;  %v754_v10 = vstv %s3963_s28  ;;  %s4089_s28 = sld [smem:[#allocation6 + $0x7c]] }
 0x222   : > { %v616_v26 = vadd.f32 %v614_v8, %v602_v37 }
 0x223   : > { %1273 = vrot.lane.b32.xlu1 %v1268_v13, %s2821_s6  ;;  %1301 = vrot.lane.b32.xlu0 %v1296_v25, %s2822_s15  ;;  %v1944_v13 = vstv %s3922_s12  ;;  %v1896_v25 = vadd.f32 %v1891_v42, %v1876_v24  ;;  %v575_v49 = vadd.f32 %v3359_v32, %v547_v43  ;;  %v1407_v32 = vstv %s3949_s24  ;;  %v2669_v43 = vld [vmem:[#allocation2 + $0x19] sm:$0xff]  ;;  %s4058_s12 = sld [smem:[#allocation6 + $0x5d]] }
 0x224   : > { %1231 = vrot.lane.b32.xlu2 %v1226_v44, %s2822_s15  ;;  %v1946_v41 = vmul.f32 %v1944_v13, %v3696_v4  ;;  %v1945_v4 = vmul.f32 %v1944_v13, %v3677_v2  ;;  %v644_v40 = vadd.f32 %v3422_v16, %v616_v26  ;;  %v755_v26 = vmul.f32 %v2669_v43, %v754_v10  ;;  %v2673_v43 = vld [vmem:[#allocation2 + $0x22] sm:$0xff]  ;;  %s4084_s24 = sld [smem:[#allocation6 + $0x60]] }
 0x225   : > { %v1893_v27 = vpop.permute.xlu1 %1892  ;;  %v1921_v61 = vpop.permute.xlu0 %1920  ;;  %v1924_v42 = vadd.f32 %v3882_v5, %v1896_v25  ;;  %v2014_v5 = vstv %s3944_s23  ;;  %v1435_v25 = vstv %s3971_s9  ;;  %s4080_s23 = sld [smem:[#allocation6 + $0x7a]] }
 0x226   : > { %v3929_v47 = vpop.permute.xlu2 %2031  ;;  %v1897_v18 = vadd.f32 %v1893_v27, %v1877_v15  ;;  %v603_v27 = vadd.f32 %v3400_v60, %v575_v49  ;;  %v2016_v17 = vmul.f32 %v2014_v5, %v3693_v33  ;;  %v2666_v60 = vld [vmem:[#allocation2 + $0x18] sm:$0xff]  ;;  %v672_v1 = vadd.f32 %v3404_v0, %v644_v40  ;;  %v3999_v49 = vld [vmem:[#allocation2 + $0x69] sm:$0xff]  ;;  %s4096_s9 = sld [smem:[#allocation6 + $0x7d]] }
 0x227   : > { %v1947_v2 = vadd.f32 %v1945_v4, %v1924_v42  ;;  %v2015_v12 = vmul.f32 %v2014_v5, %v3712_v34 }
 0x228   : > { %v1925_v44 = vadd.f32 %v1921_v61, %v1897_v18  ;;  %v684_v61 = vstv %s3938_s22  ;;  %v617_v28 = vadd.f32 %v615_v19, %v603_v27  ;;  %s4073_s22 = sld [smem:[#allocation6 + $0x79]] }
 0x22a   : > { %v1948_v51 = vadd.f32 %v1946_v41, %v1925_v44  ;;  %v645_v0 = vadd.f32 %v3382_v45, %v617_v28  ;;  %v2668_v41 = vld [vmem:[#allocation2 + $0x20] sm:$0xff] }
 0x22b   : > { %1342 = vrot.lane.b32.xlu1 %v1338_v57, %s2821_s6  ;;  %v685_v57 = vmul.f32 %v2666_v60, %v684_v61  ;;  %v686_v44 = vmul.f32 %v2668_v41, %v684_v61  ;;  %v4320_v61 = vld [vmem:[#allocation13_spill] sm:$0xff]  ;;  %v4323_v41 = vld [vmem:[#allocation16_spill] sm:$0xff] }
 0x22c   : > { %1299 = vrot.lane.b32.xlu2 %v1295_v20, %s2822_s15  ;;  %v1968_v15 = vadd.f32 %v3904_v36, %v1948_v51  ;;  %v3978_v36 = vld [vmem:[#allocation2 + $0x61] sm:$0xff]  ;;  %v673_v34 = vadd.f32 %v3445_v55, %v645_v0  ;;  %v1409_v55 = vmul.f32 %v3999_v49, %v1407_v32 }
 0x22d   : > { %v1962_v56 = vpop.permute.xlu1 %1961  ;;  %v1990_v62 = vpop.permute.xlu0 %1989  ;;  %v1408_v33 = vmul.f32 %v3978_v36, %v1407_v32  ;;  %v687_v11 = vadd.f32 %v685_v57, %v672_v1  ;;  %v1436_v4 = vmul.f32 %v3978_v36, %v1435_v25  ;;  %v1477_v32 = vstv %s3990_s25  ;;  %v2671_v1 = vld [vmem:[#allocation2 + $0x21] sm:$0xff]  ;;  %s4118_s25 = sld [smem:[#allocation6 + $0x66]] }
 0x22e   : > { %v3951_v35 = vpop.permute.xlu2 %2061  ;;  %v1967_v24 = vadd.f32 %v1962_v56, %v1947_v2  ;;  %v2084_v56 = vstv %s3973_s14  ;;  %v688_v38 = vadd.f32 %v686_v44, %v673_v34  ;;  %s2462_s14 = sld [smem:[#allocation6 + $0x63]] }
 0x22f   : > { %v715_v37 = vadd.f32 %v3472_v52, %v687_v11  ;;  %v2086_v40 = vmul.f32 %v2084_v56, %v3729_v22  ;;  %v2085_v2 = vmul.f32 %v2084_v56, %v3742_v63  ;;  %v4322_v63 = vld [vmem:[#allocation12_spill] sm:$0xff] }
 0x230   : > { %v1995_v8 = vadd.f32 %v1990_v62, %v1967_v24  ;;  %v716_v5 = vadd.f32 %v4320_v61, %v688_v38  ;;  %v756_v24 = vmul.f32 %v2671_v1, %v754_v10  ;;  %v965_v1 = vstv %s4058_s12  ;;  %s2480_s12 = sld [smem:[#allocation6 + $0x6c]] }
 0x232   : > { %v2017_v42 = vadd.f32 %v2015_v12, %v1995_v8  ;;  %v1437_v8 = vmul.f32 %v3999_v49, %v1435_v25  ;;  %v1505_v25 = vstv %s4013_s26  ;;  %s4121_s26 = sld [smem:[#allocation6 + $0x80]] }
 0x233   : > { %1370 = vrot.lane.b32.xlu1 %v1366_v54, %s2822_s15  ;;  %v4319_v54 = vld [vmem:[#allocation15_spill] sm:$0xff] }
 0x234   : > { %1344 = vrot.lane.b32.xlu2 %v1339_v3, %s2821_s6  ;;  %v743_v52 = vadd.f32 %v4319_v54, %v715_v37  ;;  %v2037_v27 = vadd.f32 %v3929_v47, %v2017_v42  ;;  %v4321_v47 = vld [vmem:[#allocation14_spill] sm:$0xff] }
 0x235   : > { %v1992_v16 = vpop.permute.xlu1 %1991  ;;  %v2034_v39 = vpop.permute.xlu0 %2033 }
 0x236   : > { %v1996_v18 = vadd.f32 %v1992_v16, %v1968_v15  ;;  %v3976_v20 = vpop.permute.xlu2 %2101  ;;  %v757_v19 = vadd.f32 %v755_v26, %v743_v52  ;;  %v824_v15 = vstv %s3985_s21  ;;  %v4046_v52 = vld [vmem:[#allocation2 + $0x6a] sm:$0xff]  ;;  %s4113_s21 = sld [smem:[#allocation6 + $0x7f]] }
 0x237   : > { %v825_v28 = vmul.f32 %v3777_v53, %v824_v15  ;;  %v826_v26 = vmul.f32 %v2673_v43, %v824_v15  ;;  %v1479_v42 = vmul.f32 %v4046_v52, %v1477_v32  ;;  %v2675_v15 = vld [vmem:[#allocation2 + $0x38] sm:$0xff] }
 0x238   : > { %v2018_v48 = vadd.f32 %v2016_v17, %v1996_v18  ;;  %v744_v18 = vadd.f32 %v4322_v63, %v716_v5 }
 0x23a   : > { %v2038_v13 = vadd.f32 %v2034_v39, %v2018_v48  ;;  %v785_v39 = vadd.f32 %v4321_v47, %v757_v19  ;;  %v758_v0 = vadd.f32 %v756_v24, %v744_v18  ;;  %v1548_v19 = vstv %s4038_s8  ;;  %s4157_s8 = sld [smem:[#allocation6 + $0x85]] }
 0x23b   : > { %1412 = vrot.lane.b32.xlu1 %v1408_v33, %s2821_s6  ;;  %v4019_v33 = vld [vmem:[#allocation2 + $0x62] sm:$0xff]  ;;  %v1576_v18 = vstv %s4062_s13  ;;  %s4179_s13 = sld [smem:[#allocation6 + $0x88]] }
 0x23c   : > { %1372 = vrot.lane.b32.xlu2 %v1367_v50, %s2822_s15  ;;  %v2066_v3 = vadd.f32 %v3951_v35, %v2038_v13  ;;  %v1478_v48 = vmul.f32 %v4019_v33, %v1477_v32  ;;  %v786_v44 = vadd.f32 %v4323_v41, %v758_v0  ;;  %v4065_v32 = vld [vmem:[#allocation2 + $0x78] sm:$0xff] }
 0x23d   : > { %v2060_v45 = vpop.permute.xlu1 %2059  ;;  %v808_v62 = vpop.permute.xlu0 %807  ;;  %v1577_v41 = vmul.f32 %v4065_v32, %v1576_v18 }
 0x23e   : > { %v2132_v51 = vpop.permute.xlu2 %2131  ;;  %v2065_v35 = vadd.f32 %v2060_v45, %v2037_v27  ;;  %v2088_v17 = vadd.f32 %v2086_v40, %v2066_v3  ;;  %v813_v11 = vadd.f32 %v808_v62, %v785_v39  ;;  %v895_v27 = vstv %s4041_s11  ;;  %s4164_s11 = sld [smem:[#allocation6 + $0x86]] }
 0x240   : > { %v2087_v50 = vadd.f32 %v2085_v2, %v2065_v35  ;;  %v827_v37 = vadd.f32 %v825_v28, %v813_v11 }
 0x242   : > { %v2107_v13 = vadd.f32 %v3976_v20, %v2087_v50  ;;  %v1506_v20 = vmul.f32 %v4019_v33, %v1505_v25 }
 0x243   : > { %1440 = vrot.lane.b32.xlu1 %v1436_v4, %s2822_s15 }
 0x244   : > { %1414 = vrot.lane.b32.xlu2 %v1409_v55, %s2821_s6 }
 0x245   : > { %v810_v22 = vpop.permute.xlu1 %809  ;;  %v2104_v16 = vpop.permute.xlu0 %2103 }
 0x246   : > { %v878_v60 = vpop.permute.xlu2 %877  ;;  %v2108_v57 = vadd.f32 %v2104_v16, %v2088_v17  ;;  %v814_v54 = vadd.f32 %v810_v22, %v786_v44  ;;  %v897_v17 = vmul.f32 %v2675_v15, %v895_v27  ;;  %v1549_v22 = vmul.f32 %v4065_v32, %v1548_v19  ;;  %v2677_v16 = vld [vmem:[#allocation2 + $0x30] sm:$0xff] }
 0x247   : > { %v896_v47 = vmul.f32 %v2677_v16, %v895_v27  ;;  %v1618_v44 = vstv %s4073_s22  ;;  %v1716_v16 = vstv %s4096_s9  ;;  %s4185_s22 = sld [smem:[#allocation6 + $0x89]] }
 0x248   : > { %v4022_v12 = vadd.f32 %v2132_v51, %v2108_v57  ;;  %v828_v38 = vadd.f32 %v826_v26, %v814_v54  ;;  %v4092_v26 = vld [vmem:[#allocation2 + $0x81] sm:$0xff]  ;;  %s2550_s9 = sld [smem:[#allocation6 + $0x8f]] }
 0x249   : > { %v1620_v54 = vmul.f32 %v4092_v26, %v1618_v44 }
 0x24a   : > { %v2152_v53 = vpack.c.bf16 %v4022_v12, %v4022_v12  ;;  %v2158_v55 = vsel %vm2156_vm7, %v4022_v12, 0.0 }
 0x24b   : > { %1482 = vrot.lane.b32.xlu1 %v1478_v48, %s2821_s6 }
 0x24c   : > { %2155 = vst.msk [vmem:[%s4028_s7 + $0x4] sm:$0xf] %vm2153_vm6, %v2152_v53  ;;  %1442 = vrot.lane.b32.xlu2 %v1437_v8, %s2822_s15  ;;  %v966_v8 = vmul.f32 %v3804_v23, %v965_v1  ;;  %v4076_v53 = vld [vmem:[#allocation2 + $0x80] sm:$0xff]  ;;  %v967_v23 = vmul.f32 %v3824_v29, %v965_v1  ;;  %v1106_v1 = vstv %s2462_s14  ;;  %s2486_s14 = sld [smem:[#allocation6 + $0x6f]] }
 0x24d   : > { %v2130_v34 = vpop.permute.xlu1 %2129  ;;  %v850_v10 = vpop.permute.xlu0 %849  ;;  %v1578_v0 = vmul.f32 %v4076_v53, %v1576_v18  ;;  %v4098_v29 = vld [vmem:[#allocation2 + $0x79] sm:$0xff] }
 0x24e   : > { %v4043_v56 = vadd.f32 %v2130_v34, %v2107_v13  ;;  %v923_v45 = vpop.permute.xlu2 %922  ;;  %v855_v62 = vadd.f32 %v850_v10, %v827_v37  ;;  %v1550_v13 = vmul.f32 %v4076_v53, %v1548_v19  ;;  %v1688_v19 = vstv %s4089_s28  ;;  %s2548_s28 = sld [smem:[#allocation6 + $0x8e]] }
 0x250   : > { %v2151_v51 = vpack.c.bf16 %v4043_v56, %v4043_v56  ;;  %v883_v4 = vadd.f32 %v878_v60, %v855_v62  ;;  %v2157_v3 = vsel %vm2156_vm7, %v4043_v56, 0.0  ;;  %v1507_v60 = vmul.f32 %v4046_v52, %v1505_v25 }
 0x251   : > { %v2159_v40 = vadd.f32 %v2158_v55, %v2157_v3  ;;  %v1035_v55 = vstv %s4084_s24  ;;  %s2544_s24 = sld [smem:[#allocation6 + $0x8c]] }
 0x252   : > { %2154 = vst.msk [vmem:[%s4028_s7] sm:$0xf] %vm2153_vm6, %v2151_v51  ;;  %v898_v24 = vadd.f32 %v896_v47, %v883_v4  ;;  %v1619_v51 = vmul.f32 %v4098_v29, %v1618_v44  ;;  %v1787_v44 = vstv %s4121_s26  ;;  %s2516_s26 = sld [smem:[#allocation6 + $0x7e]] }
 0x253   : > { %1510 = vrot.lane.b32.xlu1 %v1506_v20, %s2822_s15  ;;  %2160 = vadd.xlane.f32.xlu0 %v2159_v40 }
 0x254   : > { %1484 = vrot.lane.b32.xlu2 %v1479_v42, %s2821_s6  ;;  %v1646_v42 = vstv %s4080_s23  ;;  %s2542_s23 = sld [smem:[#allocation6 + $0x8b]] }
 0x255   : > { %v852_v61 = vpop.permute.xlu1 %851  ;;  %v880_v5 = vpop.permute.xlu0 %879  ;;  %v1648_v3 = vmul.f32 %v4092_v26, %v1646_v42 }
 0x256   : > { %v856_v2 = vadd.f32 %v852_v61, %v828_v38  ;;  %v991_v35 = vpop.permute.xlu2 %990  ;;  %v1036_v38 = vmul.f32 %v3807_v30, %v1035_v55  ;;  %v1647_v30 = vmul.f32 %v4098_v29, %v1646_v42 }
 0x258   : > { %v884_v39 = vadd.f32 %v880_v5, %v856_v2 }
 0x25a   : > { %v899_v57 = vadd.f32 %v897_v17, %v884_v39 }
 0x25b   : > { %1553 = vrot.lane.b32.xlu1 %v1549_v22, %s2821_s6  ;;  %v1037_v22 = vmul.f32 %v3820_v14, %v1035_v55  ;;  %v4150_v55 = vld [vmem:[#allocation2 + $0x91] sm:$0xff] }
 0x25c   : > { %v927_v63 = vadd.f32 %v923_v45, %v899_v57  ;;  %1512 = vrot.lane.b32.xlu2 %v1507_v60, %s2822_s15 }
 0x25d   : > { %v921_v28 = vpop.permute.xlu1 %920  ;;  %v949_v48 = vpop.permute.xlu0 %948 }
 0x25e   : > { %v926_v50 = vadd.f32 %v921_v28, %v898_v24  ;;  %v1021_v11 = vpop.permute.xlu2 %1020  ;;  %v1108_v28 = vmul.f32 %v3862_v6, %v1106_v1 }
 0x260   : > { %v954_v37 = vadd.f32 %v949_v48, %v926_v50  ;;  %v4125_v48 = vld [vmem:[#allocation2 + $0x82] sm:$0xff] }
 0x261   : > { %v1718_v50 = vmul.f32 %v4125_v48, %v1716_v16 }
 0x262   : > { %v968_v25 = vadd.f32 %v966_v8, %v954_v37  ;;  %v1107_v8 = vmul.f32 %v3841_v59, %v1106_v1  ;;  %v1690_v37 = vmul.f32 %v4125_v48, %v1688_v19 }
 0x263   : > { %1583 = vrot.lane.b32.xlu1 %v1578_v0, %s2822_s15  ;;  %v1759_v0 = vstv %s4113_s21  ;;  %s2492_s21 = sld [smem:[#allocation6 + $0x72]] }
 0x264   : > { %1555 = vrot.lane.b32.xlu2 %v1550_v13, %s2821_s6  ;;  %v996_v34 = vadd.f32 %v991_v35, %v968_v25  ;;  %v4108_v35 = vld [vmem:[#allocation2 + $0x7a] sm:$0xff] }
 0x265   : > { %v951_v10 = vpop.permute.xlu1 %950  ;;  %v993_v45 = vpop.permute.xlu0 %992  ;;  %v1689_v15 = vmul.f32 %v4108_v35, %v1688_v19  ;;  %v1717_v39 = vmul.f32 %v4108_v35, %v1716_v16  ;;  %v4134_v25 = vld [vmem:[#allocation2 + $0x98] sm:$0xff] }
 0x266   : > { %v955_v62 = vadd.f32 %v951_v10, %v927_v63  ;;  %v1089_v43 = vpop.permute.xlu2 %1088  ;;  %v1761_v6 = vmul.f32 %v4134_v25, %v1759_v0 }
 0x267   : > { %1581 = vrot.lane.b32.xlu0 %v1577_v41, %s2822_s15  ;;  %v1176_v41 = vstv %s4118_s25  ;;  %s2498_s25 = sld [smem:[#allocation6 + $0x75]] }
 0x268   : > { %v969_v20 = vadd.f32 %v967_v23, %v955_v62 }
 0x26a   : > { %v997_v4 = vadd.f32 %v993_v45, %v969_v20 }
 0x26b   : > { %1625 = vrot.lane.b32.xlu1 %v1620_v54, %s2821_s6  ;;  %v4142_v54 = vld [vmem:[#allocation2 + $0x90] sm:$0xff] }
 0x26c   : > { %v1025_v40 = vadd.f32 %v1021_v11, %v997_v4  ;;  %1623 = vrot.lane.b32.xlu2 %v1619_v51, %s2821_s6  ;;  %v1788_v20 = vmul.f32 %v4142_v54, %v1787_v44  ;;  %v1829_v51 = vstv %s4130_s27  ;;  %v1760_v4 = vmul.f32 %v4142_v54, %v1759_v0  ;;  %s2522_s27 = sld [smem:[#allocation6 + $0x81]] }
 0x26d   : > { %v1019_v27 = vpop.permute.xlu1 %1018  ;;  %v1061_v61 = vpop.permute.xlu0 %1060 }
 0x26e   : > { %v1024_v5 = vadd.f32 %v1019_v27, %v996_v34  ;;  %v1134_v2 = vpop.permute.xlu2 %1133  ;;  %v1039_v57 = vadd.f32 %v1037_v22, %v1025_v40  ;;  %v1178_v40 = vmul.f32 %v3865_v21, %v1176_v41  ;;  %v1857_v22 = vstv %s4146_s30  ;;  %s2528_s30 = sld [smem:[#allocation6 + $0x84]] }
 0x26f   : > { %1653 = vrot.lane.b32.xlu0 %v1648_v3, %s2822_s15  ;;  %v1789_v21 = vmul.f32 %v4134_v25, %v1787_v44 }
 0x270   : > { %v1038_v17 = vadd.f32 %v1036_v38, %v1024_v5 }
 0x272   : > { %v1066_v47 = vadd.f32 %v1061_v61, %v1038_v17 }
 0x273   : > { %1693 = vrot.lane.b32.xlu1 %v1689_v15, %s2821_s6 }
 0x274   : > { %v1094_v60 = vadd.f32 %v1089_v43, %v1066_v47  ;;  %1651 = vrot.lane.b32.xlu2 %v1647_v30, %s2822_s15  ;;  %v1177_v43 = vmul.f32 %v3885_v7, %v1176_v41  ;;  %v1830_v7 = vmul.f32 %v4150_v55, %v1829_v51  ;;  %v1246_v47 = vstv %s4153_s5  ;;  %s4251_s5 = sld [smem:[#allocation6 + $0x87]] }
 0x275   : > { %v1063_v14 = vpop.permute.xlu1 %1062  ;;  %v1091_v24 = vpop.permute.xlu0 %1090 }
 0x276   : > { %v1067_v63 = vadd.f32 %v1063_v14, %v1039_v57  ;;  %v1202_v18 = vpop.permute.xlu2 %1201  ;;  %v1109_v23 = vadd.f32 %v1107_v8, %v1094_v60  ;;  %v1247_v60 = vmul.f32 %v3888_v46, %v1246_v47  ;;  %v1899_v57 = vstv %s4157_s8 }
 0x277   : > { %1721 = vrot.lane.b32.xlu0 %v1717_v39, %s2822_s15  ;;  %v1927_v8 = vstv %s4164_s11  ;;  %v1858_v46 = vmul.f32 %v4150_v55, %v1857_v22  ;;  %s2540_s11 = sld [smem:[#allocation6 + $0x8a]] }
 0x278   : > { %v1095_v11 = vadd.f32 %v1091_v24, %v1067_v63 }
 0x27a   : > { %v1110_v13 = vadd.f32 %v1108_v28, %v1095_v11  ;;  %v1248_v11 = vmul.f32 %v3908_v9, %v1246_v47 }
 0x27b   : > { %1723 = vrot.lane.b32.xlu1 %v1718_v50, %s2822_s15 }
 0x27c   : > { %v1138_v34 = vadd.f32 %v1134_v2, %v1110_v13  ;;  %1695 = vrot.lane.b32.xlu2 %v1690_v37, %s2821_s6  ;;  %v4160_v2 = vld [vmem:[#allocation2 + $0x99] sm:$0xff] }
 0x27d   : > { %v1132_v59 = vpop.permute.xlu1 %1131  ;;  %v1160_v10 = vpop.permute.xlu0 %1159  ;;  %v1831_v15 = vmul.f32 %v4160_v2, %v1829_v51  ;;  %v1859_v30 = vmul.f32 %v4160_v2, %v1857_v22  ;;  %v4209_v22 = vld [vmem:[#allocation2 + $0xa9] sm:$0xff] }
 0x27e   : > { %v1137_v45 = vadd.f32 %v1132_v59, %v1109_v23  ;;  %v1232_v62 = vpop.permute.xlu2 %1231  ;;  %v1317_v23 = vstv %s2480_s12  ;;  %s2546_s12 = sld [smem:[#allocation6 + $0x8d]] }
 0x27f   : > { %1766 = vrot.lane.b32.xlu0 %v1761_v6, %s2821_s6  ;;  %v1319_v59 = vmul.f32 %v3956_v58, %v1317_v23 }
 0x280   : > { %v1165_v42 = vadd.f32 %v1160_v10, %v1137_v45  ;;  %v4189_v10 = vld [vmem:[#allocation2 + $0x9a] sm:$0xff] }
 0x281   : > { %v1929_v45 = vmul.f32 %v4189_v10, %v1927_v8 }
 0x282   : > { %v1179_v3 = vadd.f32 %v1177_v43, %v1165_v42  ;;  %v1318_v43 = vmul.f32 %v3932_v31, %v1317_v23  ;;  %v1901_v42 = vmul.f32 %v4189_v10, %v1899_v57 }
 0x283   : > { %1792 = vrot.lane.b32.xlu1 %v1788_v20, %s2822_s15  ;;  %v1970_v20 = vstv %s4179_s13 }
 0x284   : > { %v1207_v38 = vadd.f32 %v1202_v18, %v1179_v3  ;;  %1764 = vrot.lane.b32.xlu2 %v1760_v4, %s2821_s6  ;;  %v4174_v18 = vld [vmem:[#allocation2 + $0x92] sm:$0xff] }
 0x285   : > { %v1162_v19 = vpop.permute.xlu1 %1161  ;;  %v1204_v27 = vpop.permute.xlu0 %1203  ;;  %v1900_v28 = vmul.f32 %v4174_v18, %v1899_v57  ;;  %v1928_v37 = vmul.f32 %v4174_v18, %v1927_v8  ;;  %v4196_v4 = vld [vmem:[#allocation2 + $0xb0] sm:$0xff]  ;;  %v2068_v57 = vstv %s2544_s24  ;;  %v2138_v8 = vstv %s2550_s9 }
 0x286   : > { %v1166_v61 = vadd.f32 %v1162_v19, %v1138_v34  ;;  %v1300_v5 = vpop.permute.xlu2 %1299  ;;  %v1972_v58 = vmul.f32 %v4196_v4, %v1970_v20 }
 0x287   : > { %1834 = vrot.lane.b32.xlu0 %v1830_v7, %s2821_s6 }
 0x288   : > { %v1180_v17 = vadd.f32 %v1178_v40, %v1166_v61  ;;  %v1998_v40 = vstv %s4185_s22  ;;  %v4204_v61 = vld [vmem:[#allocation2 + $0xa8] sm:$0xff] }
 0x28a   : > { %v1208_v16 = vadd.f32 %v1204_v27, %v1180_v17  ;;  %v1971_v17 = vmul.f32 %v4204_v61, %v1970_v20 }
 0x28b   : > { %1836 = vrot.lane.b32.xlu1 %v1831_v15, %s2821_s6  ;;  %v2040_v15 = vstv %s2542_s23 }
 0x28c   : > { %v1236_v39 = vadd.f32 %v1232_v62, %v1208_v16  ;;  %1794 = vrot.lane.b32.xlu2 %v1789_v21, %s2822_s15  ;;  %v2041_v21 = vmul.f32 %v4209_v22, %v2040_v15 }
 0x28d   : > { %v1230_v14 = vpop.permute.xlu1 %1229  ;;  %v1272_v1 = vpop.permute.xlu0 %1271 }
 0x28e   : > { %v1235_v24 = vadd.f32 %v1230_v14, %v1207_v38  ;;  %v1345_v63 = vpop.permute.xlu2 %1344  ;;  %v1250_v6 = vadd.f32 %v1248_v11, %v1236_v39  ;;  %v4214_v39 = vld [vmem:[#allocation2 + $0xb1] sm:$0xff]  ;;  %v2000_v14 = vmul.f32 %v4196_v4, %v1998_v40 }
 0x28f   : > { %1864 = vrot.lane.b32.xlu0 %v1859_v30, %s2822_s15 }
 0x290   : > { %v1249_v50 = vadd.f32 %v1247_v60, %v1235_v24  ;;  %v2042_v60 = vmul.f32 %v4214_v39, %v2040_v15  ;;  %v2110_v24 = vstv %s2548_s28 }
 0x292   : > { %v1277_v0 = vadd.f32 %v1272_v1, %v1249_v50  ;;  %v2070_v1 = vmul.f32 %v4214_v39, %v2068_v57  ;;  %v4222_v50 = vld [vmem:[#allocation2 + $0xaa] sm:$0xff] }
 0x293   : > { %1904 = vrot.lane.b32.xlu1 %v1900_v28, %s2821_s6  ;;  %v2111_v11 = vmul.f32 %v4222_v50, %v2110_v24 }
 0x294   : > { %v1305_v13 = vadd.f32 %v1300_v5, %v1277_v0  ;;  %1862 = vrot.lane.b32.xlu2 %v1858_v46, %s2822_s15  ;;  %v1999_v5 = vmul.f32 %v4204_v61, %v1998_v40  ;;  %v2069_v46 = vmul.f32 %v4209_v22, %v2068_v57  ;;  %v2139_v0 = vmul.f32 %v4222_v50, %v2138_v8 }
 0x295   : > { %v1274_v41 = vpop.permute.xlu1 %1273  ;;  %v1302_v9 = vpop.permute.xlu0 %1301 }
 0x296   : > { %v1278_v44 = vadd.f32 %v1274_v41, %v1250_v6  ;;  %v1373_v34 = vpop.permute.xlu2 %1372  ;;  %v1320_v7 = vadd.f32 %v1318_v43, %v1305_v13  ;;  %v4230_v6 = vld [vmem:[#allocation2 + $0xb2] sm:$0xff] }
 0x297   : > { %1932 = vrot.lane.b32.xlu0 %v1928_v37, %s2822_s15  ;;  %v2140_v41 = vmul.f32 %v4230_v6, %v2138_v8  ;;  %v2112_v23 = vmul.f32 %v4230_v6, %v2110_v24 }
 0x298   : > { %v1306_v62 = vadd.f32 %v1302_v9, %v1278_v44 }
 0x29a   : > { %v1321_v51 = vadd.f32 %v1319_v59, %v1306_v62 }
 0x29b   : > { %1934 = vrot.lane.b32.xlu1 %v1929_v45, %s2822_s15 }
 0x29c   : > { %v1349_v3 = vadd.f32 %v1345_v63, %v1321_v51  ;;  %1906 = vrot.lane.b32.xlu2 %v1901_v42, %s2821_s6 }
 0x29d   : > { %v1343_v38 = vpop.permute.xlu1 %1342 }
 0x29e   : > { %v1348_v19 = vadd.f32 %v1343_v38, %v1320_v7  ;;  %v4201_v27 = vpop.permute.xlu2 %1414  ;;  %v1377_v31 = vadd.f32 %v1373_v34, %v1349_v3  ;;  %v1387_v34 = vstv %s2486_s14  ;;  %v1457_v3 = vstv %s2492_s21 }
 0x29f   : > { %1977 = vrot.lane.b32.xlu0 %v1972_v58, %s2821_s6  ;;  %v1388_v59 = vmul.f32 %v3978_v36, %v1387_v34  ;;  %v1389_v62 = vmul.f32 %v3999_v49, %v1387_v34 }
 0x2a1   : > { %v1391_v40 = vadd.f32 %v1389_v62, %v1377_v31 }
 0x2a3   : > { %2003 = vrot.lane.b32.xlu1 %v1999_v5, %s2822_s15  ;;  %v1419_v36 = vadd.f32 %v4201_v27, %v1391_v40 }
 0x2a4   : > { %1975 = vrot.lane.b32.xlu2 %v1971_v17, %s2821_s6 }
 0x2a5   : > { %v1371_v16 = vpop.permute.xlu1 %1370 }
 0x2a6   : > { %v1376_v30 = vadd.f32 %v1371_v16, %v1348_v19  ;;  %v1443_v47 = vpop.permute.xlu2 %1442  ;;  %v1458_v19 = vmul.f32 %v4019_v33, %v1457_v3 }
 0x2a7   : > { %2045 = vrot.lane.b32.xlu0 %v2041_v21, %s2821_s6 }
 0x2a8   : > { %v1390_v43 = vadd.f32 %v1388_v59, %v1376_v30  ;;  %v1447_v30 = vadd.f32 %v1443_v47, %v1419_v36 }
 0x2ab   : > { %2047 = vrot.lane.b32.xlu1 %v2042_v60, %s2821_s6  ;;  %v1459_v60 = vmul.f32 %v4046_v52, %v1457_v3 }
 0x2ac   : > { %2005 = vrot.lane.b32.xlu2 %v2000_v14, %s2822_s15  ;;  %v1528_v14 = vstv %s2498_s25 }
 0x2ad   : > { %v1413_v63 = vpop.permute.xlu1 %1412  ;;  %v1529_v31 = vmul.f32 %v4065_v32, %v1528_v14  ;;  %v1461_v33 = vadd.f32 %v1459_v60, %v1447_v30  ;;  %v1530_v27 = vmul.f32 %v4076_v53, %v1528_v14  ;;  %v1809_v14 = vstv %s2522_s27 }
 0x2ae   : > { %v1485_v28 = vpop.permute.xlu2 %1484  ;;  %v1418_v58 = vadd.f32 %v1413_v63, %v1390_v43 }
 0x2af   : > { %2075 = vrot.lane.b32.xlu0 %v2070_v1, %s2822_s15 }
 0x2b3   : > { %2115 = vrot.lane.b32.xlu1 %v2111_v11, %s2821_s6  ;;  %v1489_v11 = vadd.f32 %v1485_v28, %v1461_v33 }
 0x2b4   : > { %2073 = vrot.lane.b32.xlu2 %v2069_v46, %s2822_s15 }
 0x2b5   : > { %v1441_v37 = vpop.permute.xlu1 %1440 }
 0x2b6   : > { %v1513_v13 = vpop.permute.xlu2 %1512  ;;  %v1446_v38 = vadd.f32 %v1441_v37, %v1418_v58 }
 0x2b7   : > { %2143 = vrot.lane.b32.xlu0 %v2139_v0, %s2822_s15  ;;  %v1517_v46 = vadd.f32 %v1513_v13, %v1489_v11 }
 0x2b8   : > { %v1460_v21 = vadd.f32 %v1458_v19, %v1446_v38  ;;  %v1739_v19 = vstv %s2516_s26 }
 0x2b9   : > { %v1740_v36 = vmul.f32 %v4142_v54, %v1739_v19 }
 0x2bb   : > { %2145 = vrot.lane.b32.xlu1 %v2140_v41, %s2822_s15  ;;  %s2510_s15 = sld [smem:[#allocation6 + $0x7b]] }
 0x2bc   : > { %2117 = vrot.lane.b32.xlu2 %v2112_v23, %s2821_s6  ;;  %s2504_s6 = sld [smem:[#allocation6 + $0x78]] }
 0x2bd   : > { %v1483_v9 = vpop.permute.xlu1 %1482 }
 0x2be   : > { %v1556_v44 = vpop.permute.xlu2 %1555  ;;  %v1488_v57 = vadd.f32 %v1483_v9, %v1460_v21  ;;  %v1532_v9 = vadd.f32 %v1530_v27, %v1517_v46  ;;  %v1811_v46 = vmul.f32 %v4160_v2, %v1809_v14 }
 0x2c0   : > { %v1560_v59 = vadd.f32 %v1556_v44, %v1532_v9 }
 0x2c1   : > { %v1668_v13 = vstv %s2510_s15 }
 0x2c2   : > { %v1598_v37 = vstv %s2504_s6  ;;  %v1670_v40 = vmul.f32 %v4125_v48, %v1668_v13 }
 0x2c3   : > { %v1599_v52 = vmul.f32 %v4098_v29, %v1598_v37  ;;  %v1600_v62 = vmul.f32 %v4092_v26, %v1598_v37  ;;  %v1669_v29 = vmul.f32 %v4108_v35, %v1668_v13  ;;  %v1741_v35 = vmul.f32 %v4134_v25, %v1739_v19 }
 0x2c4   : > { %v1879_v37 = vstv %s2528_s30 }
 0x2c5   : > { %v1511_v45 = vpop.permute.xlu1 %1510  ;;  %v1881_v2 = vmul.f32 %v4189_v10, %v1879_v37 }
 0x2c6   : > { %v2161_v20 = vpop.xlane.xlu0 %2160  ;;  %v1624_v42 = vpop.permute.xlu2 %1623  ;;  %v1516_v24 = vadd.f32 %v1511_v45, %v1488_v57 }
 0x2c7   : > { %v2162_v51 = vrot.slane %v2161_v20, 4 }
 0x2c8   : > { %v1531_v8 = vadd.f32 %v1529_v31, %v1516_v24  ;;  %v1810_v31 = vmul.f32 %v4150_v55, %v1809_v14  ;;  %v1880_v55 = vmul.f32 %v4174_v18, %v1879_v37 }
 0x2c9   : > { %v2163_v7 = vadd.f32 %v2162_v51, %v2161_v20 }
 0x2cb   : > { %v2164_v5 = vrot.slane %v2163_v7, 2 }
 0x2cd   : > { %v1554_v15 = vpop.permute.xlu1 %1553  ;;  %v2165_v17 = vadd.f32 %v2164_v5, %v2163_v7 }
 0x2ce   : > { %v1652_v49 = vpop.permute.xlu2 %1651  ;;  %v1559_v0 = vadd.f32 %v1554_v15, %v1531_v8 }
 0x2cf   : > { %v2166_v16 = vrot.slane %v2165_v17, 1 }
 0x2d1   : > { %v2167_v1 = vadd.f32 %v2166_v16, %v2165_v17 }
 0x2d3   : > { %2557 = vpush %v2167_v1 }
 0x2d5   : > { %v1584_v63 = vpop.permute.xlu1 %1583 }
 0x2d6   : > { %v1696_v41 = vpop.permute.xlu2 %1695  ;;  %v1588_v45 = vadd.f32 %v1584_v63, %v1560_v59 }
 0x2d8   : > { %v1602_v20 = vadd.f32 %v1600_v62, %v1588_v45 }
 0x2d9   : > { %v1582_v47 = vpop.permute.xlu0 %1581 }
 0x2da   : > { %v1587_v23 = vadd.f32 %v1582_v47, %v1559_v0 }
 0x2dc   : > { %v1601_v32 = vadd.f32 %v1599_v52, %v1587_v23 }
 0x2dd   : > { %v1626_v34 = vpop.permute.xlu1 %1625 }
 0x2de   : > { %v1629_v43 = vadd.f32 %v1624_v42, %v1601_v32  ;;  %v1765_v53 = vpop.permute.xlu2 %1764  ;;  %v1630_v3 = vadd.f32 %v1626_v34, %v1602_v20 }
 0x2e0   : > { %v1657_v58 = vadd.f32 %v1652_v49, %v1629_v43  ;;  %v1950_v43 = vstv %s4251_s5 }
 0x2e1   : > { %v1654_v28 = vpop.permute.xlu0 %1653 }
 0x2e2   : > { %v1658_v7 = vadd.f32 %v1654_v28, %v1630_v3  ;;  %v1671_v44 = vadd.f32 %v1669_v29, %v1657_v58  ;;  %v1951_v3 = vmul.f32 %v4204_v61, %v1950_v43 }
 0x2e4   : > { %v1672_v5 = vadd.f32 %v1670_v40, %v1658_v7 }
 0x2e5   : > { %v1694_v51 = vpop.permute.xlu1 %1693 }
 0x2e6   : > { %v1699_v15 = vadd.f32 %v1694_v51, %v1671_v44  ;;  %v1795_v17 = vpop.permute.xlu2 %1794  ;;  %v1700_v21 = vadd.f32 %v1696_v41, %v1672_v5  ;;  %v1952_v44 = vmul.f32 %v4196_v4, %v1950_v43  ;;  %v2090_v4 = vstv %s2546_s12 }
 0x2e9   : > { %v1722_v38 = vpop.permute.xlu0 %1721 }
 0x2ea   : > { %v1727_v42 = vadd.f32 %v1722_v38, %v1699_v15 }
 0x2ec   : > { %v1742_v49 = vadd.f32 %v1740_v36, %v1727_v42  ;;  %v2020_v42 = vstv %s2540_s11 }
 0x2ed   : > { %v1724_v26 = vpop.permute.xlu1 %1723  ;;  %v2021_v36 = vmul.f32 %v4209_v22, %v2020_v42  ;;  %v2092_v22 = vmul.f32 %v4230_v6, %v2090_v4 }
 0x2ee   : > { %v1728_v30 = vadd.f32 %v1724_v26, %v1700_v21  ;;  %v1770_v57 = vadd.f32 %v1765_v53, %v1742_v49  ;;  %v1863_v1 = vpop.permute.xlu2 %1862 }
 0x2f0   : > { %v1743_v48 = vadd.f32 %v1741_v35, %v1728_v30  ;;  %v2022_v35 = vmul.f32 %v4214_v39, %v2020_v42 }
 0x2f1   : > { %v1767_v16 = vpop.permute.xlu0 %1766 }
 0x2f2   : > { %v1771_v63 = vadd.f32 %v1767_v16, %v1743_v48 }
 0x2f4   : > { %v1799_v8 = vadd.f32 %v1795_v17, %v1771_v63 }
 0x2f5   : > { %v1793_v60 = vpop.permute.xlu1 %1792 }
 0x2f6   : > { %v1798_v24 = vadd.f32 %v1793_v60, %v1770_v57  ;;  %v1907_v25 = vpop.permute.xlu2 %1906  ;;  %v1813_v47 = vadd.f32 %v1811_v46, %v1799_v8 }
 0x2f8   : > { %v1812_v11 = vadd.f32 %v1810_v31, %v1798_v24 }
 0x2f9   : > { %v1835_v33 = vpop.permute.xlu0 %1834 }
 0x2fa   : > { %v1840_v27 = vadd.f32 %v1835_v33, %v1812_v11  ;;  %v2091_v33 = vmul.f32 %v4222_v50, %v2090_v4 }
 0x2fc   : > { %v1868_v41 = vadd.f32 %v1863_v1, %v1840_v27 }
 0x2fd   : > { %v1837_v54 = vpop.permute.xlu1 %1836 }
 0x2fe   : > { %v1841_v52 = vadd.f32 %v1837_v54, %v1813_v47  ;;  %v1882_v62 = vadd.f32 %v1880_v55, %v1868_v41  ;;  %v1976_v58 = vpop.permute.xlu2 %1975 }
 0x301   : > { %v1865_v0 = vpop.permute.xlu0 %1864 }
 0x302   : > { %v1869_v34 = vadd.f32 %v1865_v0, %v1841_v52 }
 0x304   : > { %s4253_s8 = spop %2557  ;;  %v1883_v13 = vadd.f32 %v1881_v2, %v1869_v34 }
 0x305   : > { %v2169_v23 = vstv %s4253_s8  ;;  %v1905_v9 = vpop.permute.xlu1 %1904 }
 0x306   : > { %v2170_v59 = vmul.f32 0.00390625, %v2169_v23  ;;  %v1910_v51 = vadd.f32 %v1905_v9, %v1882_v62  ;;  %v2006_v26 = vpop.permute.xlu2 %2005 }
 0x308   : > { %v2171_v32 = vsub.f32 %v4043_v56, %v2170_v59  ;;  %v2172_v45 = vsub.f32 %v4022_v12, %v2170_v59  ;;  %v1911_v56 = vadd.f32 %v1907_v25, %v1883_v13 }
 0x309   : > { %v1933_v28 = vpop.permute.xlu0 %1932 }
 0x30a   : > { %v2173_v53 = vmul.f32 %v2171_v32, %v2171_v32  ;;  %v2174_v20 = vmul.f32 %v2172_v45, %v2172_v45  ;;  %v1938_v18 = vadd.f32 %v1933_v28, %v1910_v51 }
 0x30c   : > { %v2175_v29 = vsel %vm2156_vm7, %v2173_v53, 0.0  ;;  %v2176_v10 = vsel %vm2156_vm7, %v2174_v20, 0.0  ;;  %v1953_v12 = vadd.f32 %v1951_v3, %v1938_v18 }
 0x30d   : > { %v1935_v7 = vpop.permute.xlu1 %1934  ;;  %v2177_v40 = vadd.f32 %v2176_v10, %v2175_v29 }
 0x30e   : > { %v1939_v38 = vadd.f32 %v1935_v7, %v1911_v56  ;;  %v1981_v5 = vadd.f32 %v1976_v58, %v1953_v12  ;;  %v2074_v48 = vpop.permute.xlu2 %2073 }
 0x30f   : > { %2178 = vadd.xlane.f32.xlu2 %v2177_v40 }
 0x310   : > { %v1954_v15 = vadd.f32 %v1952_v44, %v1939_v38 }
 0x311   : > { %v1978_v19 = vpop.permute.xlu0 %1977 }
 0x312   : > { %v1982_v21 = vadd.f32 %v1978_v19, %v1954_v15 }
 0x314   : > { %v2010_v30 = vadd.f32 %v2006_v26, %v1982_v21 }
 0x315   : > { %v2004_v17 = vpop.permute.xlu1 %2003 }
 0x316   : > { %v2009_v61 = vadd.f32 %v2004_v17, %v1981_v5  ;;  %v2024_v14 = vadd.f32 %v2022_v35, %v2010_v30  ;;  %v2118_v39 = vpop.permute.xlu2 %2117 }
 0x318   : > { %v2023_v49 = vadd.f32 %v2021_v36, %v2009_v61 }
 0x319   : > { %v2046_v16 = vpop.permute.xlu0 %2045 }
 0x31a   : > { %v2051_v57 = vadd.f32 %v2046_v16, %v2023_v49 }
 0x31c   : > { %v2079_v24 = vadd.f32 %v2074_v48, %v2051_v57 }
 0x31d   : > { %v2048_v60 = vpop.permute.xlu1 %2047 }
 0x31e   : > { %v2052_v31 = vadd.f32 %v2048_v60, %v2024_v14  ;;  %v2093_v54 = vadd.f32 %v2091_v33, %v2079_v24 }
 0x321   : > { %v2076_v1 = vpop.permute.xlu0 %2075 }
 0x322   : > { %v2080_v63 = vadd.f32 %v2076_v1, %v2052_v31 }
 0x324   : > { %v2094_v46 = vadd.f32 %v2092_v22, %v2080_v63 }
 0x325   : > { %v2116_v11 = vpop.permute.xlu1 %2115 }
 0x326   : > { %v2121_v8 = vadd.f32 %v2116_v11, %v2093_v54  ;;  %v2122_v37 = vadd.f32 %v2118_v39, %v2094_v46 }
 0x329   : > { %v2144_v27 = vpop.permute.xlu0 %2143 }
 0x32a   : > { %v2149_v0 = vadd.f32 %v2144_v27, %v2121_v8 }
 0x32c   : > { %v2189_v25 = vpack.c.bf16 %v2149_v0, %v2149_v0  ;;  %v2194_v50 = vsel %vm2156_vm7, %v2149_v0, 0.0 }
 0x32d   : > { %v2146_v47 = vpop.permute.xlu1 %2145 }
 0x32e   : > { %2551 = vst.msk [vmem:[%s4028_s7 + $0x8] sm:$0xf] %vm2153_vm6, %v2189_v25  ;;  %v2150_v41 = vadd.f32 %v2146_v47, %v2122_v37 }
 0x330   : > { %v2190_v52 = vpack.c.bf16 %v2150_v41, %v2150_v41  ;;  %v2195_v55 = vsel %vm2156_vm7, %v2150_v41, 0.0 }
 0x331   : > { %v2196_v6 = vadd.f32 %v2195_v55, %v2194_v50 }
 0x332   : > { %2552 = vst.msk [vmem:[%s4028_s7 + $0xc] sm:$0xf] %vm2153_vm6, %v2190_v52  ;;  %s2406_s7 = sshll.u32 %s4332_s18, 1 }
 0x333   : > { %2197 = vadd.xlane.f32.xlu0 %v2196_v6  ;;  %s293_s9 = scalar_lea.vmem %s4309_s4, %s2406_s7 }
 0x382   : > { %v2179_v9 = vpop.xlane.xlu2 %2178 }
 0x383   : > { %v2180_v34 = vrot.slane %v2179_v9, 4 }
 0x385   : > { %v2181_v2 = vadd.f32 %v2180_v34, %v2179_v9 }
 0x387   : > { %v2182_v59 = vrot.slane %v2181_v2, 2 }
 0x389   : > { %v2183_v32 = vadd.f32 %v2182_v59, %v2181_v2 }
 0x38b   : > { %v2184_v45 = vrot.slane %v2183_v32, 1 }
 0x38d   : > { %v2185_v62 = vadd.f32 %v2184_v45, %v2183_v32 }
 0x38f   : > { %2559 = vpush %v2185_v62 }
 0x3a6   : > { %v2198_v28 = vpop.xlane.xlu0 %2197 }
 0x3a7   : > { %v2199_v43 = vrot.slane %v2198_v28, 4 }
 0x3a9   : > { %v2200_v13 = vadd.f32 %v2199_v43, %v2198_v28 }
 0x3ab   : > { %v2201_v53 = vrot.slane %v2200_v13, 2 }
 0x3ad   : > { %v2202_v20 = vadd.f32 %v2201_v53, %v2200_v13 }
 0x3af   : > { %v2203_v51 = vrot.slane %v2202_v20, 1 }
 0x3b1   : > { %v2204_v58 = vadd.f32 %v2203_v51, %v2202_v20 }
 0x3b3   : > { %2561 = vpush %v2204_v58 }
 0x3c0   : > { %s2560_s13 = spop %2559 }
 0x3c1   : > { %v2187_v61 = vstv %s2560_s13 }
 0x3c2   : > { %v2188_v49 = vsel %vm408_vm2, %v2169_v23, %v2187_v61 }
 0x3e4   : > { %s2562_s22 = spop %2561 }
 0x3e5   : > { %v2206_v18 = vstv %s2562_s22 }
 0x3e6   : > { %v2207_v3 = vmul.f32 0.00390625, %v2206_v18 }
 0x3e8   : > { %v2208_v29 = vsub.f32 %v2149_v0, %v2207_v3  ;;  %v2209_v10 = vsub.f32 %v2150_v41, %v2207_v3 }
 0x3ea   : > { %v2210_v7 = vmul.f32 %v2208_v29, %v2208_v29  ;;  %v2211_v40 = vmul.f32 %v2209_v10, %v2209_v10 }
 0x3ec   : > { %v2212_v56 = vsel %vm2156_vm7, %v2210_v7, 0.0  ;;  %v2213_v12 = vsel %vm2156_vm7, %v2211_v40, 0.0 }
 0x3ed   : > { %v2214_v38 = vadd.f32 %v2213_v12, %v2212_v56 }
 0x3ef   : > { %2215 = vadd.xlane.f32.xlu1 %v2214_v38 }
 0x462   : > { %v2216_v44 = vpop.xlane.xlu1 %2215 }
 0x463   : > { %v2217_v19 = vrot.slane %v2216_v44, 4 }
 0x465   : > { %v2218_v5 = vadd.f32 %v2217_v19, %v2216_v44 }
 0x467   : > { %v2219_v15 = vrot.slane %v2218_v5, 2 }
 0x469   : > { %v2220_v26 = vadd.f32 %v2219_v15, %v2218_v5 }
 0x46b   : > { %v2221_v17 = vrot.slane %v2220_v26, 1 }
 0x46d   : > { %v2222_v42 = vadd.f32 %v2221_v17, %v2220_v26 }
 0x46f   : > { %2563 = vpush %v2222_v42 }
 0x4a0   : > { %s2564_s23 = spop %2563 }
 0x4a1   : > { %v2224_v36 = vstv %s2564_s23 }
 0x4a2   : > { %v2225_v21 = vsel %vm408_vm2, %v2206_v18, %v2224_v36 }
 0x4a3   : > { %v2227_v16 = vrot.slane %v2225_v21, 7 }
 0x4a5   : > { %v2230_v30 = vsel %vm2229_vm8, %v2188_v49, %v2227_v16 }
 0x4a6   : > { %2232 = vst.msk [vmem:[%s293_s9] sm:$0x3] %vm2231_vm9, %v2230_v30 }
 0x4a7 PF: > { %s20_s20 = sadd.s32 1, %s2813_s20   ;;  %s4324_s15 = smov %s2797_s16 }
 0x4a8   : > { %p17_p2 = scmp.ge.s32.totalorder %s20_s20, 4   ;;  %s4325_s16 = smov %s2801_s17 }
 0x4a9   : > { %s4326_s17 = smov %s2926_s29  ;;  %s4327_s18 = smov %s2809_s19 }
 0x4aa   : > { %s4328_s19 = smov %s4330_s10  ;;  %19 = sbr.rel (!%p17_p2) target bundleno = 6 (0x6), region = 101 }
 0x4af   :  { %2283 = vsyncpa [#allocation4], 1 }
 0x4b0   :  { %2285 = vsyncpa [#allocation4 + $0x1], 1 }
 0x4b1   :  { %2286 = vsyncpa [#allocation5], 1 }
 0x4b2   :  { %2288 = vsyncpa [#allocation5 + $0x1], 1 }
 0x4b3   :  { %2289 = vsyncpa [#allocation8], 1 }

</bundles_post_ra>
